<compile_context>
chip_gen: v6e
topology: v6e:2x2x1
jax: 0.10.0
libtpu: 0.0.40
codegen_flags: <defaults>
</compile_context>

<pallas_src>
import jax
import jax.numpy as jnp
from jax import lax
from jax.experimental import pallas as pl
from jax.experimental.pallas import tpu as pltpu

# ----------------- config (small shapes consistent with the module) -----------------
N = 2                      # batch
S = 8                      # sequence length
VOCAB = 50                 # src_vocab_size
MAX_LEN = 16               # max_length
EMBED = 256                # embed_size
HEADS = 2                  # heads
HEAD_DIM = EMBED // HEADS  # 128 (lane aligned)
FFE = 2                    # forward_expansion
HIDDEN = FFE * EMBED       # 512
NUM_LAYERS = 2
EPS = 1e-5                 # nn.LayerNorm default eps
NS = N * S                 # batch folded into rows
HB = HEADS * N             # folded (head, batch) axis for attention einsums


def _layer_norm(x, g, b):
    mu = jnp.mean(x, axis=-1, keepdims=True)
    d = x - mu
    var = jnp.mean(d * d, axis=-1, keepdims=True)
    return d * lax.rsqrt(var + EPS) * g + b


def _bf16(x):
    return x.astype(jnp.bfloat16)


# ----------------------------- fused Pallas kernel ----------------------------------
def _encoder_kernel(we_ref, pe_ref, wq_ref, wk_ref, wv_ref, wfc_ref,
                    g1_ref, b1_ref, w1_ref, bb1_ref, w2_ref, bb2_ref,
                    g2_ref, b2_ref, emb_ref, out_ref):
    # dropout(word_emb + pos_emb); dropout == identity in eval mode.
    emb = we_ref[...] + pe_ref[...]                       # (N, S, E) f32
    emb_ref[...] = emb
    x = emb.reshape(NS, EMBED)                            # fold batch into rows

    # Restack heads along sublanes ONCE: (NS, E) -> (HEADS*NS, HEAD_DIM); row = h*NS + b*S + s.
    # Both layers consume the same input (reference discards layer outputs), so hoist it.
    xh = _bf16(jnp.concatenate(
        [x[:, h * HEAD_DIM:(h + 1) * HEAD_DIM] for h in range(HEADS)], axis=0))

    for l in range(NUM_LAYERS):                           # static unroll; layers independent
        # ---------- self attention ----------
        q = jnp.dot(xh, wq_ref[l], preferred_element_type=jnp.float32)  # 1/sqrt(E) folded in
        k = jnp.dot(xh, wk_ref[l], preferred_element_type=jnp.float32)
        v = jnp.dot(xh, wv_ref[l], preferred_element_type=jnp.float32)

        # fold (head, batch) into a leading batch axis for batched MXU einsums
        q3 = _bf16(q).reshape(HB, S, HEAD_DIM)
        k3 = _bf16(k).reshape(HB, S, HEAD_DIM)
        v3 = _bf16(v).reshape(HB, S, HEAD_DIM)

        # TODO(synk): reference's masked_fill is not in-place => mask has no effect; skipped.
        s = jnp.einsum('bqd,bkd->bqk', q3, k3,
                       preferred_element_type=jnp.float32)               # (HB, S, S)
        s = s - jnp.max(s, axis=-1, keepdims=True)
        p = jnp.exp(s)
        a = p * pl.reciprocal(jnp.sum(p, axis=-1, keepdims=True), approx=True)
        ctx3 = jnp.einsum('bqk,bkd->bqd', _bf16(a), v3,
                          preferred_element_type=jnp.float32)            # (HB, S, D)

        # un-fold heads back onto lanes: (HB, S, D) -> (NS, E), col = h*D + d
        ctx = jnp.concatenate(
            [ctx3[h * N:(h + 1) * N].reshape(NS, HEAD_DIM) for h in range(HEADS)], axis=1)
        att = jnp.dot(_bf16(ctx), wfc_ref[l], preferred_element_type=jnp.float32)

        # ---------- residual + norm1 + FFN + residual + norm2 (f32 math) ----------
        h1 = _layer_norm(x + att, g1_ref[l], b1_ref[l])
        ff = jnp.maximum(
            jnp.dot(_bf16(h1), w1_ref[l], preferred_element_type=jnp.float32) + bb1_ref[l], 0.0)
        ff2 = jnp.dot(_bf16(ff), w2_ref[l], preferred_element_type=jnp.float32) + bb2_ref[l]
        out_ref[l] = _layer_norm(ff2 + h1, g2_ref[l], b2_ref[l]).reshape(N, S, EMBED)


def _full_spec(shape):
    nd = len(shape)
    return pl.BlockSpec(shape, lambda i, _nd=nd: (0,) * _nd)


def encoder_fused(word_e, pos_e, kp):
    args = (word_e, pos_e, kp["wq_t"], kp["wk_t"], kp["wv_t"], kp["wfc_t"],
            kp["g1"], kp["b1"], kp["w1_t"], kp["b1f"], kp["w2_t"], kp["b2f"],
            kp["g2"], kp["b2"])
    return pl.pallas_call(
        _encoder_kernel,
        out_shape=(jax.ShapeDtypeStruct((N, S, EMBED), jnp.float32),
                   jax.ShapeDtypeStruct((NUM_LAYERS, N, S, EMBED), jnp.float32)),
        grid_spec=pltpu.PrefetchScalarGridSpec(
            num_scalar_prefetch=0,
            grid=(1,),
            in_specs=[_full_spec(a.shape) for a in args],
            out_specs=(_full_spec((N, S, EMBED)),
                       _full_spec((NUM_LAYERS, N, S, EMBED))),
        ),
        compiler_params=pltpu.CompilerParams(
            dimension_semantics=("arbitrary",),
            vmem_limit_bytes=32 * 1024 * 1024),   # explicit budget (total usage ~3 MiB)
    )(*args)


# ----------------------------- parameter init (deterministic) -----------------------
def init_params(key):
    ks = jax.random.split(key, 2 + NUM_LAYERS)

    def w(k, shape, std=0.05):
        # round to bf16-representable values so the bf16 kernel weights match the f32 reference
        return (std * jax.random.normal(k, shape, jnp.float32)
                ).astype(jnp.bfloat16).astype(jnp.float32)

    params = {
        "word_emb": jax.random.normal(ks[0], (VOCAB, EMBED), jnp.float32),
        "pos_emb": jax.random.normal(ks[1], (MAX_LEN, EMBED), jnp.float32),
        "layers": [],
    }
    for l in range(NUM_LAYERS):
        k = jax.random.split(ks[2 + l], 8)
        params["layers"].append({
            "wq": w(k[0], (HEAD_DIM, HEAD_DIM)),
            "wk": w(k[1], (HEAD_DIM, HEAD_DIM)),
            "wv": w(k[2], (HEAD_DIM, HEAD_DIM)),
            "wfc": w(k[3], (EMBED, EMBED)),
            "g1": jnp.ones((EMBED,), jnp.float32),
            "b1": jnp.zeros((EMBED,), jnp.float32),
            "w1": w(k[4], (HIDDEN, EMBED)),
            "b1f": 0.02 * jax.random.normal(k[5], (HIDDEN,), jnp.float32),
            "w2": w(k[6], (EMBED, HIDDEN)),
            "b2f": 0.02 * jax.random.normal(k[7], (EMBED,), jnp.float32),
            "g2": jnp.ones((EMBED,), jnp.float32),
            "b2": jnp.zeros((EMBED,), jnp.float32),
        })
    return params


def prep_kernel_params(params):
    """One-time weight transform: transpose to (in, out), fold 1/sqrt(E) into Wq (exact, 2^-4),
    cast matmul weights to bf16, stack across layers.  Bias / LayerNorm affine stay f32."""
    scale = 1.0 / (EMBED ** 0.5)
    layers = params["layers"]
    st = lambda f: jnp.stack([f(lp) for lp in layers])
    return {
        "wq_t": st(lambda lp: lp["wq"].T * scale).astype(jnp.bfloat16),
        "wk_t": st(lambda lp: lp["wk"].T).astype(jnp.bfloat16),
        "wv_t": st(lambda lp: lp["wv"].T).astype(jnp.bfloat16),
        "wfc_t": st(lambda lp: lp["wfc"].T).astype(jnp.bfloat16),
        "w1_t": st(lambda lp: lp["w1"].T).astype(jnp.bfloat16),
        "w2_t": st(lambda lp: lp["w2"].T).astype(jnp.bfloat16),
        "g1": st(lambda lp: lp["g1"].reshape(1, EMBED)),
        "b1": st(lambda lp: lp["b1"].reshape(1, EMBED)),
        "b1f": st(lambda lp: lp["b1f"].reshape(1, HIDDEN)),
        "b2f": st(lambda lp: lp["b2f"].reshape(1, EMBED)),
        "g2": st(lambda lp: lp["g2"].reshape(1, EMBED)),
        "b2": st(lambda lp: lp["b2"].reshape(1, EMBED)),
    }


# ----------------------------- Encoder forward ---------------------------------------
def encoder_forward(emb_tables, kparams, tokens):
    # Embedding gathers are glue (plain JAX); everything else runs in one fused Pallas kernel.
    word_e = jnp.take(emb_tables["word_emb"], tokens, axis=0)      # (N, S, E)
    pos_e = emb_tables["pos_emb"][:S]                              # (S, E)
    # Reference calls each layer on `out` and discards the result (no reassignment);
    # the kernel still executes every layer and returns their outputs for validation.
    return encoder_fused(word_e, pos_e, kparams)


# ----------------------------- pure-JAX reference (for validation) -------------------
def block_ref(x, lp):
    hp = jax.lax.Precision.HIGHEST
    xh = x.reshape(N, S, HEADS, HEAD_DIM)
    q = jnp.einsum("nshd,od->nsho", xh, lp["wq"], precision=hp)
    k = jnp.einsum("nshd,od->nsho", xh, lp["wk"], precision=hp)
    v = jnp.einsum("nshd,od->nsho", xh, lp["wv"], precision=hp)
    w = jnp.einsum("nqhd,nkhd->nhqk", q, k, precision=hp) / (EMBED ** 0.5)
    a = jax.nn.softmax(w, axis=-1)
    ctx = jnp.einsum("nhqk,nkhd->nqhd", a, v, precision=hp).reshape(N, S, EMBED)
    att = jnp.einsum("nse,oe->nso", ctx, lp["wfc"], precision=hp)
    h1 = _layer_norm(x + att, lp["g1"], lp["b1"])
    ff = jax.nn.relu(jnp.einsum("nse,he->nsh", h1, lp["w1"], precision=hp) + lp["b1f"])
    ff2 = jnp.einsum("nsh,eh->nse", ff, lp["w2"], precision=hp) + lp["b2f"]
    return _layer_norm(ff2 + h1, lp["g2"], lp["b2"])


if __name__ == "__main__":
    key = jax.random.PRNGKey(0)
    pkey, tkey = jax.random.split(key)
    params = init_params(pkey)
    kparams = prep_kernel_params(params)
    emb_tables = {"word_emb": params["word_emb"], "pos_emb": params["pos_emb"]}
    tokens = jax.random.randint(tkey, (N, S), 0, VOCAB, dtype=jnp.int32)

    out, layer_outs = jax.jit(encoder_forward)(emb_tables, kparams, tokens)
    out = jax.block_until_ready(out)
    layer_outs = jax.block_until_ready(layer_outs)

    # validate against pure-JAX reference
    word_e = jnp.take(params["word_emb"], tokens, axis=0)
    out_ref = word_e + params["pos_emb"][:S][None]
    assert jnp.allclose(out, out_ref, atol=1e-5, rtol=1e-5), "embedding mismatch"
    for l, lp in enumerate(params["layers"]):
        lref = block_ref(out_ref, lp)
        maxerr = float(jnp.max(jnp.abs(layer_outs[l] - lref)))
        assert jnp.allclose(layer_outs[l], lref, atol=2e-2, rtol=2e-2), \
            f"transformer block {l} mismatch (max abs err {maxerr})"

    print("KERNEL_OK")
</pallas_src>

<mosaic_0001>
module attributes {stable_mosaic.version = 11 : i64} {
  func.func @_encoder_kernel(%arg0: i32, %arg1: memref<2x8x256xf32, #tpu.memory_space<vmem>>, %arg2: memref<8x256xf32, #tpu.memory_space<vmem>>, %arg3: memref<2x128x128xbf16, #tpu.memory_space<vmem>>, %arg4: memref<2x128x128xbf16, #tpu.memory_space<vmem>>, %arg5: memref<2x128x128xbf16, #tpu.memory_space<vmem>>, %arg6: memref<2x256x256xbf16, #tpu.memory_space<vmem>>, %arg7: memref<2x1x256xf32, #tpu.memory_space<vmem>>, %arg8: memref<2x1x256xf32, #tpu.memory_space<vmem>>, %arg9: memref<2x256x512xbf16, #tpu.memory_space<vmem>>, %arg10: memref<2x1x512xf32, #tpu.memory_space<vmem>>, %arg11: memref<2x512x256xbf16, #tpu.memory_space<vmem>>, %arg12: memref<2x1x256xf32, #tpu.memory_space<vmem>>, %arg13: memref<2x1x256xf32, #tpu.memory_space<vmem>>, %arg14: memref<2x1x256xf32, #tpu.memory_space<vmem>>, %arg15: memref<2x8x256xf32, #tpu.memory_space<vmem>>, %arg16: memref<2x2x8x256xf32, #tpu.memory_space<vmem>>) attributes {dimension_semantics = [#tpu.dimension_semantics<arbitrary>], iteration_bounds = array<i64: 1>, scalar_prefetch = 0 : i64, scratch_operands = 0 : i64, tpu.core_type = #tpu.core_type<tc>, window_params = [{pipeline_mode = #tpu.pipeline_mode<synchronous>, transform_indices = @transform_0, window_bounds = array<i64: 2, 8, 256>}, {pipeline_mode = #tpu.pipeline_mode<synchronous>, transform_indices = @transform_1, window_bounds = array<i64: 8, 256>}, {pipeline_mode = #tpu.pipeline_mode<synchronous>, transform_indices = @transform_2, window_bounds = array<i64: 2, 128, 128>}, {pipeline_mode = #tpu.pipeline_mode<synchronous>, transform_indices = @transform_3, window_bounds = array<i64: 2, 128, 128>}, {pipeline_mode = #tpu.pipeline_mode<synchronous>, transform_indices = @transform_4, window_bounds = array<i64: 2, 128, 128>}, {pipeline_mode = #tpu.pipeline_mode<synchronous>, transform_indices = @transform_5, window_bounds = array<i64: 2, 256, 256>}, {pipeline_mode = #tpu.pipeline_mode<synchronous>, transform_indices = @transform_6, window_bounds = array<i64: 2, 1, 256>}, {pipeline_mode = #tpu.pipeline_mode<synchronous>, transform_indices = @transform_7, window_bounds = array<i64: 2, 1, 256>}, {pipeline_mode = #tpu.pipeline_mode<synchronous>, transform_indices = @transform_8, window_bounds = array<i64: 2, 256, 512>}, {pipeline_mode = #tpu.pipeline_mode<synchronous>, transform_indices = @transform_9, window_bounds = array<i64: 2, 1, 512>}, {pipeline_mode = #tpu.pipeline_mode<synchronous>, transform_indices = @transform_10, window_bounds = array<i64: 2, 512, 256>}, {pipeline_mode = #tpu.pipeline_mode<synchronous>, transform_indices = @transform_11, window_bounds = array<i64: 2, 1, 256>}, {pipeline_mode = #tpu.pipeline_mode<synchronous>, transform_indices = @transform_12, window_bounds = array<i64: 2, 1, 256>}, {pipeline_mode = #tpu.pipeline_mode<synchronous>, transform_indices = @transform_13, window_bounds = array<i64: 2, 1, 256>}, {pipeline_mode = #tpu.pipeline_mode<synchronous>, transform_indices = @transform_14, window_bounds = array<i64: 2, 8, 256>}, {pipeline_mode = #tpu.pipeline_mode<synchronous>, transform_indices = @transform_15, window_bounds = array<i64: 2, 2, 8, 256>}]} {
    %c0 = arith.constant 0 : index
    %c0_0 = arith.constant 0 : index
    %c0_1 = arith.constant 0 : index
    %0 = vector.load %arg1[%c0, %c0_0, %c0_1] : memref<2x8x256xf32, #tpu.memory_space<vmem>>, vector<2x8x256xf32>
    %c0_2 = arith.constant 0 : index
    %c0_3 = arith.constant 0 : index
    %1 = vector.load %arg2[%c0_2, %c0_3] : memref<8x256xf32, #tpu.memory_space<vmem>>, vector<8x256xf32>
    %2 = vector.shape_cast %1 : vector<8x256xf32> to vector<1x8x256xf32>
    %3 = vector.broadcast %2 : vector<1x8x256xf32> to vector<2x8x256xf32>
    %4 = arith.addf %0, %3 : vector<2x8x256xf32>
    %c0_4 = arith.constant 0 : index
    %c0_5 = arith.constant 0 : index
    %c0_6 = arith.constant 0 : index
    %5 = vector.load %arg15[%c0_4, %c0_5, %c0_6] : memref<2x8x256xf32, #tpu.memory_space<vmem>>, vector<2x8x256xf32>
    tpu.vector_store %arg15[%c0_4, %c0_5, %c0_6], %4 {strides = array<i32>} : memref<2x8x256xf32, #tpu.memory_space<vmem>>, vector<2x8x256xf32>,
    %6 = vector.shape_cast %4 : vector<2x8x256xf32> to vector<16x256xf32>
    %7 = vector.extract_strided_slice %6 {offsets = [0, 0], sizes = [16, 128], strides = [1, 1]} : vector<16x256xf32> to vector<16x128xf32>
    %8 = vector.extract_strided_slice %6 {offsets = [0, 128], sizes = [16, 128], strides = [1, 1]} : vector<16x256xf32> to vector<16x128xf32>
    %9 = tpu.concatenate %7, %8 in 0 : vector<16x128xf32>, vector<16x128xf32> -> vector<32x128xf32>
    %10 = arith.truncf %9 : vector<32x128xf32> to vector<32x128xbf16>
    %c0_7 = arith.constant 0 : index
    %c0_8 = arith.constant 0 : index
    %c0_9 = arith.constant 0 : index
    %11 = vector.load %arg3[%c0_7, %c0_8, %c0_9] : memref<2x128x128xbf16, #tpu.memory_space<vmem>>, vector<1x128x128xbf16>
    %12 = vector.shape_cast %11 : vector<1x128x128xbf16> to vector<128x128xbf16>
    %cst = arith.constant dense<0.000000e+00> : vector<32x128xf32>
    %13 = tpu.matmul %10, %12, %cst {dimension_numbers = #tpu.dot_dimension_numbers<[1], [0], [0], [1], [0, 0, 1, 1], [], []>} : vector<32x128xbf16>, vector<128x128xbf16>, vector<32x128xf32> -> vector<32x128xf32>
    %c0_10 = arith.constant 0 : index
    %c0_11 = arith.constant 0 : index
    %c0_12 = arith.constant 0 : index
    %14 = vector.load %arg4[%c0_10, %c0_11, %c0_12] : memref<2x128x128xbf16, #tpu.memory_space<vmem>>, vector<1x128x128xbf16>
    %15 = vector.shape_cast %14 : vector<1x128x128xbf16> to vector<128x128xbf16>
    %cst_13 = arith.constant dense<0.000000e+00> : vector<32x128xf32>
    %16 = tpu.matmul %10, %15, %cst_13 {dimension_numbers = #tpu.dot_dimension_numbers<[1], [0], [0], [1], [0, 0, 1, 1], [], []>} : vector<32x128xbf16>, vector<128x128xbf16>, vector<32x128xf32> -> vector<32x128xf32>
    %c0_14 = arith.constant 0 : index
    %c0_15 = arith.constant 0 : index
    %c0_16 = arith.constant 0 : index
    %17 = vector.load %arg5[%c0_14, %c0_15, %c0_16] : memref<2x128x128xbf16, #tpu.memory_space<vmem>>, vector<1x128x128xbf16>
    %18 = vector.shape_cast %17 : vector<1x128x128xbf16> to vector<128x128xbf16>
    %cst_17 = arith.constant dense<0.000000e+00> : vector<32x128xf32>
    %19 = tpu.matmul %10, %18, %cst_17 {dimension_numbers = #tpu.dot_dimension_numbers<[1], [0], [0], [1], [0, 0, 1, 1], [], []>} : vector<32x128xbf16>, vector<128x128xbf16>, vector<32x128xf32> -> vector<32x128xf32>
    %20 = arith.truncf %13 : vector<32x128xf32> to vector<32x128xbf16>
    %21 = vector.shape_cast %20 : vector<32x128xbf16> to vector<4x8x128xbf16>
    %22 = arith.truncf %16 : vector<32x128xf32> to vector<32x128xbf16>
    %23 = vector.shape_cast %22 : vector<32x128xbf16> to vector<4x8x128xbf16>
    %24 = arith.truncf %19 : vector<32x128xf32> to vector<32x128xbf16>
    %25 = vector.shape_cast %24 : vector<32x128xbf16> to vector<4x8x128xbf16>
    "tpu.trace_start"() <{level = 10 : i32, message = "bqd,bkd->bqk"}> : () -> ()
    %cst_18 = arith.constant dense<0.000000e+00> : vector<4x8x8xf32>
    %26 = tpu.matmul %21, %23, %cst_18 {dimension_numbers = #tpu.dot_dimension_numbers<[2], [2], [1], [1], [0, 0, 0, 1, 1, 1], [0], [0]>} : vector<4x8x128xbf16>, vector<4x8x128xbf16>, vector<4x8x8xf32> -> vector<4x8x8xf32>
    "tpu.trace_stop"() : () -> ()
    %cst_19 = arith.constant dense<0xFF800000> : vector<4x8xf32>
    %27 = vector.multi_reduction <maximumf>, %26, %cst_19 [2] : vector<4x8x8xf32> to vector<4x8xf32>
    %28 = vector.shape_cast %27 : vector<4x8xf32> to vector<4x8x1xf32>
    %29 = vector.broadcast %28 : vector<4x8x1xf32> to vector<4x8x8xf32>
    %30 = arith.subf %26, %29 : vector<4x8x8xf32>
    %31 = math.exp %30 : vector<4x8x8xf32>
    %cst_20 = arith.constant dense<0.000000e+00> : vector<4x8xf32>
    %32 = vector.multi_reduction <add>, %31, %cst_20 [2] : vector<4x8x8xf32> to vector<4x8xf32>
    %33 = vector.shape_cast %32 : vector<4x8xf32> to vector<4x8x1xf32>
    %34 = tpu.reciprocal %33 {approx = true} : vector<4x8x1xf32> -> vector<4x8x1xf32>
    %35 = vector.broadcast %34 : vector<4x8x1xf32> to vector<4x8x8xf32>
    %36 = arith.mulf %31, %35 : vector<4x8x8xf32>
    %37 = arith.truncf %36 : vector<4x8x8xf32> to vector<4x8x8xbf16>
    "tpu.trace_start"() <{level = 10 : i32, message = "bqk,bkd->bqd"}> : () -> ()
    %cst_21 = arith.constant dense<0.000000e+00> : vector<4x8x128xf32>
    %38 = tpu.matmul %37, %25, %cst_21 {dimension_numbers = #tpu.dot_dimension_numbers<[2], [1], [1], [2], [0, 0, 0, 1, 1, 2], [0], [0]>} : vector<4x8x8xbf16>, vector<4x8x128xbf16>, vector<4x8x128xf32> -> vector<4x8x128xf32>
    "tpu.trace_stop"() : () -> ()
    %39 = vector.extract_strided_slice %38 {offsets = [0, 0, 0], sizes = [2, 8, 128], strides = [1, 1, 1]} : vector<4x8x128xf32> to vector<2x8x128xf32>
    %40 = vector.shape_cast %39 : vector<2x8x128xf32> to vector<16x128xf32>
    %41 = vector.extract_strided_slice %38 {offsets = [2, 0, 0], sizes = [2, 8, 128], strides = [1, 1, 1]} : vector<4x8x128xf32> to vector<2x8x128xf32>
    %42 = vector.shape_cast %41 : vector<2x8x128xf32> to vector<16x128xf32>
    %43 = tpu.concatenate %40, %42 in 1 : vector<16x128xf32>, vector<16x128xf32> -> vector<16x256xf32>
    %44 = arith.truncf %43 : vector<16x256xf32> to vector<16x256xbf16>
    %c0_22 = arith.constant 0 : index
    %c0_23 = arith.constant 0 : index
    %c0_24 = arith.constant 0 : index
    %45 = vector.load %arg6[%c0_22, %c0_23, %c0_24] : memref<2x256x256xbf16, #tpu.memory_space<vmem>>, vector<1x256x256xbf16>
    %46 = vector.shape_cast %45 : vector<1x256x256xbf16> to vector<256x256xbf16>
    %cst_25 = arith.constant dense<0.000000e+00> : vector<16x256xf32>
    %47 = tpu.matmul %44, %46, %cst_25 {dimension_numbers = #tpu.dot_dimension_numbers<[1], [0], [0], [1], [0, 0, 1, 1], [], []>} : vector<16x256xbf16>, vector<256x256xbf16>, vector<16x256xf32> -> vector<16x256xf32>
    %48 = arith.addf %6, %47 : vector<16x256xf32>
    %c0_26 = arith.constant 0 : index
    %c0_27 = arith.constant 0 : index
    %c0_28 = arith.constant 0 : index
    %49 = vector.load %arg7[%c0_26, %c0_27, %c0_28] : memref<2x1x256xf32, #tpu.memory_space<vmem>>, vector<1x1x256xf32>
    %50 = vector.shape_cast %49 : vector<1x1x256xf32> to vector<1x256xf32>
    %c0_29 = arith.constant 0 : index
    %c0_30 = arith.constant 0 : index
    %c0_31 = arith.constant 0 : index
    %51 = vector.load %arg8[%c0_29, %c0_30, %c0_31] : memref<2x1x256xf32, #tpu.memory_space<vmem>>, vector<1x1x256xf32>
    %52 = vector.shape_cast %51 : vector<1x1x256xf32> to vector<1x256xf32>
    %cst_32 = arith.constant dense<0.000000e+00> : vector<16xf32>
    %53 = vector.multi_reduction <add>, %48, %cst_32 [1] : vector<16x256xf32> to vector<16xf32>
    %54 = vector.shape_cast %53 : vector<16xf32> to vector<16x1xf32>
    %cst_33 = arith.constant 2.560000e+02 : f32
    %55 = vector.broadcast %cst_33 : f32 to vector<16x1xf32>
    %56 = arith.divf %54, %55 : vector<16x1xf32>
    %57 = vector.broadcast %56 : vector<16x1xf32> to vector<16x256xf32>
    %58 = arith.subf %48, %57 : vector<16x256xf32>
    %59 = arith.mulf %58, %58 : vector<16x256xf32>
    %cst_34 = arith.constant dense<0.000000e+00> : vector<16xf32>
    %60 = vector.multi_reduction <add>, %59, %cst_34 [1] : vector<16x256xf32> to vector<16xf32>
    %61 = vector.shape_cast %60 : vector<16xf32> to vector<16x1xf32>
    %cst_35 = arith.constant 2.560000e+02 : f32
    %62 = vector.broadcast %cst_35 : f32 to vector<16x1xf32>
    %63 = arith.divf %61, %62 : vector<16x1xf32>
    %cst_36 = arith.constant 9.99999974E-6 : f32
    %64 = vector.broadcast %cst_36 : f32 to vector<16x1xf32>
    %65 = arith.addf %63, %64 : vector<16x1xf32>
    %66 = math.rsqrt %65 : vector<16x1xf32>
    %67 = vector.broadcast %66 : vector<16x1xf32> to vector<16x256xf32>
    %68 = arith.mulf %58, %67 : vector<16x256xf32>
    %69 = vector.broadcast %50 : vector<1x256xf32> to vector<16x256xf32>
    %70 = arith.mulf %68, %69 : vector<16x256xf32>
    %71 = vector.broadcast %52 : vector<1x256xf32> to vector<16x256xf32>
    %72 = arith.addf %70, %71 : vector<16x256xf32>
    %73 = arith.truncf %72 : vector<16x256xf32> to vector<16x256xbf16>
    %c0_37 = arith.constant 0 : index
    %c0_38 = arith.constant 0 : index
    %c0_39 = arith.constant 0 : index
    %74 = vector.load %arg9[%c0_37, %c0_38, %c0_39] : memref<2x256x512xbf16, #tpu.memory_space<vmem>>, vector<1x256x512xbf16>
    %75 = vector.shape_cast %74 : vector<1x256x512xbf16> to vector<256x512xbf16>
    %cst_40 = arith.constant dense<0.000000e+00> : vector<16x512xf32>
    %76 = tpu.matmul %73, %75, %cst_40 {dimension_numbers = #tpu.dot_dimension_numbers<[1], [0], [0], [1], [0, 0, 1, 1], [], []>} : vector<16x256xbf16>, vector<256x512xbf16>, vector<16x512xf32> -> vector<16x512xf32>
    %c0_41 = arith.constant 0 : index
    %c0_42 = arith.constant 0 : index
    %c0_43 = arith.constant 0 : index
    %77 = vector.load %arg10[%c0_41, %c0_42, %c0_43] : memref<2x1x512xf32, #tpu.memory_space<vmem>>, vector<1x1x512xf32>
    %78 = vector.shape_cast %77 : vector<1x1x512xf32> to vector<1x512xf32>
    %79 = vector.broadcast %78 : vector<1x512xf32> to vector<16x512xf32>
    %80 = arith.addf %76, %79 : vector<16x512xf32>
    %cst_44 = arith.constant 0.000000e+00 : f32
    %81 = vector.broadcast %cst_44 : f32 to vector<16x512xf32>
    %82 = arith.maximumf %80, %81 : vector<16x512xf32>
    %83 = arith.truncf %82 : vector<16x512xf32> to vector<16x512xbf16>
    %c0_45 = arith.constant 0 : index
    %c0_46 = arith.constant 0 : index
    %c0_47 = arith.constant 0 : index
    %84 = vector.load %arg11[%c0_45, %c0_46, %c0_47] : memref<2x512x256xbf16, #tpu.memory_space<vmem>>, vector<1x512x256xbf16>
    %85 = vector.shape_cast %84 : vector<1x512x256xbf16> to vector<512x256xbf16>
    %cst_48 = arith.constant dense<0.000000e+00> : vector<16x256xf32>
    %86 = tpu.matmul %83, %85, %cst_48 {dimension_numbers = #tpu.dot_dimension_numbers<[1], [0], [0], [1], [0, 0, 1, 1], [], []>} : vector<16x512xbf16>, vector<512x256xbf16>, vector<16x256xf32> -> vector<16x256xf32>
    %c0_49 = arith.constant 0 : index
    %c0_50 = arith.constant 0 : index
    %c0_51 = arith.constant 0 : index
    %87 = vector.load %arg12[%c0_49, %c0_50, %c0_51] : memref<2x1x256xf32, #tpu.memory_space<vmem>>, vector<1x1x256xf32>
    %88 = vector.shape_cast %87 : vector<1x1x256xf32> to vector<1x256xf32>
    %89 = vector.broadcast %88 : vector<1x256xf32> to vector<16x256xf32>
    %90 = arith.addf %86, %89 : vector<16x256xf32>
    %91 = arith.addf %90, %72 : vector<16x256xf32>
    %c0_52 = arith.constant 0 : index
    %c0_53 = arith.constant 0 : index
    %c0_54 = arith.constant 0 : index
    %92 = vector.load %arg13[%c0_52, %c0_53, %c0_54] : memref<2x1x256xf32, #tpu.memory_space<vmem>>, vector<1x1x256xf32>
    %93 = vector.shape_cast %92 : vector<1x1x256xf32> to vector<1x256xf32>
    %c0_55 = arith.constant 0 : index
    %c0_56 = arith.constant 0 : index
    %c0_57 = arith.constant 0 : index
    %94 = vector.load %arg14[%c0_55, %c0_56, %c0_57] : memref<2x1x256xf32, #tpu.memory_space<vmem>>, vector<1x1x256xf32>
    %95 = vector.shape_cast %94 : vector<1x1x256xf32> to vector<1x256xf32>
    %cst_58 = arith.constant dense<0.000000e+00> : vector<16xf32>
    %96 = vector.multi_reduction <add>, %91, %cst_58 [1] : vector<16x256xf32> to vector<16xf32>
    %97 = vector.shape_cast %96 : vector<16xf32> to vector<16x1xf32>
    %cst_59 = arith.constant 2.560000e+02 : f32
    %98 = vector.broadcast %cst_59 : f32 to vector<16x1xf32>
    %99 = arith.divf %97, %98 : vector<16x1xf32>
    %100 = vector.broadcast %99 : vector<16x1xf32> to vector<16x256xf32>
    %101 = arith.subf %91, %100 : vector<16x256xf32>
    %102 = arith.mulf %101, %101 : vector<16x256xf32>
    %cst_60 = arith.constant dense<0.000000e+00> : vector<16xf32>
    %103 = vector.multi_reduction <add>, %102, %cst_60 [1] : vector<16x256xf32> to vector<16xf32>
    %104 = vector.shape_cast %103 : vector<16xf32> to vector<16x1xf32>
    %cst_61 = arith.constant 2.560000e+02 : f32
    %105 = vector.broadcast %cst_61 : f32 to vector<16x1xf32>
    %106 = arith.divf %104, %105 : vector<16x1xf32>
    %cst_62 = arith.constant 9.99999974E-6 : f32
    %107 = vector.broadcast %cst_62 : f32 to vector<16x1xf32>
    %108 = arith.addf %106, %107 : vector<16x1xf32>
    %109 = math.rsqrt %108 : vector<16x1xf32>
    %110 = vector.broadcast %109 : vector<16x1xf32> to vector<16x256xf32>
    %111 = arith.mulf %101, %110 : vector<16x256xf32>
    %112 = vector.broadcast %93 : vector<1x256xf32> to vector<16x256xf32>
    %113 = arith.mulf %111, %112 : vector<16x256xf32>
    %114 = vector.broadcast %95 : vector<1x256xf32> to vector<16x256xf32>
    %115 = arith.addf %113, %114 : vector<16x256xf32>
    %116 = vector.shape_cast %115 : vector<16x256xf32> to vector<2x8x256xf32>
    %c0_63 = arith.constant 0 : index
    %c0_64 = arith.constant 0 : index
    %c0_65 = arith.constant 0 : index
    %c0_66 = arith.constant 0 : index
    %117 = vector.load %arg16[%c0_63, %c0_64, %c0_65, %c0_66] : memref<2x2x8x256xf32, #tpu.memory_space<vmem>>, vector<1x2x8x256xf32>
    %118 = vector.shape_cast %117 : vector<1x2x8x256xf32> to vector<2x8x256xf32>
    %119 = vector.shape_cast %116 : vector<2x8x256xf32> to vector<1x2x8x256xf32>
    tpu.vector_store %arg16[%c0_63, %c0_64, %c0_65, %c0_66], %119 {strides = array<i32>} : memref<2x2x8x256xf32, #tpu.memory_space<vmem>>, vector<1x2x8x256xf32>,
    %c1 = arith.constant 1 : index
    %c0_67 = arith.constant 0 : index
    %c0_68 = arith.constant 0 : index
    %120 = vector.load %arg3[%c1, %c0_67, %c0_68] : memref<2x128x128xbf16, #tpu.memory_space<vmem>>, vector<1x128x128xbf16>
    %121 = vector.shape_cast %120 : vector<1x128x128xbf16> to vector<128x128xbf16>
    %cst_69 = arith.constant dense<0.000000e+00> : vector<32x128xf32>
    %122 = tpu.matmul %10, %121, %cst_69 {dimension_numbers = #tpu.dot_dimension_numbers<[1], [0], [0], [1], [0, 0, 1, 1], [], []>} : vector<32x128xbf16>, vector<128x128xbf16>, vector<32x128xf32> -> vector<32x128xf32>
    %c1_70 = arith.constant 1 : index
    %c0_71 = arith.constant 0 : index
    %c0_72 = arith.constant 0 : index
    %123 = vector.load %arg4[%c1_70, %c0_71, %c0_72] : memref<2x128x128xbf16, #tpu.memory_space<vmem>>, vector<1x128x128xbf16>
    %124 = vector.shape_cast %123 : vector<1x128x128xbf16> to vector<128x128xbf16>
    %cst_73 = arith.constant dense<0.000000e+00> : vector<32x128xf32>
    %125 = tpu.matmul %10, %124, %cst_73 {dimension_numbers = #tpu.dot_dimension_numbers<[1], [0], [0], [1], [0, 0, 1, 1], [], []>} : vector<32x128xbf16>, vector<128x128xbf16>, vector<32x128xf32> -> vector<32x128xf32>
    %c1_74 = arith.constant 1 : index
    %c0_75 = arith.constant 0 : index
    %c0_76 = arith.constant 0 : index
    %126 = vector.load %arg5[%c1_74, %c0_75, %c0_76] : memref<2x128x128xbf16, #tpu.memory_space<vmem>>, vector<1x128x128xbf16>
    %127 = vector.shape_cast %126 : vector<1x128x128xbf16> to vector<128x128xbf16>
    %cst_77 = arith.constant dense<0.000000e+00> : vector<32x128xf32>
    %128 = tpu.matmul %10, %127, %cst_77 {dimension_numbers = #tpu.dot_dimension_numbers<[1], [0], [0], [1], [0, 0, 1, 1], [], []>} : vector<32x128xbf16>, vector<128x128xbf16>, vector<32x128xf32> -> vector<32x128xf32>
    %129 = arith.truncf %122 : vector<32x128xf32> to vector<32x128xbf16>
    %130 = vector.shape_cast %129 : vector<32x128xbf16> to vector<4x8x128xbf16>
    %131 = arith.truncf %125 : vector<32x128xf32> to vector<32x128xbf16>
    %132 = vector.shape_cast %131 : vector<32x128xbf16> to vector<4x8x128xbf16>
    %133 = arith.truncf %128 : vector<32x128xf32> to vector<32x128xbf16>
    %134 = vector.shape_cast %133 : vector<32x128xbf16> to vector<4x8x128xbf16>
    "tpu.trace_start"() <{level = 10 : i32, message = "bqd,bkd->bqk"}> : () -> ()
    %cst_78 = arith.constant dense<0.000000e+00> : vector<4x8x8xf32>
    %135 = tpu.matmul %130, %132, %cst_78 {dimension_numbers = #tpu.dot_dimension_numbers<[2], [2], [1], [1], [0, 0, 0, 1, 1, 1], [0], [0]>} : vector<4x8x128xbf16>, vector<4x8x128xbf16>, vector<4x8x8xf32> -> vector<4x8x8xf32>
    "tpu.trace_stop"() : () -> ()
    %cst_79 = arith.constant dense<0xFF800000> : vector<4x8xf32>
    %136 = vector.multi_reduction <maximumf>, %135, %cst_79 [2] : vector<4x8x8xf32> to vector<4x8xf32>
    %137 = vector.shape_cast %136 : vector<4x8xf32> to vector<4x8x1xf32>
    %138 = vector.broadcast %137 : vector<4x8x1xf32> to vector<4x8x8xf32>
    %139 = arith.subf %135, %138 : vector<4x8x8xf32>
    %140 = math.exp %139 : vector<4x8x8xf32>
    %cst_80 = arith.constant dense<0.000000e+00> : vector<4x8xf32>
    %141 = vector.multi_reduction <add>, %140, %cst_80 [2] : vector<4x8x8xf32> to vector<4x8xf32>
    %142 = vector.shape_cast %141 : vector<4x8xf32> to vector<4x8x1xf32>
    %143 = tpu.reciprocal %142 {approx = true} : vector<4x8x1xf32> -> vector<4x8x1xf32>
    %144 = vector.broadcast %143 : vector<4x8x1xf32> to vector<4x8x8xf32>
    %145 = arith.mulf %140, %144 : vector<4x8x8xf32>
    %146 = arith.truncf %145 : vector<4x8x8xf32> to vector<4x8x8xbf16>
    "tpu.trace_start"() <{level = 10 : i32, message = "bqk,bkd->bqd"}> : () -> ()
    %cst_81 = arith.constant dense<0.000000e+00> : vector<4x8x128xf32>
    %147 = tpu.matmul %146, %134, %cst_81 {dimension_numbers = #tpu.dot_dimension_numbers<[2], [1], [1], [2], [0, 0, 0, 1, 1, 2], [0], [0]>} : vector<4x8x8xbf16>, vector<4x8x128xbf16>, vector<4x8x128xf32> -> vector<4x8x128xf32>
    "tpu.trace_stop"() : () -> ()
    %148 = vector.extract_strided_slice %147 {offsets = [0, 0, 0], sizes = [2, 8, 128], strides = [1, 1, 1]} : vector<4x8x128xf32> to vector<2x8x128xf32>
    %149 = vector.shape_cast %148 : vector<2x8x128xf32> to vector<16x128xf32>
    %150 = vector.extract_strided_slice %147 {offsets = [2, 0, 0], sizes = [2, 8, 128], strides = [1, 1, 1]} : vector<4x8x128xf32> to vector<2x8x128xf32>
    %151 = vector.shape_cast %150 : vector<2x8x128xf32> to vector<16x128xf32>
    %152 = tpu.concatenate %149, %151 in 1 : vector<16x128xf32>, vector<16x128xf32> -> vector<16x256xf32>
    %153 = arith.truncf %152 : vector<16x256xf32> to vector<16x256xbf16>
    %c1_82 = arith.constant 1 : index
    %c0_83 = arith.constant 0 : index
    %c0_84 = arith.constant 0 : index
    %154 = vector.load %arg6[%c1_82, %c0_83, %c0_84] : memref<2x256x256xbf16, #tpu.memory_space<vmem>>, vector<1x256x256xbf16>
    %155 = vector.shape_cast %154 : vector<1x256x256xbf16> to vector<256x256xbf16>
    %cst_85 = arith.constant dense<0.000000e+00> : vector<16x256xf32>
    %156 = tpu.matmul %153, %155, %cst_85 {dimension_numbers = #tpu.dot_dimension_numbers<[1], [0], [0], [1], [0, 0, 1, 1], [], []>} : vector<16x256xbf16>, vector<256x256xbf16>, vector<16x256xf32> -> vector<16x256xf32>
    %157 = arith.addf %6, %156 : vector<16x256xf32>
    %c1_86 = arith.constant 1 : index
    %c0_87 = arith.constant 0 : index
    %c0_88 = arith.constant 0 : index
    %158 = vector.load %arg7[%c1_86, %c0_87, %c0_88] : memref<2x1x256xf32, #tpu.memory_space<vmem>>, vector<1x1x256xf32>
    %159 = vector.shape_cast %158 : vector<1x1x256xf32> to vector<1x256xf32>
    %c1_89 = arith.constant 1 : index
    %c0_90 = arith.constant 0 : index
    %c0_91 = arith.constant 0 : index
    %160 = vector.load %arg8[%c1_89, %c0_90, %c0_91] : memref<2x1x256xf32, #tpu.memory_space<vmem>>, vector<1x1x256xf32>
    %161 = vector.shape_cast %160 : vector<1x1x256xf32> to vector<1x256xf32>
    %cst_92 = arith.constant dense<0.000000e+00> : vector<16xf32>
    %162 = vector.multi_reduction <add>, %157, %cst_92 [1] : vector<16x256xf32> to vector<16xf32>
    %163 = vector.shape_cast %162 : vector<16xf32> to vector<16x1xf32>
    %cst_93 = arith.constant 2.560000e+02 : f32
    %164 = vector.broadcast %cst_93 : f32 to vector<16x1xf32>
    %165 = arith.divf %163, %164 : vector<16x1xf32>
    %166 = vector.broadcast %165 : vector<16x1xf32> to vector<16x256xf32>
    %167 = arith.subf %157, %166 : vector<16x256xf32>
    %168 = arith.mulf %167, %167 : vector<16x256xf32>
    %cst_94 = arith.constant dense<0.000000e+00> : vector<16xf32>
    %169 = vector.multi_reduction <add>, %168, %cst_94 [1] : vector<16x256xf32> to vector<16xf32>
    %170 = vector.shape_cast %169 : vector<16xf32> to vector<16x1xf32>
    %cst_95 = arith.constant 2.560000e+02 : f32
    %171 = vector.broadcast %cst_95 : f32 to vector<16x1xf32>
    %172 = arith.divf %170, %171 : vector<16x1xf32>
    %cst_96 = arith.constant 9.99999974E-6 : f32
    %173 = vector.broadcast %cst_96 : f32 to vector<16x1xf32>
    %174 = arith.addf %172, %173 : vector<16x1xf32>
    %175 = math.rsqrt %174 : vector<16x1xf32>
    %176 = vector.broadcast %175 : vector<16x1xf32> to vector<16x256xf32>
    %177 = arith.mulf %167, %176 : vector<16x256xf32>
    %178 = vector.broadcast %159 : vector<1x256xf32> to vector<16x256xf32>
    %179 = arith.mulf %177, %178 : vector<16x256xf32>
    %180 = vector.broadcast %161 : vector<1x256xf32> to vector<16x256xf32>
    %181 = arith.addf %179, %180 : vector<16x256xf32>
    %182 = arith.truncf %181 : vector<16x256xf32> to vector<16x256xbf16>
    %c1_97 = arith.constant 1 : index
    %c0_98 = arith.constant 0 : index
    %c0_99 = arith.constant 0 : index
    %183 = vector.load %arg9[%c1_97, %c0_98, %c0_99] : memref<2x256x512xbf16, #tpu.memory_space<vmem>>, vector<1x256x512xbf16>
    %184 = vector.shape_cast %183 : vector<1x256x512xbf16> to vector<256x512xbf16>
    %cst_100 = arith.constant dense<0.000000e+00> : vector<16x512xf32>
    %185 = tpu.matmul %182, %184, %cst_100 {dimension_numbers = #tpu.dot_dimension_numbers<[1], [0], [0], [1], [0, 0, 1, 1], [], []>} : vector<16x256xbf16>, vector<256x512xbf16>, vector<16x512xf32> -> vector<16x512xf32>
    %c1_101 = arith.constant 1 : index
    %c0_102 = arith.constant 0 : index
    %c0_103 = arith.constant 0 : index
    %186 = vector.load %arg10[%c1_101, %c0_102, %c0_103] : memref<2x1x512xf32, #tpu.memory_space<vmem>>, vector<1x1x512xf32>
    %187 = vector.shape_cast %186 : vector<1x1x512xf32> to vector<1x512xf32>
    %188 = vector.broadcast %187 : vector<1x512xf32> to vector<16x512xf32>
    %189 = arith.addf %185, %188 : vector<16x512xf32>
    %cst_104 = arith.constant 0.000000e+00 : f32
    %190 = vector.broadcast %cst_104 : f32 to vector<16x512xf32>
    %191 = arith.maximumf %189, %190 : vector<16x512xf32>
    %192 = arith.truncf %191 : vector<16x512xf32> to vector<16x512xbf16>
    %c1_105 = arith.constant 1 : index
    %c0_106 = arith.constant 0 : index
    %c0_107 = arith.constant 0 : index
    %193 = vector.load %arg11[%c1_105, %c0_106, %c0_107] : memref<2x512x256xbf16, #tpu.memory_space<vmem>>, vector<1x512x256xbf16>
    %194 = vector.shape_cast %193 : vector<1x512x256xbf16> to vector<512x256xbf16>
    %cst_108 = arith.constant dense<0.000000e+00> : vector<16x256xf32>
    %195 = tpu.matmul %192, %194, %cst_108 {dimension_numbers = #tpu.dot_dimension_numbers<[1], [0], [0], [1], [0, 0, 1, 1], [], []>} : vector<16x512xbf16>, vector<512x256xbf16>, vector<16x256xf32> -> vector<16x256xf32>
    %c1_109 = arith.constant 1 : index
    %c0_110 = arith.constant 0 : index
    %c0_111 = arith.constant 0 : index
    %196 = vector.load %arg12[%c1_109, %c0_110, %c0_111] : memref<2x1x256xf32, #tpu.memory_space<vmem>>, vector<1x1x256xf32>
    %197 = vector.shape_cast %196 : vector<1x1x256xf32> to vector<1x256xf32>
    %198 = vector.broadcast %197 : vector<1x256xf32> to vector<16x256xf32>
    %199 = arith.addf %195, %198 : vector<16x256xf32>
    %200 = arith.addf %199, %181 : vector<16x256xf32>
    %c1_112 = arith.constant 1 : index
    %c0_113 = arith.constant 0 : index
    %c0_114 = arith.constant 0 : index
    %201 = vector.load %arg13[%c1_112, %c0_113, %c0_114] : memref<2x1x256xf32, #tpu.memory_space<vmem>>, vector<1x1x256xf32>
    %202 = vector.shape_cast %201 : vector<1x1x256xf32> to vector<1x256xf32>
    %c1_115 = arith.constant 1 : index
    %c0_116 = arith.constant 0 : index
    %c0_117 = arith.constant 0 : index
    %203 = vector.load %arg14[%c1_115, %c0_116, %c0_117] : memref<2x1x256xf32, #tpu.memory_space<vmem>>, vector<1x1x256xf32>
    %204 = vector.shape_cast %203 : vector<1x1x256xf32> to vector<1x256xf32>
    %cst_118 = arith.constant dense<0.000000e+00> : vector<16xf32>
    %205 = vector.multi_reduction <add>, %200, %cst_118 [1] : vector<16x256xf32> to vector<16xf32>
    %206 = vector.shape_cast %205 : vector<16xf32> to vector<16x1xf32>
    %cst_119 = arith.constant 2.560000e+02 : f32
    %207 = vector.broadcast %cst_119 : f32 to vector<16x1xf32>
    %208 = arith.divf %206, %207 : vector<16x1xf32>
    %209 = vector.broadcast %208 : vector<16x1xf32> to vector<16x256xf32>
    %210 = arith.subf %200, %209 : vector<16x256xf32>
    %211 = arith.mulf %210, %210 : vector<16x256xf32>
    %cst_120 = arith.constant dense<0.000000e+00> : vector<16xf32>
    %212 = vector.multi_reduction <add>, %211, %cst_120 [1] : vector<16x256xf32> to vector<16xf32>
    %213 = vector.shape_cast %212 : vector<16xf32> to vector<16x1xf32>
    %cst_121 = arith.constant 2.560000e+02 : f32
    %214 = vector.broadcast %cst_121 : f32 to vector<16x1xf32>
    %215 = arith.divf %213, %214 : vector<16x1xf32>
    %cst_122 = arith.constant 9.99999974E-6 : f32
    %216 = vector.broadcast %cst_122 : f32 to vector<16x1xf32>
    %217 = arith.addf %215, %216 : vector<16x1xf32>
    %218 = math.rsqrt %217 : vector<16x1xf32>
    %219 = vector.broadcast %218 : vector<16x1xf32> to vector<16x256xf32>
    %220 = arith.mulf %210, %219 : vector<16x256xf32>
    %221 = vector.broadcast %202 : vector<1x256xf32> to vector<16x256xf32>
    %222 = arith.mulf %220, %221 : vector<16x256xf32>
    %223 = vector.broadcast %204 : vector<1x256xf32> to vector<16x256xf32>
    %224 = arith.addf %222, %223 : vector<16x256xf32>
    %225 = vector.shape_cast %224 : vector<16x256xf32> to vector<2x8x256xf32>
    %c1_123 = arith.constant 1 : index
    %c0_124 = arith.constant 0 : index
    %c0_125 = arith.constant 0 : index
    %c0_126 = arith.constant 0 : index
    %226 = vector.load %arg16[%c1_123, %c0_124, %c0_125, %c0_126] : memref<2x2x8x256xf32, #tpu.memory_space<vmem>>, vector<1x2x8x256xf32>
    %227 = vector.shape_cast %226 : vector<1x2x8x256xf32> to vector<2x8x256xf32>
    %228 = vector.shape_cast %225 : vector<2x8x256xf32> to vector<1x2x8x256xf32>
    tpu.vector_store %arg16[%c1_123, %c0_124, %c0_125, %c0_126], %228 {strides = array<i32>} : memref<2x2x8x256xf32, #tpu.memory_space<vmem>>, vector<1x2x8x256xf32>,
    return
  }
  func.func @transform_0(%arg0: i32) -> (i32, i32, i32) {
    %c0_i32 = arith.constant 0 : i32
    %c0_i32_0 = arith.constant 0 : i32
    %c0_i32_1 = arith.constant 0 : i32
    %c0_i32_2 = arith.constant 0 : i32
    return %c0_i32, %c0_i32_0, %c0_i32_1 : i32, i32, i32
  }
  func.func @transform_1(%arg0: i32) -> (i32, i32) {
    %c0_i32 = arith.constant 0 : i32
    %c0_i32_0 = arith.constant 0 : i32
    %c0_i32_1 = arith.constant 0 : i32
    return %c0_i32, %c0_i32_0 : i32, i32
  }
  func.func @transform_2(%arg0: i32) -> (i32, i32, i32) {
    %c0_i32 = arith.constant 0 : i32
    %c0_i32_0 = arith.constant 0 : i32
    %c0_i32_1 = arith.constant 0 : i32
    %c0_i32_2 = arith.constant 0 : i32
    return %c0_i32, %c0_i32_0, %c0_i32_1 : i32, i32, i32
  }
  func.func @transform_3(%arg0: i32) -> (i32, i32, i32) {
    %c0_i32 = arith.constant 0 : i32
    %c0_i32_0 = arith.constant 0 : i32
    %c0_i32_1 = arith.constant 0 : i32
    %c0_i32_2 = arith.constant 0 : i32
    return %c0_i32, %c0_i32_0, %c0_i32_1 : i32, i32, i32
  }
  func.func @transform_4(%arg0: i32) -> (i32, i32, i32) {
    %c0_i32 = arith.constant 0 : i32
    %c0_i32_0 = arith.constant 0 : i32
    %c0_i32_1 = arith.constant 0 : i32
    %c0_i32_2 = arith.constant 0 : i32
    return %c0_i32, %c0_i32_0, %c0_i32_1 : i32, i32, i32
  }
  func.func @transform_5(%arg0: i32) -> (i32, i32, i32) {
    %c0_i32 = arith.constant 0 : i32
    %c0_i32_0 = arith.constant 0 : i32
    %c0_i32_1 = arith.constant 0 : i32
    %c0_i32_2 = arith.constant 0 : i32
    return %c0_i32, %c0_i32_0, %c0_i32_1 : i32, i32, i32
  }
  func.func @transform_6(%arg0: i32) -> (i32, i32, i32) {
    %c0_i32 = arith.constant 0 : i32
    %c0_i32_0 = arith.constant 0 : i32
    %c0_i32_1 = arith.constant 0 : i32
    %c0_i32_2 = arith.constant 0 : i32
    return %c0_i32, %c0_i32_0, %c0_i32_1 : i32, i32, i32
  }
  func.func @transform_7(%arg0: i32) -> (i32, i32, i32) {
    %c0_i32 = arith.constant 0 : i32
    %c0_i32_0 = arith.constant 0 : i32
    %c0_i32_1 = arith.constant 0 : i32
    %c0_i32_2 = arith.constant 0 : i32
    return %c0_i32, %c0_i32_0, %c0_i32_1 : i32, i32, i32
  }
  func.func @transform_8(%arg0: i32) -> (i32, i32, i32) {
    %c0_i32 = arith.constant 0 : i32
    %c0_i32_0 = arith.constant 0 : i32
    %c0_i32_1 = arith.constant 0 : i32
    %c0_i32_2 = arith.constant 0 : i32
    return %c0_i32, %c0_i32_0, %c0_i32_1 : i32, i32, i32
  }
  func.func @transform_9(%arg0: i32) -> (i32, i32, i32) {
    %c0_i32 = arith.constant 0 : i32
    %c0_i32_0 = arith.constant 0 : i32
    %c0_i32_1 = arith.constant 0 : i32
    %c0_i32_2 = arith.constant 0 : i32
    return %c0_i32, %c0_i32_0, %c0_i32_1 : i32, i32, i32
  }
  func.func @transform_10(%arg0: i32) -> (i32, i32, i32) {
    %c0_i32 = arith.constant 0 : i32
    %c0_i32_0 = arith.constant 0 : i32
    %c0_i32_1 = arith.constant 0 : i32
    %c0_i32_2 = arith.constant 0 : i32
    return %c0_i32, %c0_i32_0, %c0_i32_1 : i32, i32, i32
  }
  func.func @transform_11(%arg0: i32) -> (i32, i32, i32) {
    %c0_i32 = arith.constant 0 : i32
    %c0_i32_0 = arith.constant 0 : i32
    %c0_i32_1 = arith.constant 0 : i32
    %c0_i32_2 = arith.constant 0 : i32
    return %c0_i32, %c0_i32_0, %c0_i32_1 : i32, i32, i32
  }
  func.func @transform_12(%arg0: i32) -> (i32, i32, i32) {
    %c0_i32 = arith.constant 0 : i32
    %c0_i32_0 = arith.constant 0 : i32
    %c0_i32_1 = arith.constant 0 : i32
    %c0_i32_2 = arith.constant 0 : i32
    return %c0_i32, %c0_i32_0, %c0_i32_1 : i32, i32, i32
  }
  func.func @transform_13(%arg0: i32) -> (i32, i32, i32) {
    %c0_i32 = arith.constant 0 : i32
    %c0_i32_0 = arith.constant 0 : i32
    %c0_i32_1 = arith.constant 0 : i32
    %c0_i32_2 = arith.constant 0 : i32
    return %c0_i32, %c0_i32_0, %c0_i32_1 : i32, i32, i32
  }
  func.func @transform_14(%arg0: i32) -> (i32, i32, i32) {
    %c0_i32 = arith.constant 0 : i32
    %c0_i32_0 = arith.constant 0 : i32
    %c0_i32_1 = arith.constant 0 : i32
    %c0_i32_2 = arith.constant 0 : i32
    return %c0_i32, %c0_i32_0, %c0_i32_1 : i32, i32, i32
  }
  func.func @transform_15(%arg0: i32) -> (i32, i32, i32, i32) {
    %c0_i32 = arith.constant 0 : i32
    %c0_i32_0 = arith.constant 0 : i32
    %c0_i32_1 = arith.constant 0 : i32
    %c0_i32_2 = arith.constant 0 : i32
    %c0_i32_3 = arith.constant 0 : i32
    return %c0_i32, %c0_i32_0, %c0_i32_1, %c0_i32_2 : i32, i32, i32, i32
  }
}

</mosaic_0001>

<bundles_post_ra>
// kernel: encoder_forward.1
= control target key start
LH: loop header
LB: loop body
LE: loop exit
PB: predicated region body
PF: predicated region fallthrough
CT: control target
= control target key end

     0   :  { %21 = vsyncpa [#allocation3], 0  ;;  %s6659_s0 = inlined_call_operand.vmem [shape: f32[2,8,256], index: 0, kind: input, shape index: {}]   ;;  %s6660_s1 = inlined_call_operand.vmem [shape: f32[8,256], index: 1, kind: input, shape index: {}]   ;;  %s6661_s2 = inlined_call_operand.vmem [shape: bf16[2,128,128], index: 2, kind: input, shape index: {}]   ;;  %s6662_s3 = inlined_call_operand.vmem [shape: bf16[2,128,128], index: 3, kind: input, shape index: {}]   ;;  %s6663_s4 = inlined_call_operand.vmem [shape: bf16[2,128,128], index: 4, kind: input, shape index: {}]   ;;  %s6664_s5 = inlined_call_operand.hbm [shape: bf16[2,256,256], index: 5, kind: input, shape index: {}]   ;;  %s6665_s6 = inlined_call_operand.vmem [shape: f32[2,1,256], index: 6, kind: input, shape index: {}]   ;;  %s6666_s7 = inlined_call_operand.hbm [shape: f32[2,1,256], index: 7, kind: input, shape index: {}]   ;;  %s6667_s8 = inlined_call_operand.hbm [shape: bf16[2,256,512], index: 8, kind: input, shape index: {}]   ;;  %s6668_s9 = inlined_call_operand.hbm [shape: f32[2,1,512], index: 9, kind: input, shape index: {}]   ;;  %s6669_s10 = inlined_call_operand.hbm [shape: bf16[2,512,256], index: 10, kind: input, shape index: {}]   ;;  %s6670_s11 = inlined_call_operand.vmem [shape: f32[2,1,256], index: 11, kind: input, shape index: {}]   ;;  %s6671_s12 = inlined_call_operand.vmem [shape: f32[2,1,256], index: 12, kind: input, shape index: {}]   ;;  %s6672_s13 = inlined_call_operand.hbm [shape: f32[2,1,256], index: 13, kind: input, shape index: {}]   ;;  %s6673_s14 = inlined_call_operand.hbm [shape: f32[2,8,256], index: 14, kind: output, shape index: {0}]   ;;  %s6674_s15 = inlined_call_operand.hbm [shape: f32[2,2,8,256], index: 15, kind: output, shape index: {1}]  }
   0x1   :  { %22 = vsyncpa [#allocation6], 0 }
   0x2   :  { %23 = vsyncpa [#allocation9], 0 }
   0x3   :  { %24 = vsyncpa [#allocation12], 0 }
   0x4   :  { %25 = vsyncpa [#allocation4], 0 }
   0x5   :  { %26 = vsyncpa [#allocation15], 0  ;;  %s6039_s18 = smov [#allocation5]  }
   0x6   :  { %s56_s19 = sshll.u32 %s6039_s18, 4  ;;  %s57_s19 = int_to_ptr.vmem [resolvable:$true] %s56_s19 }
   0x7   :  { %s5875_s20 = scalar_lea.vmem %s57_s19, 64  ;;  %p5880_p1 = scmp.lt.s32.totalorder %s57_s19, %s57_s19 }
   0x8   :  { %p5876_p0 = scmp.ne.s32.totalorder %s57_s19, %s5875_s20  ;;  %p5881_p2 = scmp.lt.s32.totalorder %s5875_s20, %s5875_s20 }
   0xa   :  { %p5882_p3 = por %p5881_p2, %p5880_p1 }
   0xc   :  { %p5883_p4 = pnand %p5882_p3, %p5876_p0 }
   0xe   :  { %5886 = shalt.err (!%p5883_p4)
}
   0xf   :  { %s6040_s21 = smov 32   ;;  %s6041_s22 = smov 2  }
  0x10   :  { %62 = dma.hbm_to_vmem [thread:$0]  %s6666_s7, 64, %s57_s19, [#allocation6], %s6040_s21, %s6040_s21, %s6041_s22  }
  0x11   :  { %s6042_s25 = smov [#allocation8]  }
  0x12   :  { %s80_s26 = sshll.u32 %s6042_s25, 4  ;;  %s81_s26 = int_to_ptr.vmem [resolvable:$true] %s80_s26 }
  0x13   :  { %s5895_s27 = scalar_lea.vmem %s81_s26, 128  ;;  %p5900_p6 = scmp.lt.s32.totalorder %s81_s26, %s81_s26 }
  0x14   :  { %p5896_p5 = scmp.ne.s32.totalorder %s81_s26, %s5895_s27  ;;  %p5901_p7 = scmp.lt.s32.totalorder %s5895_s27, %s5895_s27 }
  0x16   :  { %p5902_p8 = por %p5901_p7, %p5900_p6 }
  0x18   :  { %p5903_p9 = pnand %p5902_p8, %p5896_p5 }
  0x1a   :  { %5906 = shalt.err (!%p5903_p9)
}
  0x1b   :  { %s6043_s28 = smov 64   ;;  %s6044_s29 = smov 4  }
  0x1c   :  { %86 = dma.hbm_to_vmem [thread:$0]  %s6668_s9, 128, %s81_s26, [#allocation9], %s6043_s28, %s6043_s28, %s6044_s29  }
  0x1d   :  { %s6045_s17 = smov [#allocation2]  }
  0x1e   :  { %s42_s18 = sshll.u32 %s6045_s17, 4  ;;  %s43_s18 = int_to_ptr.vmem [resolvable:$true] %s42_s18 }
  0x1f   :  { %s5915_s7 = scalar_lea.vmem %s43_s18, 8192  ;;  %p5920_p11 = scmp.lt.s32.totalorder %s43_s18, %s43_s18 }
  0x20   :  { %p5916_p10 = scmp.ne.s32.totalorder %s43_s18, %s5915_s7  ;;  %p5921_p12 = scmp.lt.s32.totalorder %s5915_s7, %s5915_s7 }
  0x22   :  { %p5922_p13 = por %p5921_p12, %p5920_p11 }
  0x24   :  { %p5923_p0 = pnand %p5922_p13, %p5916_p10 }
  0x26   :  { %5926 = shalt.err (!%p5923_p0)
}
  0x27   :  { %s6046_s19 = smov 128   ;;  %s6047_s20 = smov 8  }
  0x28   :  { %48 = dma.hbm_to_vmem [thread:$0]  %s6664_s5, 8192, %s43_s18, [#allocation3], %s6046_s19, %s6046_s19, %s6047_s20  }
  0x29   :  { %s6048_s9 = smov [#allocation7]  }
  0x2a   :  { %s68_s25 = sshll.u32 %s6048_s9, 4  ;;  %s69_s25 = int_to_ptr.vmem [resolvable:$true] %s68_s25 }
  0x2b   :  { %s5935_s26 = scalar_lea.vmem %s69_s25, 16384  ;;  %p5940_p2 = scmp.lt.s32.totalorder %s69_s25, %s69_s25 }
  0x2c   :  { %p5936_p1 = scmp.ne.s32.totalorder %s69_s25, %s5935_s26  ;;  %p5941_p3 = scmp.lt.s32.totalorder %s5935_s26, %s5935_s26 }
  0x2e   :  { %p5942_p4 = por %p5941_p3, %p5940_p2 }
  0x30   :  { %p5943_p5 = pnand %p5942_p4, %p5936_p1 }
  0x32   :  { %5946 = shalt.err (!%p5943_p5)
}
  0x33   :  { %s6049_s27 = smov 256   ;;  %s6050_s28 = smov 16  }
  0x34   :  { %74 = dma.hbm_to_vmem [thread:$0]  %s6667_s8, 16384, %s69_s25, [#allocation6], %s6049_s27, %s6049_s27, %s6050_s28  }
  0x35   :  { %s6051_s5 = smov [#allocation10]   ;;  %s6052_s17 = smov [#allocation11]  }
  0x36   :  { %s92_s16 = sshll.u32 %s6051_s5, 4  ;;  %s108_s18 = sshll.u32 %s6052_s17, 4  ;;  %s93_s16 = int_to_ptr.vmem [resolvable:$true] %s92_s16  ;;  %s109_s18 = int_to_ptr.vmem [resolvable:$true] %s108_s18 }
  0x37   :  { %s5955_s7 = scalar_lea.vmem %s93_s16, 16384  ;;  %p5960_p7 = scmp.lt.s32.totalorder %s93_s16, %s93_s16 }
  0x38   :  { %p5956_p6 = scmp.ne.s32.totalorder %s93_s16, %s5955_s7  ;;  %p5961_p8 = scmp.lt.s32.totalorder %s5955_s7, %s5955_s7 }
  0x3a   :  { %p5962_p9 = por %p5961_p8, %p5960_p7 }
  0x3c   :  { %p5963_p10 = pnand %p5962_p9, %p5956_p6 }
  0x3e   :  { %5966 = shalt.err (!%p5963_p10)
}
  0x3f   :  { %98 = dma.hbm_to_vmem [thread:$0]  %s6669_s10, 16384, %s93_s16, [#allocation9], %s6046_s19, %s6046_s19, %s6047_s20  }
  0x40   :  { %s5975_s8 = scalar_lea.vmem %s109_s18, 64  ;;  %p5980_p12 = scmp.lt.s32.totalorder %s109_s18, %s109_s18 }
  0x41   :  { %p5976_p11 = scmp.ne.s32.totalorder %s109_s18, %s5975_s8  ;;  %p5981_p13 = scmp.lt.s32.totalorder %s5975_s8, %s5975_s8 }
  0x43   :  { %p5982_p0 = por %p5981_p13, %p5980_p12 }
  0x45   :  { %p5983_p1 = pnand %p5982_p0, %p5976_p11 }
  0x47   :  { %5986 = shalt.err (!%p5983_p1)
}
  0x48   :  { %114 = dma.hbm_to_vmem [thread:$0]  %s6672_s13, 64, %s109_s18, [#allocation12], %s6040_s21, %s6040_s21, %s6041_s22  }
  0x49   :  { %6027 = dma.done.wait [#allocation3], 8192  }
  0x4a   :  { %6028 = vsyncadd [#allocation3], 4294959104 }
  0x4b   :  { %6029 = dma.done.wait [#allocation6], 16448  }
  0x4c   :  { %6030 = vsyncadd [#allocation6], 4294950848 }
  0x4d   :  { %6031 = dma.done.wait [#allocation9], 16512  }
  0x4e   :  { %6032 = vsyncadd [#allocation9], 4294950784 }
  0x4f   :  { %6033 = dma.done.wait [#allocation12], 64  }
  0x50   :  { %6034 = vsyncadd [#allocation12], 4294967232  ;;  %v5283_v0 = vld [vmem:[%s6661_s2 + $0x38] sm:$0xff]   ;;  %v5284_v1 = vld [vmem:[%s6661_s2 + $0x30] sm:$0xff]   ;;  %v6053_v28 = vmov 0.0   ;;  %vm6054_vm0 = vmmov 0  }
  0x51   :  { %5049 = vmatprep.subr.bf16.mxu1 %v5283_v0  ;;  %v5285_v2 = vld [vmem:[%s6661_s2 + $0x28] sm:$0xff]   ;;  %v5286_v3 = vld [vmem:[%s6661_s2 + $0x20] sm:$0xff]   ;;  %v136_v5 = vld [vmem:[%s6659_s0 + $0x10] sm:$0xff]  ;;  %vm693_vm1 = vcmask 64512   ;;  %vm745_vm2 = vcmask 1043456   ;;  %s6055_s29 = smov [#allocation13]  }
  0x52   :  { %5050 = vmatpush3.bf16.msra.mxu1 %v5283_v0  ;;  %v134_v4 = vld [vmem:[%s6659_s0] sm:$0xff]  ;;  %v135_v9 = vld [vmem:[%s6659_s0 + $0x8] sm:$0xff]  ;;  %v137_v10 = vld [vmem:[%s6659_s0 + $0x18] sm:$0xff]  ;;  %s4451_s30 = sshll.u32 %s6055_s29, 4  ;;  %s4452_s30 = int_to_ptr.vmem [resolvable:$true] %s4451_s30 }
  0x53   :  { %5051 = vmatprep.subr.bf16.mxu1 %v5284_v1  ;;  %v138_v6 = vld [vmem:[%s6660_s1] sm:$0xff]  ;;  %v139_v11 = vld [vmem:[%s6660_s1 + $0x8] sm:$0xff]  ;;  %v5287_v15 = vld [vmem:[%s6661_s2 + $0x18] sm:$0xff]   ;;  %s5987_s5 = scalar_lea.vmem %s4452_s30, 512  ;;  %p5992_p3 = scmp.lt.s32.totalorder %s4452_s30, %s4452_s30 }
  0x54   :  { %v140_v7 = vadd.f32 %v138_v6, %v134_v4  ;;  %v142_v8 = vadd.f32 %v138_v6, %v136_v5  ;;  %v141_v12 = vadd.f32 %v139_v11, %v135_v9  ;;  %v143_v13 = vadd.f32 %v139_v11, %v137_v10  ;;  %v5288_v16 = vld [vmem:[%s6661_s2 + $0x10] sm:$0xff]   ;;  %v5289_v17 = vld [vmem:[%s6661_s2 + $0x8] sm:$0xff]   ;;  %v5290_v18 = vld [vmem:[%s6661_s2] sm:$0xff]   ;;  %p5988_p2 = scmp.ne.s32.totalorder %s4452_s30, %s5987_s5  ;;  %p5993_p4 = scmp.lt.s32.totalorder %s5987_s5, %s5987_s5 }
  0x55   :  { %v5291_v19 = vld [vmem:[%s6662_s3 + $0x38] sm:$0xff]   ;;  %v5292_v21 = vld [vmem:[%s6662_s3 + $0x30] sm:$0xff]   ;;  %v5293_v22 = vld [vmem:[%s6662_s3 + $0x28] sm:$0xff]  }
  0x56   :  { %5052 = vmatpush3.bf16.msra.mxu1 %v5284_v1  ;;  %v6200_v14 = vpack.c.bf16 %v142_v8, %v140_v7  ;;  %144 = vst [vmem:[#allocation13] sm:$0xff] %v140_v7  ;;  %146 = vst [vmem:[#allocation13 + $0x10] sm:$0xff] %v142_v8  ;;  %v6219_v20 = vpack.c.bf16 %v143_v13, %v141_v12  ;;  %v5294_v23 = vld [vmem:[%s6662_s3 + $0x20] sm:$0xff]   ;;  %v5295_v24 = vld [vmem:[%s6662_s3 + $0x18] sm:$0xff]   ;;  %p5994_p5 = por %p5993_p4, %p5992_p3 }
  0x57   :  { %5053 = vmatprep.subr.bf16.mxu1 %v5285_v2  ;;  %145 = vst [vmem:[#allocation13 + $0x8] sm:$0xff] %v141_v12  ;;  %147 = vst [vmem:[#allocation13 + $0x18] sm:$0xff] %v143_v13  ;;  %v5296_v25 = vld [vmem:[%s6662_s3 + $0x10] sm:$0xff]   ;;  %v5297_v26 = vld [vmem:[%s6662_s3 + $0x8] sm:$0xff]  }
  0x58   :  { %5065 = vmatprep.mubr.bf16.mxu1 %v6200_v14  ;;  %5105 = vmatprep.mubr.bf16.mxu0 %v6200_v14  ;;  %v5298_v27 = vld [vmem:[%s6662_s3] sm:$0xff]   ;;  %v5299_v45 = vld [vmem:[%s6663_s4 + $0x38] sm:$0xff]   ;;  %v5300_v46 = vld [vmem:[%s6663_s4 + $0x30] sm:$0xff]   ;;  %p5995_p6 = pnand %p5994_p5, %p5988_p2 }
  0x59   :  { %5089 = vmatprep.subr.bf16.mxu0 %v5299_v45  ;;  %v5301_v47 = vld [vmem:[%s6663_s4 + $0x28] sm:$0xff]   ;;  %v5302_v48 = vld [vmem:[%s6663_s4 + $0x20] sm:$0xff]   ;;  %v5303_v49 = vld [vmem:[%s6663_s4 + $0x18] sm:$0xff]  }
  0x5a   :  { %5054 = vmatpush3.bf16.msra.mxu1 %v5285_v2  ;;  %5090 = vmatpush3.bf16.msra.mxu0 %v5299_v45  ;;  %v5304_v50 = vld [vmem:[%s6663_s4 + $0x10] sm:$0xff]   ;;  %v5305_v51 = vld [vmem:[%s6663_s4 + $0x8] sm:$0xff]   ;;  %v5306_v52 = vld [vmem:[%s6663_s4] sm:$0xff]  }
  0x5b   :  { %5055 = vmatprep.subr.bf16.mxu1 %v5286_v3  ;;  %5091 = vmatprep.subr.bf16.mxu0 %v5300_v46 }
  0x5e   :  { %5056 = vmatpush3.bf16.msra.mxu1 %v5286_v3  ;;  %5092 = vmatpush3.bf16.msra.mxu0 %v5300_v46 }
  0x5f   :  { %5057 = vmatprep.subr.bf16.mxu1 %v5287_v15  ;;  %5093 = vmatprep.subr.bf16.mxu0 %v5301_v47 }
  0x62   :  { %5058 = vmatpush3.bf16.msra.mxu1 %v5287_v15  ;;  %5094 = vmatpush3.bf16.msra.mxu0 %v5301_v47 }
  0x63   :  { %5059 = vmatprep.subr.bf16.mxu1 %v5288_v16  ;;  %5095 = vmatprep.subr.bf16.mxu0 %v5302_v48 }
  0x66   :  { %5060 = vmatpush3.bf16.msra.mxu1 %v5288_v16  ;;  %5096 = vmatpush3.bf16.msra.mxu0 %v5302_v48  ;;  %v5309_v48 = vld [vmem:[#allocation2 + $0x74] ss:$8 sps:$4 sm:$0xff]  }
  0x67   :  { %5061 = vmatprep.subr.bf16.mxu1 %v5289_v17  ;;  %5097 = vmatprep.subr.bf16.mxu0 %v5303_v49 }
  0x6a   :  { %5062 = vmatpush3.bf16.msra.mxu1 %v5289_v17  ;;  %5098 = vmatpush3.bf16.msra.mxu0 %v5303_v49 }
  0x6b   :  { %5063 = vmatprep.subr.bf16.mxu1 %v5290_v18  ;;  %5099 = vmatprep.subr.bf16.mxu0 %v5304_v50 }
  0x6e   :  { %5064 = vmatpush3.bf16.msra.mxu1 %v5290_v18  ;;  %5100 = vmatpush3.bf16.msra.mxu0 %v5304_v50 }
  0x6f   :  { %5069 = vmatprep.subr.bf16.mxu1 %v5291_v19  ;;  %5101 = vmatprep.subr.bf16.mxu0 %v5305_v51 }
  0x71   :  { %5066 = vmatmul.mubr.bf16.vlgmr.msra.gmra.mxu1 %v6219_v20 }
  0x72   :  { %5070 = vmatpush3.bf16.msra.mxu1 %v5291_v19  ;;  %5085 = vmatprep.mubr.bf16.mxu1 %v6200_v14 }
  0x73   :  { %5071 = vmatprep.subr.bf16.mxu1 %v5292_v21  ;;  %5102 = vmatpush3.bf16.msra.mxu0 %v5305_v51 }
  0x74   :  { %5103 = vmatprep.subr.bf16.mxu0 %v5306_v52 }
  0x76   :  { %5072 = vmatpush3.bf16.msra.mxu1 %v5292_v21 }
  0x77   :  { %5073 = vmatprep.subr.bf16.mxu1 %v5293_v22  ;;  %5104 = vmatpush3.bf16.msra.mxu0 %v5306_v52 }
  0x78   :  { %5133 = vmatprep.subr.bf16.mxu0 %v6053_v28 }
  0x7a   :  { %5074 = vmatpush3.bf16.msra.mxu1 %v5293_v22  ;;  %5106 = vmatmul.mubr.bf16.vlgmr.msra.gmra.mxu0 %v6219_v20 }
  0x7b   :  { %5075 = vmatprep.subr.bf16.mxu1 %v5294_v23  ;;  %5135 = vmatprep.mubr.msk.bf16.mxu0 %vm6054_vm0, %v6053_v28 }
  0x7e   :  { %5076 = vmatpush3.bf16.msra.mxu1 %v5294_v23 }
  0x7f   :  { %5077 = vmatprep.subr.bf16.mxu1 %v5295_v24 }
  0x82   :  { %5078 = vmatpush3.bf16.msra.mxu1 %v5295_v24 }
  0x83   :  { %5079 = vmatprep.subr.bf16.mxu1 %v5296_v25 }
  0x86   :  { %5080 = vmatpush3.bf16.msra.mxu1 %v5296_v25 }
  0x87   :  { %5081 = vmatprep.subr.bf16.mxu1 %v5297_v26 }
  0x8a   :  { %5082 = vmatpush3.bf16.msra.mxu1 %v5297_v26 }
  0x8b   :  { %5083 = vmatprep.subr.bf16.mxu1 %v5298_v27 }
  0x8e   :  { %5084 = vmatpush3.bf16.msra.mxu1 %v5298_v27 }
  0x8f   :  { %5109 = vmatprep.subr.bf16.mxu1 %v6053_v28 }
  0x91   :  { %5086 = vmatmul.mubr.bf16.vlgmr.msra.gmra.mxu1 %v6219_v20 }
  0x92   :  { %5111 = vmatprep.mubr.msk.bf16.mxu1 %vm6054_vm0, %v6053_v28 }
 0x131   :  { %v5067_v29 = vpop.f32.mrf.mxu1 }
 0x132   :  { %v4935_v42 = vpack.c.bf16 %v5067_v29, %v5067_v29 }
 0x133   :  { %v248_v30 = vpop.f32.mrf.mxu1 }
 0x134   :  { %v4933_v38 = vpack.c.bf16 %v248_v30, %v248_v30 }
 0x135   :  { %v5068_v31 = vpop.f32.mrf.mxu1 }
 0x136   :  { %v4936_v44 = vpack.c.bf16 %v5068_v31, %v5068_v31 }
 0x137   :  { %v251_v32 = vpop.f32.mrf.mxu1 }
 0x138   :  { %v4934_v40 = vpack.c.bf16 %v251_v32, %v251_v32 }
 0x13a   :  { %v5107_v30 = vpop.f32.mrf.mxu0 }
 0x13c   :  { %v474_v31 = vpop.f32.mrf.mxu0 }
 0x13d   :  { %v4941_v32 = vpack.c.bf16 %v474_v31, %v474_v31 }
 0x151   :  { %v5087_v33 = vpop.f32.mrf.mxu1 }
 0x152   :  { %v4939_v41 = vpack.c.bf16 %v5087_v33, %v5087_v33 }
 0x153   :  { %v361_v34 = vpop.f32.mrf.mxu1 }
 0x154   :  { %v4937_v35 = vpack.c.bf16 %v361_v34, %v361_v34  ;;  %v5108_v34 = vpop.f32.mrf.mxu0 }
 0x155   :  { %v5088_v36 = vpop.f32.mrf.mxu1  ;;  %v4944_v49 = vpack.c.bf16 %v5108_v34, %v5108_v34 }
 0x156   :  { %5110 = vmatpush3.bf16.xpose.msra.mxu1 %v4937_v35  ;;  %v4940_v43 = vpack.c.bf16 %v5088_v36, %v5088_v36  ;;  %v747_v36 = vsel %vm745_vm2, %v4941_v32, 0 }
 0x157   :  { %5115 = vmatprep.subr.bf16.mxu1 %v6053_v28  ;;  %v364_v37 = vpop.f32.mrf.mxu1  ;;  %5134 = vmatpush3.bf16.msra.mxu0 %v747_v36 }
 0x158   :  { %v4938_v39 = vpack.c.bf16 %v364_v37, %v364_v37  ;;  %5145 = vmatprep.subr.bf16.mxu0 %v6053_v28  ;;  %v477_v37 = vpop.f32.mrf.mxu0 }
 0x15d   :  { %5112 = vmatmul.mubr.bf16.vlgmr.msra.gmra.mxu1 %v4933_v38  ;;  %v4942_v38 = vpack.c.bf16 %v477_v37, %v477_v37 }
 0x15e   :  { %5116 = vmatpush3.bf16.xpose.msra.mxu1 %v4938_v39  ;;  %5117 = vmatprep.mubr.msk.bf16.mxu1 %vm6054_vm0, %v6053_v28 }
 0x15f   :  { %5121 = vmatprep.subr.bf16.mxu1 %v6053_v28  ;;  %v793_v39 = vsel %vm745_vm2, %v4942_v38, 0 }
 0x165   :  { %5118 = vmatmul.mubr.bf16.vlgmr.msra.gmra.mxu1 %v4934_v40 }
 0x166   :  { %5122 = vmatpush3.bf16.xpose.msra.mxu1 %v4939_v41  ;;  %5123 = vmatprep.mubr.msk.bf16.mxu1 %vm6054_vm0, %v6053_v28 }
 0x167   :  { %5127 = vmatprep.subr.bf16.mxu1 %v6053_v28 }
 0x16d   :  { %5124 = vmatmul.mubr.bf16.vlgmr.msra.gmra.mxu1 %v4935_v42  ;;  %v4943_v42 = vpack.c.bf16 %v5107_v30, %v5107_v30  ;;  %v5352_v30 = vld [vmem:[#allocation2 + $0x80] ss:$8 sps:$4 sm:$0xff]  }
 0x16e   :  { %5128 = vmatpush3.bf16.xpose.msra.mxu1 %v4940_v43  ;;  %5129 = vmatprep.mubr.msk.bf16.mxu1 %vm6054_vm0, %v6053_v28 }
 0x16f   :  { %5139 = vmatprep.subr.bf16.mxu1 %v6053_v28  ;;  %v839_v46 = vsel %vm745_vm2, %v4943_v42, 0 }
 0x175   :  { %5130 = vmatmul.mubr.bf16.vlgmr.msra.gmra.mxu1 %v4936_v44 }
 0x176   :  { %5141 = vmatprep.mubr.msk.bf16.mxu1 %vm6054_vm0, %v6053_v28  ;;  %5140 = vmatpush3.bf16.msra.mxu1 %v793_v39 }
 0x177   :  { %5151 = vmatprep.subr.bf16.mxu1 %v6053_v28 }
 0x21d   :  { %v567_v53 = vpop.f32.mrf.mxu1 }
 0x21e   :  { %v694_v54 = vsel %vm693_vm1, %v567_v53, -inf }
 0x21f   :  { %695 = vmax.xlane.f32.xlu0 %v694_v54  ;;  %v5113_v55 = vpop.f32.mrf.mxu1 }
 0x221   :  { %v570_v56 = vpop.f32.mrf.mxu1 }
 0x223   :  { %v5114_v57 = vpop.f32.mrf.mxu1 }
 0x224   :  { %v5307_v57 = vld [vmem:[#allocation2 + $0x70] ss:$8 sps:$4 sm:$0xff]  }
 0x225   :  { %v607_v58 = vpop.f32.mrf.mxu1 }
 0x226   :  { %v697_v59 = vsel %vm693_vm1, %v607_v58, -inf }
 0x227   :  { %698 = vmax.xlane.f32.xlu0 %v697_v59  ;;  %v5119_v60 = vpop.f32.mrf.mxu1  ;;  %v5312_v59 = vld [vmem:[#allocation2 + $0x64] ss:$8 sps:$4 sm:$0xff]  }
 0x228   :  { %v5310_v60 = vld [vmem:[#allocation2 + $0x60] ss:$8 sps:$4 sm:$0xff]  }
 0x229   :  { %v610_v61 = vpop.f32.mrf.mxu1 }
 0x22a   :  { %v5315_v61 = vld [vmem:[#allocation2 + $0x54] ss:$8 sps:$4 sm:$0xff]  }
 0x22b   :  { %v5120_v62 = vpop.f32.mrf.mxu1 }
 0x22d   :  { %v647_v63 = vpop.f32.mrf.mxu1 }
 0x22e   :  { %v700_v0 = vsel %vm693_vm1, %v647_v63, -inf }
 0x22f   :  { %701 = vmax.xlane.f32.xlu1 %v700_v0  ;;  %v5125_v1 = vpop.f32.mrf.mxu1  ;;  %v5313_v0 = vld [vmem:[#allocation2 + $0x50] ss:$8 sps:$4 sm:$0xff]  }
 0x231   :  { %v650_v2 = vpop.f32.mrf.mxu1 }
 0x232   :  { %v5318_v2 = vld [vmem:[#allocation2 + $0x44] ss:$8 sps:$4 sm:$0xff]  }
 0x233   :  { %v5126_v3 = vpop.f32.mrf.mxu1 }
 0x234   :  { %v5316_v3 = vld [vmem:[#allocation2 + $0x40] ss:$8 sps:$4 sm:$0xff]  }
 0x235   :  { %v687_v4 = vpop.f32.mrf.mxu1 }
 0x236   :  { %v703_v5 = vsel %vm693_vm1, %v687_v4, -inf }
 0x237   :  { %704 = vmax.xlane.f32.xlu1 %v703_v5  ;;  %v5131_v6 = vpop.f32.mrf.mxu1  ;;  %v5319_v5 = vld [vmem:[#allocation2 + $0x30] ss:$8 sps:$4 sm:$0xff]  }
 0x238   :  { %v5324_v6 = vld [vmem:[#allocation2 + $0x24] ss:$8 sps:$4 sm:$0xff]  }
 0x239   :  { %v690_v7 = vpop.f32.mrf.mxu1 }
 0x23a   :  { %v5322_v7 = vld [vmem:[#allocation2 + $0x20] ss:$8 sps:$4 sm:$0xff]  }
 0x23b   :  { %v5132_v8 = vpop.f32.mrf.mxu1 }
 0x23c   :  { %v5327_v8 = vld [vmem:[#allocation2 + $0x14] ss:$8 sps:$4 sm:$0xff]  }
 0x2a8   :  { %v696_v9 = vpop.xlane.xlu0 %695 }
 0x2a9   :  { %v706_v10 = vsub.f32 %v567_v53, %v696_v9  ;;  %v885_v53 = vsel %vm745_vm2, %v4944_v49, 0  ;;  %v5325_v9 = vld [vmem:[#allocation2 + $0x10] ss:$8 sps:$4 sm:$0xff]  }
 0x2ab   :  { %v710_v11 = vmul.f32 1.442695, %v706_v10  ;;  %v5330_v10 = vld [vmem:[#allocation2 + $0x4] ss:$8 sps:$4 sm:$0xff]  }
 0x2ad   :  { %5811 = vpow2.f32 %v710_v11  ;;  %v5328_v11 = vld [vmem:[#allocation2] ss:$8 sps:$4 sm:$0xff]  }
 0x2b0   :  { %v699_v12 = vpop.xlane.xlu0 %698 }
 0x2b1   :  { %v707_v13 = vsub.f32 %v607_v58, %v699_v12  ;;  %v5333_v12 = vld [vmem:[#allocation2 + $0xf4] ss:$8 sps:$4 sm:$0xff]  }
 0x2b3   :  { %v712_v15 = vmul.f32 1.442695, %v707_v13  ;;  %v5331_v13 = vld [vmem:[#allocation2 + $0xf0] ss:$8 sps:$4 sm:$0xff]  }
 0x2b5   :  { %5813 = vpow2.f32 %v712_v15  ;;  %v5336_v15 = vld [vmem:[#allocation2 + $0xe4] ss:$8 sps:$4 sm:$0xff]  }
 0x2b8   :  { %v702_v16 = vpop.xlane.xlu1 %701 }
 0x2b9   :  { %v708_v17 = vsub.f32 %v647_v63, %v702_v16  ;;  %v5334_v16 = vld [vmem:[#allocation2 + $0xe0] ss:$8 sps:$4 sm:$0xff]  }
 0x2ba   :  { %v5812_v18 = vpop.eup %5811 }
 0x2bb   :  { %v714_v19 = vmul.f32 1.442695, %v708_v17  ;;  %v718_v21 = vsel %vm693_vm1, %v5812_v18, 0.0  ;;  %v5339_v17 = vld [vmem:[#allocation2 + $0xd4] ss:$8 sps:$4 sm:$0xff]  }
 0x2bc   :  { %719 = vadd.xlane.f32.xlu0 %v718_v21  ;;  %v5340_v21 = vld [vmem:[#allocation2 + $0xc0] ss:$8 sps:$4 sm:$0xff]  }
 0x2bd   :  { %5815 = vpow2.f32 %v714_v19  ;;  %v5342_v19 = vld [vmem:[#allocation2 + $0xc4] ss:$8 sps:$4 sm:$0xff]  }
 0x2c0   :  { %v705_v22 = vpop.xlane.xlu1 %704 }
 0x2c1   :  { %v709_v23 = vsub.f32 %v687_v4, %v705_v22  ;;  %v5321_v4 = vld [vmem:[#allocation2 + $0x34] ss:$8 sps:$4 sm:$0xff]  }
 0x2c2   :  { %v5814_v24 = vpop.eup %5813  ;;  %v5345_v22 = vld [vmem:[#allocation2 + $0xb4] ss:$8 sps:$4 sm:$0xff]  }
 0x2c3   :  { %v716_v25 = vmul.f32 1.442695, %v709_v23  ;;  %v721_v26 = vsel %vm693_vm1, %v5814_v24, 0.0  ;;  %v5343_v23 = vld [vmem:[#allocation2 + $0xb0] ss:$8 sps:$4 sm:$0xff]  }
 0x2c4   :  { %722 = vadd.xlane.f32.xlu1 %v721_v26  ;;  %v5351_v26 = vld [vmem:[#allocation2 + $0x94] ss:$8 sps:$4 sm:$0xff]  }
 0x2c5   :  { %5817 = vpow2.f32 %v716_v25  ;;  %v5346_v25 = vld [vmem:[#allocation2 + $0xa0] ss:$8 sps:$4 sm:$0xff]  }
 0x2ca   :  { %v5816_v27 = vpop.eup %5815 }
 0x2cb   :  { %v724_v29 = vsel %vm693_vm1, %v5816_v27, 0.0 }
 0x2cc   :  { %725 = vadd.xlane.f32.xlu0 %v724_v29  ;;  %v5354_v29 = vld [vmem:[#allocation2 + $0x84] ss:$8 sps:$4 sm:$0xff]  }
 0x2d2   :  { %v5818_v33 = vpop.eup %5817 }
 0x2d3   :  { %v727_v35 = vsel %vm693_vm1, %v5818_v33, 0.0 }
 0x2d4   :  { %728 = vadd.xlane.f32.xlu1 %v727_v35 }
 0x345   :  { %v720_v40 = vpop.xlane.xlu0 %719 }
 0x346   :  { %5819 = vrcp.f32 %v720_v40 }
 0x34d   :  { %v723_v41 = vpop.xlane.xlu1 %722 }
 0x34e   :  { %5821 = vrcp.f32 %v723_v41 }
 0x353   :  { %v5820_v43 = vpop.eup %5819 }
 0x354   :  { %v734_v44 = vmul.f32 %v5820_v43, %v5812_v18  ;;  %v5337_v18 = vld [vmem:[#allocation2 + $0xd0] ss:$8 sps:$4 sm:$0xff]  }
 0x355   :  { %v726_v45 = vpop.xlane.xlu0 %725 }
 0x356   :  { %5823 = vrcp.f32 %v726_v45  ;;  %v738_v47 = vpack.c.bf16 %v734_v44, %v734_v44 }
 0x358   :  { %5136 = vmatmul.mubr.msk.bf16.vlgmr.msra.gmra.mxu0 %vm693_vm1, %v738_v47 }
 0x359   :  { %5146 = vmatpush3.bf16.msra.mxu0 %v839_v46  ;;  %5147 = vmatprep.mubr.msk.bf16.mxu0 %vm6054_vm0, %v6053_v28 }
 0x35a   :  { %1121 = vmatprep.subr.bf16.mxu0 %v5309_v48 }
 0x35b   :  { %v5822_v50 = vpop.eup %5821 }
 0x35c   :  { %v735_v51 = vmul.f32 %v5822_v50, %v5814_v24  ;;  %v5348_v24 = vld [vmem:[#allocation2 + $0xa4] ss:$8 sps:$4 sm:$0xff]  }
 0x35d   :  { %v729_v52 = vpop.xlane.xlu1 %728 }
 0x35e   :  { %5825 = vrcp.f32 %v729_v52  ;;  %v739_v54 = vpack.c.bf16 %v735_v51, %v735_v51  ;;  %v5859_v51 = vld [vmem:[#allocation13] sm:$0xff] }
 0x360   :  { %5142 = vmatmul.mubr.msk.bf16.vlgmr.msra.gmra.mxu1 %vm693_vm1, %v739_v54 }
 0x361   :  { %5152 = vmatpush3.bf16.msra.mxu1 %v885_v53  ;;  %5153 = vmatprep.mubr.msk.bf16.mxu1 %vm6054_vm0, %v6053_v28  ;;  %v5860_v53 = vld [vmem:[#allocation13 + $0x8] sm:$0xff] }
 0x363   :  { %v5824_v55 = vpop.eup %5823 }
 0x364   :  { %v736_v56 = vmul.f32 %v5824_v55, %v5816_v27  ;;  %v5349_v27 = vld [vmem:[#allocation2 + $0x90] ss:$8 sps:$4 sm:$0xff]  }
 0x366   :  { %v740_v58 = vpack.c.bf16 %v736_v56, %v736_v56 }
 0x368   :  { %5148 = vmatmul.mubr.msk.bf16.vlgmr.msra.gmra.mxu0 %vm693_vm1, %v740_v58  ;;  %v5861_v58 = vld [vmem:[#allocation13 + $0x10] sm:$0xff] }
 0x369   :  { %1122 = vmatpush1.bf16.msra.mxu0 %v5307_v57 }
 0x36a   :  { %1123 = vmatprep.subr.bf16.mxu0 %v5312_v59 }
 0x36b   :  { %v5826_v62 = vpop.eup %5825 }
 0x36c   :  { %v737_v63 = vmul.f32 %v5826_v62, %v5818_v33 }
 0x36d   :  { %1124 = vmatpush1.bf16.msra.mxu0 %v5310_v60  ;;  %v5862_v60 = vld [vmem:[#allocation13 + $0x18] sm:$0xff] }
 0x36e   :  { %v741_v1 = vpack.c.bf16 %v737_v63, %v737_v63  ;;  %1125 = vmatprep.subr.bf16.mxu0 %v5315_v61  ;;  %v5355_v63 = vld [vmem:[#allocation7 + $0xe0] ss:$16 sps:$4 sm:$0xff]  }
 0x370   :  { %5154 = vmatmul.mubr.msk.bf16.vlgmr.msra.gmra.mxu1 %vm693_vm1, %v741_v1  ;;  %v5358_v1 = vld [vmem:[#allocation7 + $0xe8] ss:$16 sps:$4 sm:$0xff]  }
 0x371   :  { %1126 = vmatpush1.bf16.msra.mxu0 %v5313_v0  ;;  %v5357_v0 = vld [vmem:[#allocation7 + $0xe4] ss:$16 sps:$4 sm:$0xff]  }
 0x372   :  { %1127 = vmatprep.subr.bf16.mxu0 %v5318_v2  ;;  %v5360_v2 = vld [vmem:[#allocation7 + $0xec] ss:$16 sps:$4 sm:$0xff]   ;;  %1641 = vmatprep.subr.bf16.mxu1 %v5357_v0  ;;  %v5429_v0 = vld [vmem:[#allocation7 + $0x164] ss:$16 sps:$4 sm:$0xff]  }
 0x373   :  { %1642 = vmatpush1.bf16.msra.mxu1 %v5355_v63  ;;  %v5426_v63 = vld [vmem:[#allocation7 + $0x18c] ss:$16 sps:$4 sm:$0xff]  }
 0x375   :  { %1128 = vmatpush1.bf16.msra.mxu0 %v5316_v3  ;;  %v5363_v3 = vld [vmem:[#allocation7 + $0xc4] ss:$16 sps:$4 sm:$0xff]  }
 0x376   :  { %1129 = vmatprep.subr.bf16.mxu0 %v5321_v4  ;;  %v5366_v4 = vld [vmem:[#allocation7 + $0xcc] ss:$16 sps:$4 sm:$0xff]   ;;  %1643 = vmatprep.subr.bf16.mxu1 %v5363_v3  ;;  %v5430_v3 = vld [vmem:[#allocation7 + $0x168] ss:$16 sps:$4 sm:$0xff]  }
 0x379   :  { %1130 = vmatpush1.bf16.msra.mxu0 %v5319_v5  ;;  %v5361_v5 = vld [vmem:[#allocation7 + $0xc0] ss:$16 sps:$4 sm:$0xff]  }
 0x37a   :  { %1131 = vmatprep.subr.bf16.mxu0 %v5324_v6  ;;  %v5364_v6 = vld [vmem:[#allocation7 + $0xc8] ss:$16 sps:$4 sm:$0xff]   ;;  %1644 = vmatpush1.bf16.msra.mxu1 %v5361_v5  ;;  %v5438_v5 = vld [vmem:[#allocation7 + $0x14c] ss:$16 sps:$4 sm:$0xff]  }
 0x37d   :  { %1132 = vmatpush1.bf16.msra.mxu0 %v5322_v7  ;;  %v5369_v7 = vld [vmem:[#allocation7 + $0xa4] ss:$16 sps:$4 sm:$0xff]  }
 0x37e   :  { %1133 = vmatprep.subr.bf16.mxu0 %v5327_v8  ;;  %v5372_v8 = vld [vmem:[#allocation7 + $0xac] ss:$16 sps:$4 sm:$0xff]   ;;  %1645 = vmatprep.subr.bf16.mxu1 %v5369_v7  ;;  %v5436_v7 = vld [vmem:[#allocation7 + $0x148] ss:$16 sps:$4 sm:$0xff]  }
 0x381   :  { %1134 = vmatpush1.bf16.msra.mxu0 %v5325_v9  ;;  %v5367_v9 = vld [vmem:[#allocation7 + $0xa0] ss:$16 sps:$4 sm:$0xff]  }
 0x382   :  { %1135 = vmatprep.subr.bf16.mxu0 %v5330_v10  ;;  %v5370_v10 = vld [vmem:[#allocation7 + $0xa8] ss:$16 sps:$4 sm:$0xff]   ;;  %1646 = vmatpush1.bf16.msra.mxu1 %v5367_v9  ;;  %v5444_v9 = vld [vmem:[#allocation7 + $0x12c] ss:$16 sps:$4 sm:$0xff]  }
 0x385   :  { %1136 = vmatpush1.bf16.msra.mxu0 %v5328_v11  ;;  %v5375_v11 = vld [vmem:[#allocation7 + $0x84] ss:$16 sps:$4 sm:$0xff]  }
 0x386   :  { %1137 = vmatprep.subr.bf16.mxu0 %v5333_v12  ;;  %v5378_v12 = vld [vmem:[#allocation7 + $0x8c] ss:$16 sps:$4 sm:$0xff]   ;;  %1647 = vmatprep.subr.bf16.mxu1 %v5375_v11  ;;  %v5442_v11 = vld [vmem:[#allocation7 + $0x128] ss:$16 sps:$4 sm:$0xff]  }
 0x389   :  { %1138 = vmatpush2.bf16.msra.mxu0 %v5331_v13  ;;  %v5373_v13 = vld [vmem:[#allocation7 + $0x80] ss:$16 sps:$4 sm:$0xff]  }
 0x38a   :  { %1139 = vmatprep.subr.bf16.mxu0 %v5336_v15  ;;  %v5376_v15 = vld [vmem:[#allocation7 + $0x88] ss:$16 sps:$4 sm:$0xff]   ;;  %1648 = vmatpush1.bf16.msra.mxu1 %v5373_v13  ;;  %v5450_v13 = vld [vmem:[#allocation7 + $0x10c] ss:$16 sps:$4 sm:$0xff]  }
 0x38d   :  { %1140 = vmatpush2.bf16.msra.mxu0 %v5334_v16  ;;  %v5381_v16 = vld [vmem:[#allocation7 + $0x64] ss:$16 sps:$4 sm:$0xff]  }
 0x38e   :  { %1141 = vmatprep.subr.bf16.mxu0 %v5339_v17  ;;  %v5384_v17 = vld [vmem:[#allocation7 + $0x6c] ss:$16 sps:$4 sm:$0xff]   ;;  %1649 = vmatprep.subr.bf16.mxu1 %v5381_v16  ;;  %v5448_v16 = vld [vmem:[#allocation7 + $0x108] ss:$16 sps:$4 sm:$0xff]  }
 0x391   :  { %1142 = vmatpush2.bf16.msra.mxu0 %v5337_v18  ;;  %v5379_v18 = vld [vmem:[#allocation7 + $0x60] ss:$16 sps:$4 sm:$0xff]  }
 0x392   :  { %1143 = vmatprep.subr.bf16.mxu0 %v5342_v19  ;;  %v5382_v19 = vld [vmem:[#allocation7 + $0x68] ss:$16 sps:$4 sm:$0xff]   ;;  %1650 = vmatpush1.bf16.msra.mxu1 %v5379_v18  ;;  %v5456_v18 = vld [vmem:[#allocation10 + $0x174] ss:$8 sps:$4 sm:$0xff]  }
 0x395   :  { %1144 = vmatpush2.bf16.msra.mxu0 %v5340_v21  ;;  %v5387_v21 = vld [vmem:[#allocation7 + $0x44] ss:$16 sps:$4 sm:$0xff]  }
 0x396   :  { %1145 = vmatprep.subr.bf16.mxu0 %v5345_v22  ;;  %v5390_v22 = vld [vmem:[#allocation7 + $0x4c] ss:$16 sps:$4 sm:$0xff]   ;;  %1651 = vmatprep.subr.bf16.mxu1 %v5387_v21 }
 0x399   :  { %1146 = vmatpush2.bf16.msra.mxu0 %v5343_v23  ;;  %v5385_v23 = vld [vmem:[#allocation7 + $0x40] ss:$16 sps:$4 sm:$0xff]  }
 0x39a   :  { %1147 = vmatprep.subr.bf16.mxu0 %v5348_v24  ;;  %v5388_v24 = vld [vmem:[#allocation7 + $0x48] ss:$16 sps:$4 sm:$0xff]   ;;  %1652 = vmatpush1.bf16.msra.mxu1 %v5385_v23 }
 0x39d   :  { %1148 = vmatpush2.bf16.msra.mxu0 %v5346_v25  ;;  %v5393_v25 = vld [vmem:[#allocation7 + $0x24] ss:$16 sps:$4 sm:$0xff]  }
 0x39e   :  { %1149 = vmatprep.subr.bf16.mxu0 %v5351_v26  ;;  %v5396_v26 = vld [vmem:[#allocation7 + $0x2c] ss:$16 sps:$4 sm:$0xff]   ;;  %1653 = vmatprep.subr.bf16.mxu1 %v5393_v25 }
 0x3a1   :  { %1150 = vmatpush2.bf16.msra.mxu0 %v5349_v27  ;;  %v5391_v27 = vld [vmem:[#allocation7 + $0x20] ss:$16 sps:$4 sm:$0xff]  }
 0x3a2   :  { %1151 = vmatprep.subr.bf16.mxu0 %v5354_v29  ;;  %v5394_v29 = vld [vmem:[#allocation7 + $0x28] ss:$16 sps:$4 sm:$0xff]   ;;  %1654 = vmatpush1.bf16.msra.mxu1 %v5391_v27 }
 0x3a5   :  { %1152 = vmatpush2.bf16.msra.mxu0 %v5352_v30  ;;  %v5399_v30 = vld [vmem:[#allocation7 + $0x4] ss:$16 sps:$4 sm:$0xff]  }
 0x3a6   :  { %1684 = vmatprep.subr.bf16.mxu0 %v5360_v2  ;;  %1655 = vmatprep.subr.bf16.mxu1 %v5399_v30  ;;  %v5427_v2 = vld [vmem:[#allocation7 + $0x160] ss:$16 sps:$4 sm:$0xff]  }
 0x418   :  { %v783_v31 = vpop.f32.mrf.mxu0 }
 0x41a   :  { %v5137_v32 = vpop.f32.mrf.mxu0 }
 0x41b   :  { %v5397_v32 = vld [vmem:[#allocation7] ss:$16 sps:$4 sm:$0xff]  }
 0x41c   :  { %v786_v33 = vpop.f32.mrf.mxu0  ;;  %1656 = vmatpush1.bf16.msra.mxu1 %v5397_v32 }
 0x41d   :  { %v5400_v33 = vld [vmem:[#allocation7 + $0x8] ss:$16 sps:$4 sm:$0xff]  }
 0x41e   :  { %v5138_v34 = vpop.f32.mrf.mxu0 }
 0x41f   :  { %v5405_v34 = vld [vmem:[#allocation7 + $0x1e4] ss:$16 sps:$4 sm:$0xff]  }
 0x420   :  { %v829_v35 = vpop.f32.mrf.mxu1  ;;  %1657 = vmatprep.subr.bf16.mxu1 %v5405_v34 }
 0x421   :  { %v927_v45 = vpack.c.bf16 %v829_v35, %v783_v31  ;;  %v5402_v31 = vld [vmem:[#allocation7 + $0xc] ss:$16 sps:$4 sm:$0xff]  }
 0x422   :  { %v5143_v36 = vpop.f32.mrf.mxu1  ;;  %v5408_v35 = vld [vmem:[#allocation7 + $0x1ec] ss:$16 sps:$4 sm:$0xff]  }
 0x423   :  { %v5403_v36 = vld [vmem:[#allocation7 + $0x1e0] ss:$16 sps:$4 sm:$0xff]  }
 0x424   :  { %v832_v37 = vpop.f32.mrf.mxu1  ;;  %1658 = vmatpush2.bf16.msra.mxu1 %v5403_v36 }
 0x425   :  { %v5406_v37 = vld [vmem:[#allocation7 + $0x1e8] ss:$16 sps:$4 sm:$0xff]  }
 0x426   :  { %v5144_v38 = vpop.f32.mrf.mxu1 }
 0x428   :  { %v875_v39 = vpop.f32.mrf.mxu0 }
 0x42a   :  { %v5149_v40 = vpop.f32.mrf.mxu0 }
 0x42c   :  { %v878_v41 = vpop.f32.mrf.mxu0 }
 0x42e   :  { %v5150_v42 = vpop.f32.mrf.mxu0 }
 0x430   :  { %v921_v43 = vpop.f32.mrf.mxu1 }
 0x431   :  { %v928_v44 = vpack.c.bf16 %v921_v43, %v875_v39 }
 0x432   :  { %v5155_v46 = vpop.f32.mrf.mxu1 }
 0x433   :  { %1153 = vmatprep.mubr.bf16.mxu0 %v928_v44 }
 0x434   :  { %v924_v47 = vpop.f32.mrf.mxu1  ;;  %1154 = vmatmul.mubr.bf16.vlgmr.msra.gmra.mxu0 %v927_v45 }
 0x435   :  { %1685 = vmatpush1.bf16.msra.mxu0 %v5358_v1  ;;  %v5432_v1 = vld [vmem:[#allocation7 + $0x16c] ss:$16 sps:$4 sm:$0xff]  }
 0x436   :  { %v5156_v48 = vpop.f32.mrf.mxu1  ;;  %1686 = vmatprep.subr.bf16.mxu0 %v5366_v4  ;;  %v5435_v4 = vld [vmem:[#allocation7 + $0x144] ss:$16 sps:$4 sm:$0xff]  }
 0x439   :  { %1687 = vmatpush1.bf16.msra.mxu0 %v5364_v6  ;;  %v5433_v6 = vld [vmem:[#allocation7 + $0x140] ss:$16 sps:$4 sm:$0xff]  }
 0x43a   :  { %1688 = vmatprep.subr.bf16.mxu0 %v5372_v8  ;;  %v5441_v8 = vld [vmem:[#allocation7 + $0x124] ss:$16 sps:$4 sm:$0xff]  }
 0x43d   :  { %1689 = vmatpush1.bf16.msra.mxu0 %v5370_v10  ;;  %v5439_v10 = vld [vmem:[#allocation7 + $0x120] ss:$16 sps:$4 sm:$0xff]  }
 0x43e   :  { %1690 = vmatprep.subr.bf16.mxu0 %v5378_v12  ;;  %v5447_v12 = vld [vmem:[#allocation7 + $0x104] ss:$16 sps:$4 sm:$0xff]  }
 0x441   :  { %1691 = vmatpush1.bf16.msra.mxu0 %v5376_v15  ;;  %v5445_v15 = vld [vmem:[#allocation7 + $0x100] ss:$16 sps:$4 sm:$0xff]  }
 0x442   :  { %1692 = vmatprep.subr.bf16.mxu0 %v5384_v17  ;;  %v5453_v17 = vld [vmem:[#allocation10 + $0x74] ss:$8 sps:$4 sm:$0xff]  }
 0x445   :  { %1693 = vmatpush1.bf16.msra.mxu0 %v5382_v19 }
 0x446   :  { %1694 = vmatprep.subr.bf16.mxu0 %v5390_v22 }
 0x449   :  { %1695 = vmatpush1.bf16.msra.mxu0 %v5388_v24 }
 0x44a   :  { %1696 = vmatprep.subr.bf16.mxu0 %v5396_v26  ;;  %v1204_v26 = vlaneseq }
 0x44c   :  { %v6342_v27 = vshrl.u32 %v1204_v26, 7  ;;  %v5510_v26 = vld [vmem:[#allocation10 + $0x1e4] ss:$8 sps:$4 sm:$0xff]  }
 0x44d   :  { %1697 = vmatpush1.bf16.msra.mxu0 %v5394_v29 }
 0x44e   :  { %1698 = vmatprep.subr.bf16.mxu0 %v5402_v31  ;;  %v6345_v29 = vsub.s32 0, %v6342_v27  ;;  %v6348_v30 = vsub.s32 1, %v6342_v27  ;;  %v1168_v31 = vld [vmem:[%s6665_s6] sm:$0x3] }
 0x450   :  { %v1211_v36 = vrot.slane %v1168_v31, %v6348_v30 }
 0x451   :  { %1699 = vmatpush1.bf16.msra.mxu0 %v5400_v33  ;;  %v1169_v33 = vld [vmem:[#allocation5] sm:$0x3] }
 0x452   :  { %1700 = vmatprep.subr.bf16.mxu0 %v5408_v35  ;;  %v1207_v35 = vrot.slane %v1168_v31, %v6345_v29  ;;  %v5505_v31 = vld [vmem:[#allocation10 + $0xe0] ss:$8 sps:$4 sm:$0xff]  }
 0x455   :  { %1701 = vmatpush2.bf16.msra.mxu0 %v5406_v37 }
 0x4f4   :  { %v1155_v49 = vpop.f32.mrf.mxu0 }
 0x4f5   :  { %v6310_v52 = vadd.f32 %v5859_v51, %v1155_v49 }
 0x4f6   :  { %v1157_v50 = vpop.f32.mrf.mxu0 }
 0x4f7   :  { %v6312_v54 = vadd.f32 %v5860_v53, %v1157_v50  ;;  %v5414_v53 = vld [vmem:[#allocation7 + $0x1cc] ss:$16 sps:$4 sm:$0xff]  }
 0x4f8   :  { %v1159_v55 = vpop.f32.mrf.mxu0  ;;  %1702 = vmatprep.subr.bf16.mxu0 %v5414_v53 }
 0x4f9   :  { %v1170_v56 = vadd.f32 %v6312_v54, %v6310_v52  ;;  %v6316_v59 = vadd.f32 %v5861_v58, %v1159_v55  ;;  %v5412_v55 = vld [vmem:[#allocation7 + $0x1c8] ss:$16 sps:$4 sm:$0xff]   ;;  %v5415_v58 = vld [vmem:[#allocation7 + $0x1a0] ss:$16 sps:$4 sm:$0xff]  }
 0x4fa   :  { %v1161_v57 = vpop.f32.mrf.mxu0  ;;  %1703 = vmatpush2.bf16.msra.mxu0 %v5412_v55  ;;  %v5454_v55 = vld [vmem:[#allocation10 + $0x170] ss:$8 sps:$4 sm:$0xff]  }
 0x4fb   :  { %v6318_v61 = vadd.f32 %v5862_v60, %v1161_v57  ;;  %1171 = vadd.xlane.f32.xlu0 %v1170_v56  ;;  %v5417_v56 = vld [vmem:[#allocation7 + $0x1a4] ss:$16 sps:$4 sm:$0xff]   ;;  %v5420_v57 = vld [vmem:[#allocation7 + $0x1ac] ss:$16 sps:$4 sm:$0xff]  }
 0x4fc   :  { %1704 = vmatprep.subr.bf16.mxu0 %v5420_v57  ;;  %v5423_v60 = vld [vmem:[#allocation7 + $0x184] ss:$16 sps:$4 sm:$0xff]   ;;  %v5457_v57 = vld [vmem:[#allocation10 + $0x60] ss:$8 sps:$4 sm:$0xff]  }
 0x4fd   :  { %v1173_v62 = vadd.f32 %v6318_v61, %v6316_v59 }
 0x4ff   :  { %1174 = vadd.xlane.f32.xlu1 %v1173_v62  ;;  %v5424_v62 = vld [vmem:[#allocation7 + $0x188] ss:$16 sps:$4 sm:$0xff]  }
 0x584   :  { %v1172_v38 = vpop.xlane.xlu0 %1171 }
 0x585   :  { %v1177_v39 = vmul.f32 0.00390625, %v1172_v38 }
 0x587   :  { %v6323_v40 = vsub.f32 %v6310_v52, %v1177_v39  ;;  %v6326_v41 = vsub.f32 %v6312_v54, %v1177_v39  ;;  %v5411_v52 = vld [vmem:[#allocation7 + $0x1c4] ss:$16 sps:$4 sm:$0xff]   ;;  %v5409_v54 = vld [vmem:[#allocation7 + $0x1c0] ss:$16 sps:$4 sm:$0xff]   ;;  %v1222_v39 = vrot.slane %v1169_v33, %v6345_v29 }
 0x588   :  { %v1175_v42 = vpop.xlane.xlu1 %1174  ;;  %1659 = vmatprep.subr.bf16.mxu1 %v5411_v52 }
 0x589   :  { %v1178_v43 = vmul.f32 0.00390625, %v1175_v42  ;;  %v1183_v44 = vmul.f32 %v6323_v40, %v6323_v40  ;;  %v1184_v45 = vmul.f32 %v6326_v41, %v6326_v41  ;;  %1660 = vmatpush2.bf16.msra.mxu1 %v5409_v54  ;;  %v1226_v42 = vrot.slane %v1169_v33, %v6348_v30  ;;  %v5451_v54 = vld [vmem:[#allocation10 + $0x70] ss:$8 sps:$4 sm:$0xff]   ;;  %v5513_v33 = vld [vmem:[#allocation10 + $0xd4] ss:$8 sps:$4 sm:$0xff]  }
 0x58a   :  { %1661 = vmatprep.subr.bf16.mxu1 %v5417_v56  ;;  %v5462_v56 = vld [vmem:[#allocation10 + $0x164] ss:$8 sps:$4 sm:$0xff]  }
 0x58b   :  { %v6333_v46 = vsub.f32 %v6316_v59, %v1178_v43  ;;  %v6336_v47 = vsub.f32 %v6318_v61, %v1178_v43  ;;  %v1187_v48 = vadd.f32 %v1184_v45, %v1183_v44  ;;  %v5418_v59 = vld [vmem:[#allocation7 + $0x1a8] ss:$16 sps:$4 sm:$0xff]   ;;  %v5421_v61 = vld [vmem:[#allocation7 + $0x180] ss:$16 sps:$4 sm:$0xff]  }
 0x58c   :  { %1705 = vmatpush2.bf16.msra.mxu0 %v5418_v59  ;;  %v5465_v59 = vld [vmem:[#allocation10 + $0x54] ss:$8 sps:$4 sm:$0xff]  }
 0x58d   :  { %1188 = vadd.xlane.f32.xlu0 %v1187_v48  ;;  %v1185_v49 = vmul.f32 %v6333_v46, %v6333_v46  ;;  %v1186_v50 = vmul.f32 %v6336_v47, %v6336_v47  ;;  %1662 = vmatpush2.bf16.msra.mxu1 %v5415_v58  ;;  %v5460_v58 = vld [vmem:[#allocation10 + $0x160] ss:$8 sps:$4 sm:$0xff]  }
 0x58e   :  { %1663 = vmatprep.subr.bf16.mxu1 %v5423_v60  ;;  %1706 = vmatprep.subr.bf16.mxu0 %v5426_v63  ;;  %v5468_v60 = vld [vmem:[#allocation10 + $0x154] ss:$8 sps:$4 sm:$0xff]   ;;  %v5471_v63 = vld [vmem:[#allocation10 + $0x44] ss:$8 sps:$4 sm:$0xff]  }
 0x58f   :  { %v1190_v51 = vadd.f32 %v1186_v50, %v1185_v49 }
 0x590   :  { %1707 = vmatpush2.bf16.msra.mxu0 %v5424_v62  ;;  %v5466_v62 = vld [vmem:[#allocation10 + $0x150] ss:$8 sps:$4 sm:$0xff]  }
 0x591   :  { %1191 = vadd.xlane.f32.xlu1 %v1190_v51  ;;  %1664 = vmatpush2.bf16.msra.mxu1 %v5421_v61  ;;  %v5463_v61 = vld [vmem:[#allocation10 + $0x50] ss:$8 sps:$4 sm:$0xff]  }
 0x592   :  { %1665 = vmatprep.subr.bf16.mxu1 %v5429_v0  ;;  %1708 = vmatprep.subr.bf16.mxu0 %v5432_v1  ;;  %v5474_v0 = vld [vmem:[#allocation10 + $0x144] ss:$8 sps:$4 sm:$0xff]   ;;  %v5469_v1 = vld [vmem:[#allocation10 + $0x40] ss:$8 sps:$4 sm:$0xff]  }
 0x594   :  { %1709 = vmatpush2.bf16.msra.mxu0 %v5430_v3  ;;  %v5477_v3 = vld [vmem:[#allocation10 + $0x34] ss:$8 sps:$4 sm:$0xff]  }
 0x595   :  { %1666 = vmatpush2.bf16.msra.mxu1 %v5427_v2  ;;  %1710 = vmatprep.subr.bf16.mxu0 %v5438_v5  ;;  %v5472_v2 = vld [vmem:[#allocation10 + $0x140] ss:$8 sps:$4 sm:$0xff]   ;;  %v5475_v5 = vld [vmem:[#allocation10 + $0x30] ss:$8 sps:$4 sm:$0xff]  }
 0x596   :  { %1667 = vmatprep.subr.bf16.mxu1 %v5435_v4  ;;  %v5480_v4 = vld [vmem:[#allocation10 + $0x134] ss:$8 sps:$4 sm:$0xff]  }
 0x598   :  { %1711 = vmatpush2.bf16.msra.mxu0 %v5436_v7  ;;  %v5483_v7 = vld [vmem:[#allocation10 + $0x24] ss:$8 sps:$4 sm:$0xff]  }
 0x599   :  { %1668 = vmatpush2.bf16.msra.mxu1 %v5433_v6  ;;  %1712 = vmatprep.subr.bf16.mxu0 %v5444_v9  ;;  %v5478_v6 = vld [vmem:[#allocation10 + $0x130] ss:$8 sps:$4 sm:$0xff]   ;;  %v5481_v9 = vld [vmem:[#allocation10 + $0x20] ss:$8 sps:$4 sm:$0xff]  }
 0x59a   :  { %1669 = vmatprep.subr.bf16.mxu1 %v5441_v8  ;;  %v5486_v8 = vld [vmem:[#allocation10 + $0x124] ss:$8 sps:$4 sm:$0xff]  }
 0x59c   :  { %1713 = vmatpush2.bf16.msra.mxu0 %v5442_v11  ;;  %v5489_v11 = vld [vmem:[#allocation10 + $0x14] ss:$8 sps:$4 sm:$0xff]  }
 0x59d   :  { %1670 = vmatpush2.bf16.msra.mxu1 %v5439_v10  ;;  %1714 = vmatprep.subr.bf16.mxu0 %v5450_v13  ;;  %v5484_v10 = vld [vmem:[#allocation10 + $0x120] ss:$8 sps:$4 sm:$0xff]   ;;  %v5487_v13 = vld [vmem:[#allocation10 + $0x10] ss:$8 sps:$4 sm:$0xff]  }
 0x59e   :  { %1671 = vmatprep.subr.bf16.mxu1 %v5447_v12  ;;  %v5492_v12 = vld [vmem:[#allocation10 + $0x114] ss:$8 sps:$4 sm:$0xff]  }
 0x5a0   :  { %1715 = vmatpush2.bf16.msra.mxu0 %v5448_v16  ;;  %v5495_v16 = vld [vmem:[#allocation10 + $0x4] ss:$8 sps:$4 sm:$0xff]  }
 0x5a1   :  { %1672 = vmatpush2.bf16.msra.mxu1 %v5445_v15  ;;  %2178 = vmatprep.subr.bf16.mxu0 %v5456_v18  ;;  %v5490_v15 = vld [vmem:[#allocation10 + $0x110] ss:$8 sps:$4 sm:$0xff]   ;;  %v5493_v18 = vld [vmem:[#allocation10] ss:$8 sps:$4 sm:$0xff]  }
 0x5a2   :  { %2135 = vmatprep.subr.bf16.mxu1 %v5453_v17  ;;  %v5498_v17 = vld [vmem:[#allocation10 + $0x104] ss:$8 sps:$4 sm:$0xff]  }
 0x616   :  { %v1189_v19 = vpop.xlane.xlu0 %1188 }
 0x617   :  { %v1193_v21 = vmul.f32 0.00390625, %v1189_v19  ;;  %v5496_v19 = vld [vmem:[#allocation10 + $0x100] ss:$8 sps:$4 sm:$0xff]  }
 0x619   :  { %v1195_v22 = vadd.f32 1e-05, %v1193_v21  ;;  %v5501_v21 = vld [vmem:[#allocation10 + $0xf4] ss:$8 sps:$4 sm:$0xff]  }
 0x61a   :  { %v1192_v23 = vpop.xlane.xlu1 %1191 }
 0x61b   :  { %5827 = vrsqrt.f32 %v1195_v22  ;;  %v1194_v24 = vmul.f32 0.00390625, %v1192_v23  ;;  %v5504_v22 = vld [vmem:[#allocation10 + $0x1f4] ss:$8 sps:$4 sm:$0xff]   ;;  %v5499_v23 = vld [vmem:[#allocation10 + $0xf0] ss:$8 sps:$4 sm:$0xff]  }
 0x61d   :  { %v1196_v25 = vadd.f32 1e-05, %v1194_v24  ;;  %v5502_v24 = vld [vmem:[#allocation10 + $0x1f0] ss:$8 sps:$4 sm:$0xff]  }
 0x61f   :  { %5829 = vrsqrt.f32 %v1196_v25  ;;  %v5507_v25 = vld [vmem:[#allocation10 + $0xe4] ss:$8 sps:$4 sm:$0xff]  }
 0x628   :  { %v5828_v32 = vpop.eup %5827 }
 0x629   :  { %v1200_v34 = vmul.f32 %v5828_v32, %v6326_v41  ;;  %v1199_v37 = vmul.f32 %v5828_v32, %v6323_v40  ;;  %v5508_v32 = vld [vmem:[#allocation10 + $0x1e0] ss:$8 sps:$4 sm:$0xff]  }
 0x62b   :  { %v1215_v44 = vmul.f32 %v1211_v36, %v1200_v34  ;;  %v1214_v48 = vmul.f32 %v1207_v35, %v1199_v37  ;;  %v5516_v34 = vld [vmem:[#allocation10 + $0x1d4] ss:$8 sps:$4 sm:$0xff]   ;;  %v5519_v37 = vld [vmem:[#allocation10 + $0xc4] ss:$8 sps:$4 sm:$0xff]  }
 0x62c   :  { %v5830_v38 = vpop.eup %5829 }
 0x62d   :  { %v1202_v43 = vmul.f32 %v5830_v38, %v6336_v47  ;;  %v1201_v45 = vmul.f32 %v5830_v38, %v6333_v46  ;;  %v6361_v41 = vadd.f32 %v1226_v42, %v1215_v44  ;;  %v6365_v52 = vadd.f32 %v1222_v39, %v1214_v48  ;;  %v5459_v46 = vld [vmem:[#allocation10 + $0x64] ss:$8 sps:$4 sm:$0xff]   ;;  %v5528_v44 = vld [vmem:[#allocation10 + $0x1b4] ss:$8 sps:$4 sm:$0xff]   ;;  %v5526_v48 = vld [vmem:[#allocation10 + $0x1b0] ss:$8 sps:$4 sm:$0xff]  }
 0x62e   :  { %v5522_v38 = vld [vmem:[#allocation10 + $0x1c4] ss:$8 sps:$4 sm:$0xff]  }
 0x62f   :  { %v1217_v49 = vmul.f32 %v1211_v36, %v1202_v43  ;;  %v1216_v50 = vmul.f32 %v1207_v35, %v1201_v45  ;;  %v5511_v35 = vld [vmem:[#allocation10 + $0xd0] ss:$8 sps:$4 sm:$0xff]   ;;  %v5525_v43 = vld [vmem:[#allocation10 + $0xb4] ss:$8 sps:$4 sm:$0xff]  }
 0x630   :  { %v5514_v36 = vld [vmem:[#allocation10 + $0x1d0] ss:$8 sps:$4 sm:$0xff]  }
 0x631   :  { %v6363_v51 = vadd.f32 %v1226_v42, %v1217_v49  ;;  %v6367_v40 = vadd.f32 %v1222_v39, %v1216_v50  ;;  %v5517_v39 = vld [vmem:[#allocation10 + $0xc0] ss:$8 sps:$4 sm:$0xff]   ;;  %v5523_v45 = vld [vmem:[#allocation10 + $0xb0] ss:$8 sps:$4 sm:$0xff]   ;;  %v5531_v49 = vld [vmem:[#allocation10 + $0xa4] ss:$8 sps:$4 sm:$0xff]  }
 0x632   :  { %v5520_v42 = vld [vmem:[#allocation10 + $0x1c0] ss:$8 sps:$4 sm:$0xff]  }
 0x633   :  { %v1234_v53 = vpack.c.bf16 %v6363_v51, %v6361_v41  ;;  %v1233_v47 = vpack.c.bf16 %v6367_v40, %v6365_v52  ;;  %v5529_v50 = vld [vmem:[#allocation10 + $0xa0] ss:$8 sps:$4 sm:$0xff]  }
 0x635   :  { %1673 = vmatprep.mubr.bf16.mxu1 %v1234_v53  ;;  %1716 = vmatprep.mubr.bf16.mxu0 %v1234_v53  ;;  %v5534_v53 = vld [vmem:[#allocation10 + $0x1a4] ss:$8 sps:$4 sm:$0xff]  }
 0x636   :  { %1674 = vmatmul.mubr.bf16.vlgmr.msra.gmra.mxu1 %v1233_v47  ;;  %1717 = vmatmul.mubr.bf16.vlgmr.msra.gmra.mxu0 %v1233_v47  ;;  %v5532_v47 = vld [vmem:[#allocation10 + $0x1a0] ss:$8 sps:$4 sm:$0xff]  }
 0x637   :  { %2136 = vmatpush1.bf16.msra.mxu1 %v5451_v54  ;;  %2179 = vmatpush1.bf16.msra.mxu0 %v5454_v55  ;;  %v5537_v54 = vld [vmem:[#allocation10 + $0x94] ss:$8 sps:$4 sm:$0xff]   ;;  %v5535_v55 = vld [vmem:[#allocation10 + $0x90] ss:$8 sps:$4 sm:$0xff]  }
 0x638   :  { %2137 = vmatprep.subr.bf16.mxu1 %v5459_v46  ;;  %2180 = vmatprep.subr.bf16.mxu0 %v5462_v56  ;;  %v5540_v46 = vld [vmem:[#allocation10 + $0x194] ss:$8 sps:$4 sm:$0xff]   ;;  %v5538_v56 = vld [vmem:[#allocation10 + $0x190] ss:$8 sps:$4 sm:$0xff]  }
 0x63b   :  { %2138 = vmatpush1.bf16.msra.mxu1 %v5457_v57  ;;  %2181 = vmatpush1.bf16.msra.mxu0 %v5460_v58  ;;  %v5543_v57 = vld [vmem:[#allocation10 + $0x84] ss:$8 sps:$4 sm:$0xff]   ;;  %v5541_v58 = vld [vmem:[#allocation10 + $0x80] ss:$8 sps:$4 sm:$0xff]  }
 0x63c   :  { %2139 = vmatprep.subr.bf16.mxu1 %v5465_v59  ;;  %2182 = vmatprep.subr.bf16.mxu0 %v5468_v60  ;;  %v5546_v59 = vld [vmem:[#allocation10 + $0x184] ss:$8 sps:$4 sm:$0xff]   ;;  %v5544_v60 = vld [vmem:[#allocation10 + $0x180] ss:$8 sps:$4 sm:$0xff]  }
 0x63f   :  { %2140 = vmatpush1.bf16.msra.mxu1 %v5463_v61  ;;  %2183 = vmatpush1.bf16.msra.mxu0 %v5466_v62  ;;  %v5547_v61 = vld [vmem:[%s6661_s2 + $0x78] sm:$0xff]   ;;  %v1315_v62 = vsub.s32 3, %v6342_v27 }
 0x640   :  { %2141 = vmatprep.subr.bf16.mxu1 %v5471_v63  ;;  %2184 = vmatprep.subr.bf16.mxu0 %v5474_v0  ;;  %v1311_v63 = vsub.s32 2, %v6342_v27  ;;  %v1299_v0 = vld [vmem:[#allocation8] sm:$0xf] }
 0x643   :  { %2142 = vmatpush1.bf16.msra.mxu1 %v5469_v1  ;;  %2185 = vmatpush1.bf16.msra.mxu0 %v5472_v2 }
 0x644   :  { %2143 = vmatprep.subr.bf16.mxu1 %v5477_v3  ;;  %2186 = vmatprep.subr.bf16.mxu0 %v5480_v4  ;;  %v1308_v3 = vrot.slane %v1299_v0, %v6348_v30  ;;  %v1316_v4 = vrot.slane %v1299_v0, %v1315_v62 }
 0x647   :  { %2144 = vmatpush1.bf16.msra.mxu1 %v5475_v5  ;;  %2187 = vmatpush1.bf16.msra.mxu0 %v5478_v6  ;;  %v1304_v5 = vrot.slane %v1299_v0, %v6345_v29  ;;  %v1312_v6 = vrot.slane %v1299_v0, %v1311_v63 }
 0x648   :  { %2145 = vmatprep.subr.bf16.mxu1 %v5483_v7  ;;  %2188 = vmatprep.subr.bf16.mxu0 %v5486_v8 }
 0x64b   :  { %2146 = vmatpush1.bf16.msra.mxu1 %v5481_v9  ;;  %2189 = vmatpush1.bf16.msra.mxu0 %v5484_v10 }
 0x64c   :  { %2147 = vmatprep.subr.bf16.mxu1 %v5489_v11  ;;  %2190 = vmatprep.subr.bf16.mxu0 %v5492_v12 }
 0x64f   :  { %2148 = vmatpush1.bf16.msra.mxu1 %v5487_v13  ;;  %2191 = vmatpush1.bf16.msra.mxu0 %v5490_v15 }
 0x650   :  { %2149 = vmatprep.subr.bf16.mxu1 %v5495_v16  ;;  %2192 = vmatprep.subr.bf16.mxu0 %v5498_v17 }
 0x653   :  { %2150 = vmatpush1.bf16.msra.mxu1 %v5493_v18  ;;  %2193 = vmatpush1.bf16.msra.mxu0 %v5496_v19 }
 0x654   :  { %2151 = vmatprep.subr.bf16.mxu1 %v5501_v21  ;;  %2194 = vmatprep.subr.bf16.mxu0 %v5504_v22 }
 0x657   :  { %2152 = vmatpush2.bf16.msra.mxu1 %v5499_v23  ;;  %2195 = vmatpush2.bf16.msra.mxu0 %v5502_v24 }
 0x658   :  { %2153 = vmatprep.subr.bf16.mxu1 %v5507_v25  ;;  %2196 = vmatprep.subr.bf16.mxu0 %v5510_v26 }
 0x65b   :  { %2154 = vmatpush2.bf16.msra.mxu1 %v5505_v31  ;;  %2197 = vmatpush2.bf16.msra.mxu0 %v5508_v32 }
 0x65c   :  { %2155 = vmatprep.subr.bf16.mxu1 %v5513_v33  ;;  %2198 = vmatprep.subr.bf16.mxu0 %v5516_v34 }
 0x65f   :  { %2156 = vmatpush2.bf16.msra.mxu1 %v5511_v35  ;;  %2199 = vmatpush2.bf16.msra.mxu0 %v5514_v36 }
 0x660   :  { %2157 = vmatprep.subr.bf16.mxu1 %v5519_v37  ;;  %2200 = vmatprep.subr.bf16.mxu0 %v5522_v38 }
 0x663   :  { %2158 = vmatpush2.bf16.msra.mxu1 %v5517_v39  ;;  %2201 = vmatpush2.bf16.msra.mxu0 %v5520_v42  ;;  %v5548_v39 = vld [vmem:[%s6661_s2 + $0x70] sm:$0xff]   ;;  %v5549_v42 = vld [vmem:[%s6661_s2 + $0x68] sm:$0xff]  }
 0x664   :  { %2159 = vmatprep.subr.bf16.mxu1 %v5525_v43  ;;  %2202 = vmatprep.subr.bf16.mxu0 %v5528_v44  ;;  %v5550_v43 = vld [vmem:[%s6661_s2 + $0x60] sm:$0xff]   ;;  %v5551_v44 = vld [vmem:[%s6661_s2 + $0x58] sm:$0xff]  }
 0x667   :  { %2160 = vmatpush2.bf16.msra.mxu1 %v5523_v45  ;;  %2203 = vmatpush2.bf16.msra.mxu0 %v5526_v48  ;;  %v5552_v45 = vld [vmem:[%s6661_s2 + $0x50] sm:$0xff]   ;;  %v5553_v48 = vld [vmem:[%s6661_s2 + $0x48] sm:$0xff]  }
 0x668   :  { %2161 = vmatprep.subr.bf16.mxu1 %v5531_v49  ;;  %2204 = vmatprep.subr.bf16.mxu0 %v5534_v53  ;;  %v5554_v49 = vld [vmem:[%s6661_s2 + $0x40] sm:$0xff]   ;;  %v5556_v53 = vld [vmem:[%s6662_s3 + $0x70] sm:$0xff]  }
 0x66b   :  { %2162 = vmatpush2.bf16.msra.mxu1 %v5529_v50  ;;  %2205 = vmatpush2.bf16.msra.mxu0 %v5532_v47  ;;  %v5555_v50 = vld [vmem:[%s6662_s3 + $0x78] sm:$0xff]   ;;  %v5557_v47 = vld [vmem:[%s6662_s3 + $0x68] sm:$0xff]  }
 0x66c   :  { %2163 = vmatprep.subr.bf16.mxu1 %v5537_v54  ;;  %2206 = vmatprep.subr.bf16.mxu0 %v5540_v46  ;;  %v5558_v54 = vld [vmem:[%s6662_s3 + $0x60] sm:$0xff]   ;;  %v5561_v46 = vld [vmem:[%s6662_s3 + $0x48] sm:$0xff]  }
 0x66f   :  { %2164 = vmatpush2.bf16.msra.mxu1 %v5535_v55  ;;  %2207 = vmatpush2.bf16.msra.mxu0 %v5538_v56  ;;  %v5559_v55 = vld [vmem:[%s6662_s3 + $0x58] sm:$0xff]   ;;  %v5562_v56 = vld [vmem:[%s6662_s3 + $0x40] sm:$0xff]  }
 0x670   :  { %2165 = vmatprep.subr.bf16.mxu1 %v5543_v57  ;;  %2208 = vmatprep.subr.bf16.mxu0 %v5546_v59  ;;  %v1803_v57 = vld [vmem:[%s6670_s11] sm:$0x3] }
 0x671   :  { %v6442_v59 = vrot.slane %v1803_v57, %v6348_v30 }
 0x673   :  { %2166 = vmatpush2.bf16.msra.mxu1 %v5541_v58  ;;  %2209 = vmatpush2.bf16.msra.mxu0 %v5544_v60  ;;  %v1808_v58 = vrot.slane %v1803_v57, %v6345_v29 }
 0x674   :  { %5157 = vmatprep.subr.bf16.mxu1 %v5547_v61 }
 0x6f6   :  { %v1675_v1 = vpop.f32.mrf.mxu1  ;;  %v1718_v2 = vpop.f32.mrf.mxu0 }
 0x6f7   :  { %v1676_v16 = vadd.f32 %v1675_v1, %v1304_v5  ;;  %v1719_v17 = vadd.f32 %v1718_v2, %v1312_v6 }
 0x6f8   :  { %v1677_v7 = vpop.f32.mrf.mxu1  ;;  %v1720_v8 = vpop.f32.mrf.mxu0 }
 0x6f9   :  { %v1678_v11 = vadd.f32 %v1677_v7, %v1308_v3  ;;  %v1721_v12 = vadd.f32 %v1720_v8, %v1316_v4  ;;  %v1727_v33 = vmax.f32 %v1676_v16, 0.0  ;;  %v1729_v34 = vmax.f32 %v1719_v17, 0.0 }
 0x6fa   :  { %v1679_v9 = vpop.f32.mrf.mxu1  ;;  %v1722_v10 = vpop.f32.mrf.mxu0 }
 0x6fb   :  { %v1680_v13 = vadd.f32 %v1679_v9, %v1304_v5  ;;  %v1723_v15 = vadd.f32 %v1722_v10, %v1312_v6  ;;  %v1728_v25 = vmax.f32 %v1678_v11, 0.0  ;;  %v1730_v26 = vmax.f32 %v1721_v12, 0.0 }
 0x6fc   :  { %v1681_v18 = vpop.f32.mrf.mxu1  ;;  %v1724_v19 = vpop.f32.mrf.mxu0 }
 0x6fd   :  { %v1682_v21 = vadd.f32 %v1681_v18, %v1308_v3  ;;  %v1725_v22 = vadd.f32 %v1724_v19, %v1316_v4  ;;  %v1731_v23 = vmax.f32 %v1680_v13, 0.0  ;;  %v1733_v24 = vmax.f32 %v1723_v15, 0.0 }
 0x6ff   :  { %v1732_v31 = vmax.f32 %v1682_v21, 0.0  ;;  %v1734_v32 = vmax.f32 %v1725_v22, 0.0  ;;  %v1735_v37 = vpack.c.bf16 %v1731_v23, %v1727_v33  ;;  %v1737_v38 = vpack.c.bf16 %v1733_v24, %v1729_v34  ;;  %v5563_v33 = vld [vmem:[%s6663_s4 + $0x78] sm:$0xff]   ;;  %v5564_v34 = vld [vmem:[%s6663_s4 + $0x70] sm:$0xff]  }
 0x700   :  { %5197 = vmatprep.subr.bf16.mxu0 %v5563_v33 }
 0x701   :  { %v1736_v35 = vpack.c.bf16 %v1732_v31, %v1728_v25  ;;  %v1738_v36 = vpack.c.bf16 %v1734_v32, %v1730_v26 }
 0x703   :  { %2167 = vmatprep.mubr.bf16.mxu1 %v1736_v35  ;;  %2210 = vmatprep.mubr.bf16.mxu0 %v1738_v36  ;;  %v5565_v35 = vld [vmem:[%s6663_s4 + $0x68] sm:$0xff]   ;;  %v5566_v36 = vld [vmem:[%s6663_s4 + $0x60] sm:$0xff]  }
 0x704   :  { %2168 = vmatmul.mubr.bf16.vlgmr.msra.gmra.mxu1 %v1735_v37  ;;  %2211 = vmatmul.mubr.bf16.vlgmr.msra.gmra.mxu0 %v1737_v38  ;;  %v5567_v37 = vld [vmem:[%s6663_s4 + $0x58] sm:$0xff]   ;;  %v5568_v38 = vld [vmem:[%s6663_s4 + $0x50] sm:$0xff]  }
 0x705   :  { %5158 = vmatpush3.bf16.msra.mxu1 %v5547_v61  ;;  %5173 = vmatprep.mubr.bf16.mxu1 %v6200_v14 }
 0x706   :  { %5159 = vmatprep.subr.bf16.mxu1 %v5548_v39  ;;  %5213 = vmatprep.mubr.bf16.mxu0 %v6200_v14 }
 0x707   :  { %5198 = vmatpush3.bf16.msra.mxu0 %v5563_v33 }
 0x708   :  { %5199 = vmatprep.subr.bf16.mxu0 %v5564_v34 }
 0x709   :  { %5160 = vmatpush3.bf16.msra.mxu1 %v5548_v39  ;;  %v5569_v39 = vld [vmem:[%s6663_s4 + $0x48] sm:$0xff]  }
 0x70a   :  { %5161 = vmatprep.subr.bf16.mxu1 %v5549_v42 }
 0x70b   :  { %5200 = vmatpush3.bf16.msra.mxu0 %v5564_v34 }
 0x70c   :  { %5201 = vmatprep.subr.bf16.mxu0 %v5565_v35 }
 0x70d   :  { %5162 = vmatpush3.bf16.msra.mxu1 %v5549_v42  ;;  %v5570_v42 = vld [vmem:[%s6663_s4 + $0x40] sm:$0xff]  }
 0x70e   :  { %5163 = vmatprep.subr.bf16.mxu1 %v5550_v43 }
 0x70f   :  { %5202 = vmatpush3.bf16.msra.mxu0 %v5565_v35 }
 0x710   :  { %5203 = vmatprep.subr.bf16.mxu0 %v5566_v36 }
 0x711   :  { %5164 = vmatpush3.bf16.msra.mxu1 %v5550_v43 }
 0x712   :  { %5165 = vmatprep.subr.bf16.mxu1 %v5551_v44 }
 0x713   :  { %5204 = vmatpush3.bf16.msra.mxu0 %v5566_v36 }
 0x714   :  { %5205 = vmatprep.subr.bf16.mxu0 %v5567_v37 }
 0x715   :  { %5166 = vmatpush3.bf16.msra.mxu1 %v5551_v44 }
 0x716   :  { %5167 = vmatprep.subr.bf16.mxu1 %v5552_v45 }
 0x717   :  { %5206 = vmatpush3.bf16.msra.mxu0 %v5567_v37 }
 0x718   :  { %5207 = vmatprep.subr.bf16.mxu0 %v5568_v38 }
 0x719   :  { %5168 = vmatpush3.bf16.msra.mxu1 %v5552_v45 }
 0x71a   :  { %5169 = vmatprep.subr.bf16.mxu1 %v5553_v48 }
 0x71b   :  { %5208 = vmatpush3.bf16.msra.mxu0 %v5568_v38 }
 0x71c   :  { %5209 = vmatprep.subr.bf16.mxu0 %v5569_v39 }
 0x71d   :  { %5170 = vmatpush3.bf16.msra.mxu1 %v5553_v48 }
 0x71e   :  { %5171 = vmatprep.subr.bf16.mxu1 %v5554_v49 }
 0x71f   :  { %5210 = vmatpush3.bf16.msra.mxu0 %v5569_v39 }
 0x720   :  { %5211 = vmatprep.subr.bf16.mxu0 %v5570_v42 }
 0x721   :  { %5172 = vmatpush3.bf16.msra.mxu1 %v5554_v49 }
 0x722   :  { %5177 = vmatprep.subr.bf16.mxu1 %v5555_v50 }
 0x723   :  { %5212 = vmatpush3.bf16.msra.mxu0 %v5570_v42 }
 0x724   :  { %5174 = vmatmul.mubr.bf16.vlgmr.msra.gmra.mxu1 %v6219_v20  ;;  %5241 = vmatprep.subr.bf16.mxu0 %v6053_v28 }
 0x725   :  { %5178 = vmatpush3.bf16.msra.mxu1 %v5555_v50  ;;  %5193 = vmatprep.mubr.bf16.mxu1 %v6200_v14  ;;  %v5560_v14 = vld [vmem:[%s6662_s3 + $0x50] sm:$0xff]  }
 0x726   :  { %5179 = vmatprep.subr.bf16.mxu1 %v5556_v53  ;;  %5214 = vmatmul.mubr.bf16.vlgmr.msra.gmra.mxu0 %v6219_v20 }
 0x727   :  { %5243 = vmatprep.mubr.msk.bf16.mxu0 %vm6054_vm0, %v6053_v28 }
 0x729   :  { %5180 = vmatpush3.bf16.msra.mxu1 %v5556_v53 }
 0x72a   :  { %5181 = vmatprep.subr.bf16.mxu1 %v5557_v47 }
 0x72d   :  { %5182 = vmatpush3.bf16.msra.mxu1 %v5557_v47 }
 0x72e   :  { %5183 = vmatprep.subr.bf16.mxu1 %v5558_v54 }
 0x731   :  { %5184 = vmatpush3.bf16.msra.mxu1 %v5558_v54 }
 0x732   :  { %5185 = vmatprep.subr.bf16.mxu1 %v5559_v55 }
 0x735   :  { %5186 = vmatpush3.bf16.msra.mxu1 %v5559_v55 }
 0x736   :  { %5187 = vmatprep.subr.bf16.mxu1 %v5560_v14 }
 0x739   :  { %5188 = vmatpush3.bf16.msra.mxu1 %v5560_v14 }
 0x73a   :  { %5189 = vmatprep.subr.bf16.mxu1 %v5561_v46 }
 0x73d   :  { %5190 = vmatpush3.bf16.msra.mxu1 %v5561_v46 }
 0x73e   :  { %5191 = vmatprep.subr.bf16.mxu1 %v5562_v56 }
 0x741   :  { %5192 = vmatpush3.bf16.msra.mxu1 %v5562_v56 }
 0x742   :  { %5217 = vmatprep.subr.bf16.mxu1 %v6053_v28 }
 0x744   :  { %5194 = vmatmul.mubr.bf16.vlgmr.msra.gmra.mxu1 %v6219_v20 }
 0x745   :  { %5219 = vmatprep.mubr.msk.bf16.mxu1 %vm6054_vm0, %v6053_v28 }
 0x7c4   :  { %v2169_v60 = vpop.f32.mrf.mxu1  ;;  %v2212_v61 = vpop.f32.mrf.mxu0 }
 0x7c5   :  { %v2170_v0 = vadd.f32 %v2169_v60, %v1808_v58 }
 0x7c6   :  { %v2171_v1 = vpop.f32.mrf.mxu1  ;;  %v2214_v2 = vpop.f32.mrf.mxu0 }
 0x7c7   :  { %v6444_v3 = vadd.f32 %v2212_v61, %v2170_v0  ;;  %v2172_v4 = vadd.f32 %v2171_v1, %v6442_v59 }
 0x7c8   :  { %v2173_v5 = vpop.f32.mrf.mxu1  ;;  %v2216_v8 = vpop.f32.mrf.mxu0 }
 0x7c9   :  { %v6447_v6 = vadd.f32 %v2214_v2, %v2172_v4  ;;  %v2174_v7 = vadd.f32 %v2173_v5, %v1808_v58 }
 0x7ca   :  { %v6451_v10 = vpop.f32.mrf.mxu1 }
 0x7cb   :  { %v6449_v9 = vadd.f32 %v2216_v8, %v2174_v7 }
 0x7e4   :  { %v5175_v11 = vpop.f32.mrf.mxu1 }
 0x7e5   :  { %v4947_v26 = vpack.c.bf16 %v5175_v11, %v5175_v11 }
 0x7e6   :  { %v2392_v12 = vpop.f32.mrf.mxu1 }
 0x7e7   :  { %v4945_v22 = vpack.c.bf16 %v2392_v12, %v2392_v12 }
 0x7e8   :  { %v5176_v13 = vpop.f32.mrf.mxu1 }
 0x7e9   :  { %v4948_v32 = vpack.c.bf16 %v5176_v13, %v5176_v13 }
 0x7ea   :  { %v2395_v15 = vpop.f32.mrf.mxu1 }
 0x7eb   :  { %v4946_v24 = vpack.c.bf16 %v2395_v15, %v2395_v15 }
 0x804   :  { %v5195_v16 = vpop.f32.mrf.mxu1 }
 0x805   :  { %v4951_v25 = vpack.c.bf16 %v5195_v16, %v5195_v16 }
 0x806   :  { %v2506_v17 = vpop.f32.mrf.mxu1 }
 0x807   :  { %v4949_v18 = vpack.c.bf16 %v2506_v17, %v2506_v17 }
 0x808   :  { %v5196_v19 = vpop.f32.mrf.mxu1 }
 0x809   :  { %5218 = vmatpush3.bf16.xpose.msra.mxu1 %v4949_v18  ;;  %v4952_v31 = vpack.c.bf16 %v5196_v19, %v5196_v19 }
 0x80a   :  { %5223 = vmatprep.subr.bf16.mxu1 %v6053_v28  ;;  %v2509_v21 = vpop.f32.mrf.mxu1 }
 0x80b   :  { %v4950_v23 = vpack.c.bf16 %v2509_v21, %v2509_v21 }
 0x810   :  { %5220 = vmatmul.mubr.bf16.vlgmr.msra.gmra.mxu1 %v4945_v22 }
 0x811   :  { %5224 = vmatpush3.bf16.xpose.msra.mxu1 %v4950_v23  ;;  %5225 = vmatprep.mubr.msk.bf16.mxu1 %vm6054_vm0, %v6053_v28 }
 0x812   :  { %5229 = vmatprep.subr.bf16.mxu1 %v6053_v28 }
 0x818   :  { %5226 = vmatmul.mubr.bf16.vlgmr.msra.gmra.mxu1 %v4946_v24 }
 0x819   :  { %5230 = vmatpush3.bf16.xpose.msra.mxu1 %v4951_v25  ;;  %5231 = vmatprep.mubr.msk.bf16.mxu1 %vm6054_vm0, %v6053_v28 }
 0x81a   :  { %5235 = vmatprep.subr.bf16.mxu1 %v6053_v28 }
 0x820   :  { %5232 = vmatmul.mubr.bf16.vlgmr.msra.gmra.mxu1 %v4947_v26  ;;  %v6500_v26 = vpop.f32.mrf.mxu0 }
 0x821   :  { %5236 = vmatpush3.bf16.xpose.msra.mxu1 %v4952_v31  ;;  %5237 = vmatprep.mubr.msk.bf16.mxu1 %vm6054_vm0, %v6053_v28 }
 0x822   :  { %5247 = vmatprep.subr.bf16.mxu1 %v6053_v28  ;;  %v5215_v31 = vpop.f32.mrf.mxu0 }
 0x828   :  { %5238 = vmatmul.mubr.bf16.vlgmr.msra.gmra.mxu1 %v4948_v32  ;;  %v2620_v32 = vpop.f32.mrf.mxu0 }
 0x829   :  { %5249 = vmatprep.mubr.msk.bf16.mxu1 %vm6054_vm0, %v6053_v28  ;;  %v4953_v33 = vpack.c.bf16 %v2620_v32, %v2620_v32  ;;  %v5603_v32 = vld [vmem:[#allocation2 + $0x1d4] ss:$8 sps:$4 sm:$0xff]  }
 0x82a   :  { %v5216_v35 = vpop.f32.mrf.mxu0 }
 0x82b   :  { %v2891_v37 = vsel %vm745_vm2, %v4953_v33, 0  ;;  %v5601_v33 = vld [vmem:[#allocation2 + $0x1d0] ss:$8 sps:$4 sm:$0xff]  }
 0x82c   :  { %5242 = vmatpush3.bf16.msra.mxu0 %v2891_v37  ;;  %v2623_v38 = vpop.f32.mrf.mxu0  ;;  %v5607_v37 = vld [vmem:[#allocation2 + $0x1b0] ss:$8 sps:$4 sm:$0xff]  }
 0x82d   :  { %5253 = vmatprep.subr.bf16.mxu0 %v6053_v28  ;;  %v4954_v39 = vpack.c.bf16 %v2623_v38, %v2623_v38  ;;  %v5612_v38 = vld [vmem:[#allocation2 + $0x1a4] ss:$8 sps:$4 sm:$0xff]  }
 0x82f   :  { %v2937_v42 = vsel %vm745_vm2, %v4954_v39, 0  ;;  %v5610_v39 = vld [vmem:[#allocation2 + $0x1a0] ss:$8 sps:$4 sm:$0xff]  }
 0x830   :  { %5248 = vmatpush3.bf16.msra.mxu1 %v2937_v42  ;;  %v5615_v42 = vld [vmem:[#allocation2 + $0x194] ss:$8 sps:$4 sm:$0xff]  }
 0x831   :  { %5259 = vmatprep.subr.bf16.mxu1 %v6053_v28 }
 0x8d0   :  { %v2713_v43 = vpop.f32.mrf.mxu1 }
 0x8d1   :  { %v2839_v44 = vsel %vm693_vm1, %v2713_v43, -inf }
 0x8d2   :  { %2840 = vmax.xlane.f32.xlu0 %v2839_v44  ;;  %v5221_v45 = vpop.f32.mrf.mxu1 }
 0x8d3   :  { %v4955_v45 = vpack.c.bf16 %v5215_v31, %v5215_v31  ;;  %v5598_v31 = vld [vmem:[#allocation2 + $0x1e0] ss:$8 sps:$4 sm:$0xff]  }
 0x8d4   :  { %v2716_v48 = vpop.f32.mrf.mxu1 }
 0x8d6   :  { %v5222_v49 = vpop.f32.mrf.mxu1 }
 0x8d8   :  { %v2753_v50 = vpop.f32.mrf.mxu1 }
 0x8d9   :  { %v2842_v53 = vsel %vm693_vm1, %v2753_v50, -inf }
 0x8da   :  { %2843 = vmax.xlane.f32.xlu1 %v2842_v53  ;;  %v5227_v47 = vpop.f32.mrf.mxu1  ;;  %v2983_v53 = vsel %vm745_vm2, %v4955_v45, 0  ;;  %v5616_v45 = vld [vmem:[#allocation2 + $0x180] ss:$8 sps:$4 sm:$0xff]  }
 0x8dc   :  { %v2756_v54 = vpop.f32.mrf.mxu1 }
 0x8dd   :  { %v5573_v54 = vld [vmem:[#allocation2 + $0x174] ss:$8 sps:$4 sm:$0xff]  }
 0x8de   :  { %v5228_v55 = vpop.f32.mrf.mxu1 }
 0x8df   :  { %v4956_v55 = vpack.c.bf16 %v5216_v35, %v5216_v35  ;;  %v5604_v35 = vld [vmem:[#allocation2 + $0x1c0] ss:$8 sps:$4 sm:$0xff]  }
 0x8e0   :  { %v2793_v14 = vpop.f32.mrf.mxu1 }
 0x8e1   :  { %v2845_v20 = vsel %vm693_vm1, %v2793_v14, -inf }
 0x8e2   :  { %2846 = vmax.xlane.f32.xlu0 %v2845_v20  ;;  %v5233_v46 = vpop.f32.mrf.mxu1 }
 0x8e4   :  { %v2796_v56 = vpop.f32.mrf.mxu1 }
 0x8e5   :  { %v3029_v56 = vsel %vm745_vm2, %v4956_v55, 0 }
 0x8e6   :  { %v5234_v57 = vpop.f32.mrf.mxu1 }
 0x8e8   :  { %v2833_v58 = vpop.f32.mrf.mxu1 }
 0x8e9   :  { %v2848_v60 = vsel %vm693_vm1, %v2833_v58, -inf }
 0x8ea   :  { %2849 = vmax.xlane.f32.xlu1 %v2848_v60  ;;  %v5239_v61 = vpop.f32.mrf.mxu1 }
 0x8eb   :  { %v5571_v61 = vld [vmem:[#allocation2 + $0x170] ss:$8 sps:$4 sm:$0xff]  }
 0x8ec   :  { %v2836_v0 = vpop.f32.mrf.mxu1 }
 0x8ee   :  { %v5240_v1 = vpop.f32.mrf.mxu1 }
 0x8ef   :  { %v5576_v1 = vld [vmem:[#allocation2 + $0x164] ss:$8 sps:$4 sm:$0xff]  }
 0x95b   :  { %v2841_v2 = vpop.xlane.xlu0 %2840 }
 0x95c   :  { %v2851_v4 = vsub.f32 %v2713_v43, %v2841_v2  ;;  %v5574_v2 = vld [vmem:[#allocation2 + $0x160] ss:$8 sps:$4 sm:$0xff]  }
 0x95e   :  { %v2855_v5 = vmul.f32 1.442695, %v2851_v4  ;;  %v5579_v4 = vld [vmem:[#allocation2 + $0x154] ss:$8 sps:$4 sm:$0xff]  }
 0x960   :  { %5831 = vpow2.f32 %v2855_v5 }
 0x963   :  { %v2844_v7 = vpop.xlane.xlu1 %2843 }
 0x964   :  { %v2852_v8 = vsub.f32 %v2753_v50, %v2844_v7 }
 0x966   :  { %v2857_v11 = vmul.f32 1.442695, %v2852_v8  ;;  %v5577_v8 = vld [vmem:[#allocation2 + $0x150] ss:$8 sps:$4 sm:$0xff]  }
 0x968   :  { %5833 = vpow2.f32 %v2857_v11 }
 0x96b   :  { %v2847_v12 = vpop.xlane.xlu0 %2846 }
 0x96c   :  { %v2853_v13 = vsub.f32 %v2793_v14, %v2847_v12  ;;  %v5582_v12 = vld [vmem:[#allocation2 + $0x144] ss:$8 sps:$4 sm:$0xff]  }
 0x96d   :  { %v5832_v15 = vpop.eup %5831 }
 0x96e   :  { %v2859_v16 = vmul.f32 1.442695, %v2853_v13  ;;  %v2863_v17 = vsel %vm693_vm1, %v5832_v15, 0.0  ;;  %v5585_v13 = vld [vmem:[#allocation2 + $0x134] ss:$8 sps:$4 sm:$0xff]  }
 0x96f   :  { %2864 = vadd.xlane.f32.xlu0 %v2863_v17  ;;  %v5586_v17 = vld [vmem:[#allocation2 + $0x120] ss:$8 sps:$4 sm:$0xff]  }
 0x970   :  { %5835 = vpow2.f32 %v2859_v16  ;;  %v5588_v16 = vld [vmem:[#allocation2 + $0x124] ss:$8 sps:$4 sm:$0xff]  }
 0x973   :  { %v2850_v18 = vpop.xlane.xlu1 %2849 }
 0x974   :  { %v2854_v19 = vsub.f32 %v2833_v58, %v2850_v18  ;;  %v5591_v18 = vld [vmem:[#allocation2 + $0x114] ss:$8 sps:$4 sm:$0xff]  }
 0x975   :  { %v5834_v21 = vpop.eup %5833 }
 0x976   :  { %v2861_v22 = vmul.f32 1.442695, %v2854_v19  ;;  %v2866_v23 = vsel %vm693_vm1, %v5834_v21, 0.0  ;;  %v5589_v19 = vld [vmem:[#allocation2 + $0x110] ss:$8 sps:$4 sm:$0xff]  }
 0x977   :  { %2867 = vadd.xlane.f32.xlu1 %v2866_v23  ;;  %v5597_v23 = vld [vmem:[#allocation2 + $0x1f4] ss:$8 sps:$4 sm:$0xff]  }
 0x978   :  { %5837 = vpow2.f32 %v2861_v22  ;;  %v5592_v22 = vld [vmem:[#allocation2 + $0x100] ss:$8 sps:$4 sm:$0xff]  }
 0x97d   :  { %v5836_v24 = vpop.eup %5835 }
 0x97e   :  { %v2869_v25 = vsel %vm693_vm1, %v5836_v24, 0.0 }
 0x97f   :  { %2870 = vadd.xlane.f32.xlu0 %v2869_v25  ;;  %v5600_v25 = vld [vmem:[#allocation2 + $0x1e4] ss:$8 sps:$4 sm:$0xff]  }
 0x985   :  { %v5838_v34 = vpop.eup %5837 }
 0x986   :  { %v2872_v36 = vsel %vm693_vm1, %v5838_v34, 0.0 }
 0x987   :  { %2873 = vadd.xlane.f32.xlu1 %v2872_v36  ;;  %v5609_v36 = vld [vmem:[#allocation2 + $0x1b4] ss:$8 sps:$4 sm:$0xff]  }
 0x9f8   :  { %v2865_v43 = vpop.xlane.xlu0 %2864 }
 0x9f9   :  { %5839 = vrcp.f32 %v2865_v43  ;;  %v5613_v43 = vld [vmem:[#allocation2 + $0x190] ss:$8 sps:$4 sm:$0xff]  }
 0xa00   :  { %v2868_v44 = vpop.xlane.xlu1 %2867 }
 0xa01   :  { %5841 = vrcp.f32 %v2868_v44  ;;  %v5618_v44 = vld [vmem:[#allocation2 + $0x184] ss:$8 sps:$4 sm:$0xff]  }
 0xa06   :  { %v5840_v48 = vpop.eup %5839 }
 0xa07   :  { %v2879_v49 = vmul.f32 %v5840_v48, %v5832_v15  ;;  %v5583_v15 = vld [vmem:[#allocation2 + $0x130] ss:$8 sps:$4 sm:$0xff]  }
 0xa08   :  { %v2871_v50 = vpop.xlane.xlu0 %2870 }
 0xa09   :  { %5843 = vrcp.f32 %v2871_v50  ;;  %v2883_v47 = vpack.c.bf16 %v2879_v49, %v2879_v49 }
 0xa0b   :  { %5244 = vmatmul.mubr.msk.bf16.vlgmr.msra.gmra.mxu0 %vm693_vm1, %v2883_v47 }
 0xa0c   :  { %5254 = vmatpush3.bf16.msra.mxu0 %v2983_v53  ;;  %5255 = vmatprep.mubr.msk.bf16.mxu0 %vm6054_vm0, %v6053_v28 }
 0xa0d   :  { %3266 = vmatprep.subr.bf16.mxu0 %v5573_v54 }
 0xa0e   :  { %v5842_v14 = vpop.eup %5841 }
 0xa0f   :  { %v2880_v20 = vmul.f32 %v5842_v14, %v5834_v21  ;;  %v5594_v21 = vld [vmem:[#allocation2 + $0x104] ss:$8 sps:$4 sm:$0xff]  }
 0xa10   :  { %v2874_v46 = vpop.xlane.xlu1 %2873 }
 0xa11   :  { %5845 = vrcp.f32 %v2874_v46  ;;  %v2884_v57 = vpack.c.bf16 %v2880_v20, %v2880_v20 }
 0xa13   :  { %5250 = vmatmul.mubr.msk.bf16.vlgmr.msra.gmra.mxu1 %vm693_vm1, %v2884_v57 }
 0xa14   :  { %5260 = vmatpush3.bf16.msra.mxu1 %v3029_v56  ;;  %5261 = vmatprep.mubr.msk.bf16.mxu1 %vm6054_vm0, %v6053_v28  ;;  %v5580_v28 = vld [vmem:[#allocation2 + $0x140] ss:$8 sps:$4 sm:$0xff]  }
 0xa16   :  { %v5844_v58 = vpop.eup %5843 }
 0xa17   :  { %v2881_v60 = vmul.f32 %v5844_v58, %v5836_v24  ;;  %v5595_v24 = vld [vmem:[#allocation2 + $0x1f0] ss:$8 sps:$4 sm:$0xff]  }
 0xa19   :  { %v2885_v0 = vpack.c.bf16 %v2881_v60, %v2881_v60 }
 0xa1b   :  { %5256 = vmatmul.mubr.msk.bf16.vlgmr.msra.gmra.mxu0 %vm693_vm1, %v2885_v0 }
 0xa1c   :  { %3267 = vmatpush1.bf16.msra.mxu0 %v5571_v61 }
 0xa1d   :  { %3268 = vmatprep.subr.bf16.mxu0 %v5576_v1 }
 0xa1e   :  { %v5846_v5 = vpop.eup %5845 }
 0xa1f   :  { %v2882_v7 = vmul.f32 %v5846_v5, %v5838_v34  ;;  %v5606_v34 = vld [vmem:[#allocation2 + $0x1c4] ss:$8 sps:$4 sm:$0xff]  }
 0xa20   :  { %3269 = vmatpush1.bf16.msra.mxu0 %v5574_v2 }
 0xa21   :  { %v2886_v11 = vpack.c.bf16 %v2882_v7, %v2882_v7  ;;  %3270 = vmatprep.subr.bf16.mxu0 %v5579_v4  ;;  %v5863_v7 = vld [vmem:[#allocation13] sm:$0xff] }
 0xa23   :  { %5262 = vmatmul.mubr.msk.bf16.vlgmr.msra.gmra.mxu1 %vm693_vm1, %v2886_v11  ;;  %v5864_v11 = vld [vmem:[#allocation13 + $0x8] sm:$0xff] }
 0xa24   :  { %3271 = vmatpush1.bf16.msra.mxu0 %v5577_v8 }
 0xa25   :  { %3272 = vmatprep.subr.bf16.mxu0 %v5582_v12 }
 0xa28   :  { %3273 = vmatpush1.bf16.msra.mxu0 %v5580_v28 }
 0xa29   :  { %3274 = vmatprep.subr.bf16.mxu0 %v5585_v13 }
 0xa2c   :  { %3275 = vmatpush1.bf16.msra.mxu0 %v5583_v15 }
 0xa2d   :  { %3276 = vmatprep.subr.bf16.mxu0 %v5588_v16  ;;  %v5865_v16 = vld [vmem:[#allocation13 + $0x10] sm:$0xff] }
 0xa30   :  { %3277 = vmatpush1.bf16.msra.mxu0 %v5586_v17 }
 0xa31   :  { %3278 = vmatprep.subr.bf16.mxu0 %v5591_v18  ;;  %v5866_v18 = vld [vmem:[#allocation13 + $0x18] sm:$0xff] }
 0xa34   :  { %3279 = vmatpush1.bf16.msra.mxu0 %v5589_v19 }
 0xa35   :  { %3280 = vmatprep.subr.bf16.mxu0 %v5594_v21 }
 0xa38   :  { %3281 = vmatpush1.bf16.msra.mxu0 %v5592_v22  ;;  %v5619_v22 = vld [vmem:[#allocation7 + $0x2e0] ss:$16 sps:$4 sm:$0xff]  }
 0xa39   :  { %3282 = vmatprep.subr.bf16.mxu0 %v5597_v23  ;;  %v5621_v23 = vld [vmem:[#allocation7 + $0x2e4] ss:$16 sps:$4 sm:$0xff]  }
 0xa3a   :  { %3789 = vmatprep.subr.bf16.mxu1 %v5621_v23  ;;  %v6554_v23 = vadd.f32 %v6444_v3, %v6365_v52  ;;  %v5675_v3 = vld [vmem:[#allocation7 + $0x3c4] ss:$16 sps:$4 sm:$0xff]  }
 0xa3b   :  { %3790 = vmatpush1.bf16.msra.mxu1 %v5619_v22  ;;  %v6543_v22 = vadd.f32 %v6447_v6, %v6361_v41 }
 0xa3c   :  { %3283 = vmatpush2.bf16.msra.mxu0 %v5595_v24  ;;  %v5622_v24 = vld [vmem:[#allocation7 + $0x2e8] ss:$16 sps:$4 sm:$0xff]  }
 0xa3d   :  { %3284 = vmatprep.subr.bf16.mxu0 %v5600_v25  ;;  %v5624_v25 = vld [vmem:[#allocation7 + $0x2ec] ss:$16 sps:$4 sm:$0xff]  }
 0xa40   :  { %3285 = vmatpush2.bf16.msra.mxu0 %v5598_v31  ;;  %v5627_v31 = vld [vmem:[#allocation7 + $0x2c4] ss:$16 sps:$4 sm:$0xff]  }
 0xa41   :  { %3286 = vmatprep.subr.bf16.mxu0 %v5603_v32  ;;  %v5630_v32 = vld [vmem:[#allocation7 + $0x2cc] ss:$16 sps:$4 sm:$0xff]   ;;  %3791 = vmatprep.subr.bf16.mxu1 %v5627_v31  ;;  %v5673_v31 = vld [vmem:[#allocation7 + $0x3c0] ss:$16 sps:$4 sm:$0xff]  }
 0xa44   :  { %3287 = vmatpush2.bf16.msra.mxu0 %v5601_v33  ;;  %v5625_v33 = vld [vmem:[#allocation7 + $0x2c0] ss:$16 sps:$4 sm:$0xff]  }
 0xa45   :  { %3288 = vmatprep.subr.bf16.mxu0 %v5606_v34  ;;  %v5628_v34 = vld [vmem:[#allocation7 + $0x2c8] ss:$16 sps:$4 sm:$0xff]   ;;  %3792 = vmatpush1.bf16.msra.mxu1 %v5625_v33  ;;  %v5684_v33 = vld [vmem:[#allocation7 + $0x3ac] ss:$16 sps:$4 sm:$0xff]  }
 0xa48   :  { %3289 = vmatpush2.bf16.msra.mxu0 %v5604_v35  ;;  %v5633_v35 = vld [vmem:[#allocation7 + $0x2a4] ss:$16 sps:$4 sm:$0xff]  }
 0xa49   :  { %3290 = vmatprep.subr.bf16.mxu0 %v5609_v36  ;;  %v5636_v36 = vld [vmem:[#allocation7 + $0x2ac] ss:$16 sps:$4 sm:$0xff]   ;;  %3793 = vmatprep.subr.bf16.mxu1 %v5633_v35  ;;  %v5682_v35 = vld [vmem:[#allocation7 + $0x3a8] ss:$16 sps:$4 sm:$0xff]  }
 0xa4c   :  { %3291 = vmatpush2.bf16.msra.mxu0 %v5607_v37  ;;  %v5631_v37 = vld [vmem:[#allocation7 + $0x2a0] ss:$16 sps:$4 sm:$0xff]  }
 0xa4d   :  { %3292 = vmatprep.subr.bf16.mxu0 %v5612_v38  ;;  %v5634_v38 = vld [vmem:[#allocation7 + $0x2a8] ss:$16 sps:$4 sm:$0xff]   ;;  %3794 = vmatpush1.bf16.msra.mxu1 %v5631_v37  ;;  %v5690_v37 = vld [vmem:[#allocation7 + $0x38c] ss:$16 sps:$4 sm:$0xff]  }
 0xa50   :  { %3293 = vmatpush2.bf16.msra.mxu0 %v5610_v39  ;;  %v5639_v39 = vld [vmem:[#allocation7 + $0x284] ss:$16 sps:$4 sm:$0xff]  }
 0xa51   :  { %3294 = vmatprep.subr.bf16.mxu0 %v5615_v42  ;;  %v5642_v42 = vld [vmem:[#allocation7 + $0x28c] ss:$16 sps:$4 sm:$0xff]   ;;  %3795 = vmatprep.subr.bf16.mxu1 %v5639_v39 }
 0xa52   :  { %v5696_v39 = vld [vmem:[#allocation7 + $0x36c] ss:$16 sps:$4 sm:$0xff]  }
 0xa54   :  { %3295 = vmatpush2.bf16.msra.mxu0 %v5613_v43  ;;  %v5637_v43 = vld [vmem:[#allocation7 + $0x280] ss:$16 sps:$4 sm:$0xff]  }
 0xa55   :  { %3296 = vmatprep.subr.bf16.mxu0 %v5618_v44  ;;  %v5640_v44 = vld [vmem:[#allocation7 + $0x288] ss:$16 sps:$4 sm:$0xff]   ;;  %3796 = vmatpush1.bf16.msra.mxu1 %v5637_v43 }
 0xa56   :  { %v5694_v43 = vld [vmem:[#allocation7 + $0x368] ss:$16 sps:$4 sm:$0xff]  }
 0xa58   :  { %3297 = vmatpush2.bf16.msra.mxu0 %v5616_v45  ;;  %v5645_v45 = vld [vmem:[#allocation7 + $0x264] ss:$16 sps:$4 sm:$0xff]  }
 0xa59   :  { %3832 = vmatprep.subr.bf16.mxu0 %v5624_v25  ;;  %3797 = vmatprep.subr.bf16.mxu1 %v5645_v45  ;;  %v5678_v25 = vld [vmem:[#allocation7 + $0x3cc] ss:$16 sps:$4 sm:$0xff]  }
 0xa5a   :  { %v5702_v45 = vld [vmem:[#allocation7 + $0x34c] ss:$16 sps:$4 sm:$0xff]  }
 0xacb   :  { %v2927_v48 = vpop.f32.mrf.mxu0 }
 0xacd   :  { %v5245_v49 = vpop.f32.mrf.mxu0 }
 0xace   :  { %v5643_v49 = vld [vmem:[#allocation7 + $0x260] ss:$16 sps:$4 sm:$0xff]  }
 0xacf   :  { %v2930_v50 = vpop.f32.mrf.mxu0  ;;  %3798 = vmatpush1.bf16.msra.mxu1 %v5643_v49  ;;  %v5700_v49 = vld [vmem:[#allocation7 + $0x348] ss:$16 sps:$4 sm:$0xff]  }
 0xad0   :  { %v5646_v50 = vld [vmem:[#allocation7 + $0x268] ss:$16 sps:$4 sm:$0xff]  }
 0xad1   :  { %v5246_v53 = vpop.f32.mrf.mxu0 }
 0xad2   :  { %v5651_v53 = vld [vmem:[#allocation7 + $0x244] ss:$16 sps:$4 sm:$0xff]  }
 0xad3   :  { %v2973_v47 = vpop.f32.mrf.mxu1  ;;  %3799 = vmatprep.subr.bf16.mxu1 %v5651_v53  ;;  %v5708_v53 = vld [vmem:[#allocation7 + $0x32c] ss:$16 sps:$4 sm:$0xff]  }
 0xad4   :  { %v3071_v61 = vpack.c.bf16 %v2973_v47, %v2927_v48  ;;  %v5648_v48 = vld [vmem:[#allocation7 + $0x26c] ss:$16 sps:$4 sm:$0xff]  }
 0xad5   :  { %v5251_v54 = vpop.f32.mrf.mxu1  ;;  %v5654_v47 = vld [vmem:[#allocation7 + $0x24c] ss:$16 sps:$4 sm:$0xff]  }
 0xad6   :  { %v5649_v54 = vld [vmem:[#allocation7 + $0x240] ss:$16 sps:$4 sm:$0xff]  }
 0xad7   :  { %v2976_v55 = vpop.f32.mrf.mxu1  ;;  %3800 = vmatpush1.bf16.msra.mxu1 %v5649_v54  ;;  %v5706_v54 = vld [vmem:[#allocation7 + $0x328] ss:$16 sps:$4 sm:$0xff]  }
 0xad8   :  { %v5652_v55 = vld [vmem:[#allocation7 + $0x248] ss:$16 sps:$4 sm:$0xff]  }
 0xad9   :  { %v5252_v14 = vpop.f32.mrf.mxu1 }
 0xada   :  { %v5657_v14 = vld [vmem:[#allocation7 + $0x224] ss:$16 sps:$4 sm:$0xff]  }
 0xadb   :  { %v3019_v20 = vpop.f32.mrf.mxu0  ;;  %3801 = vmatprep.subr.bf16.mxu1 %v5657_v14  ;;  %v5714_v14 = vld [vmem:[#allocation7 + $0x30c] ss:$16 sps:$4 sm:$0xff]  }
 0xadd   :  { %v5257_v46 = vpop.f32.mrf.mxu0 }
 0xade   :  { %v5655_v46 = vld [vmem:[#allocation7 + $0x220] ss:$16 sps:$4 sm:$0xff]  }
 0xadf   :  { %v3022_v56 = vpop.f32.mrf.mxu0  ;;  %3802 = vmatpush1.bf16.msra.mxu1 %v5655_v46  ;;  %v5712_v46 = vld [vmem:[#allocation7 + $0x308] ss:$16 sps:$4 sm:$0xff]  }
 0xae0   :  { %v5658_v56 = vld [vmem:[#allocation7 + $0x228] ss:$16 sps:$4 sm:$0xff]  }
 0xae1   :  { %v5258_v57 = vpop.f32.mrf.mxu0 }
 0xae2   :  { %v5663_v57 = vld [vmem:[#allocation7 + $0x204] ss:$16 sps:$4 sm:$0xff]  }
 0xae3   :  { %v3065_v58 = vpop.f32.mrf.mxu1  ;;  %3803 = vmatprep.subr.bf16.mxu1 %v5663_v57  ;;  %v5720_v57 = vld [vmem:[#allocation10 + $0x374] ss:$8 sps:$4 sm:$0xff]  }
 0xae4   :  { %v3072_v60 = vpack.c.bf16 %v3065_v58, %v3019_v20  ;;  %v5660_v20 = vld [vmem:[#allocation7 + $0x22c] ss:$16 sps:$4 sm:$0xff]  }
 0xae5   :  { %v5263_v0 = vpop.f32.mrf.mxu1  ;;  %v5666_v58 = vld [vmem:[#allocation7 + $0x20c] ss:$16 sps:$4 sm:$0xff]  }
 0xae6   :  { %3298 = vmatprep.mubr.bf16.mxu0 %v3072_v60  ;;  %v5661_v60 = vld [vmem:[#allocation7 + $0x200] ss:$16 sps:$4 sm:$0xff]   ;;  %v5669_v0 = vld [vmem:[#allocation7 + $0x3e4] ss:$16 sps:$4 sm:$0xff]  }
 0xae7   :  { %v3068_v1 = vpop.f32.mrf.mxu1  ;;  %3299 = vmatmul.mubr.bf16.vlgmr.msra.gmra.mxu0 %v3071_v61  ;;  %v5664_v61 = vld [vmem:[#allocation7 + $0x208] ss:$16 sps:$4 sm:$0xff]   ;;  %3804 = vmatpush1.bf16.msra.mxu1 %v5661_v60 }
 0xae8   :  { %3833 = vmatpush1.bf16.msra.mxu0 %v5622_v24  ;;  %v5672_v1 = vld [vmem:[#allocation7 + $0x3ec] ss:$16 sps:$4 sm:$0xff]   ;;  %3805 = vmatprep.subr.bf16.mxu1 %v5669_v0 }
 0xae9   :  { %v5264_v2 = vpop.f32.mrf.mxu1  ;;  %3834 = vmatprep.subr.bf16.mxu0 %v5630_v32  ;;  %v5676_v32 = vld [vmem:[#allocation7 + $0x3c8] ss:$16 sps:$4 sm:$0xff]  }
 0xaea   :  { %v5667_v2 = vld [vmem:[#allocation7 + $0x3e0] ss:$16 sps:$4 sm:$0xff]  }
 0xaeb   :  { %3806 = vmatpush2.bf16.msra.mxu1 %v5667_v2 }
 0xaec   :  { %3835 = vmatpush1.bf16.msra.mxu0 %v5628_v34  ;;  %3807 = vmatprep.subr.bf16.mxu1 %v5675_v3  ;;  %v5679_v34 = vld [vmem:[#allocation7 + $0x3a0] ss:$16 sps:$4 sm:$0xff]  }
 0xaed   :  { %3836 = vmatprep.subr.bf16.mxu0 %v5636_v36  ;;  %v5688_v36 = vld [vmem:[#allocation7 + $0x388] ss:$16 sps:$4 sm:$0xff]  }
 0xaef   :  { %3808 = vmatpush2.bf16.msra.mxu1 %v5673_v31 }
 0xaf0   :  { %3837 = vmatpush1.bf16.msra.mxu0 %v5634_v38  ;;  %v5693_v38 = vld [vmem:[#allocation7 + $0x364] ss:$16 sps:$4 sm:$0xff]  }
 0xaf1   :  { %3838 = vmatprep.subr.bf16.mxu0 %v5642_v42  ;;  %v5691_v42 = vld [vmem:[#allocation7 + $0x360] ss:$16 sps:$4 sm:$0xff]  }
 0xaf4   :  { %3839 = vmatpush1.bf16.msra.mxu0 %v5640_v44  ;;  %v5699_v44 = vld [vmem:[#allocation7 + $0x344] ss:$16 sps:$4 sm:$0xff]  }
 0xaf5   :  { %3840 = vmatprep.subr.bf16.mxu0 %v5648_v48  ;;  %v5697_v48 = vld [vmem:[#allocation7 + $0x340] ss:$16 sps:$4 sm:$0xff]  }
 0xaf8   :  { %3841 = vmatpush1.bf16.msra.mxu0 %v5646_v50  ;;  %v5705_v50 = vld [vmem:[#allocation7 + $0x324] ss:$16 sps:$4 sm:$0xff]  }
 0xaf9   :  { %3842 = vmatprep.subr.bf16.mxu0 %v5654_v47  ;;  %v5703_v47 = vld [vmem:[#allocation7 + $0x320] ss:$16 sps:$4 sm:$0xff]  }
 0xafc   :  { %3843 = vmatpush1.bf16.msra.mxu0 %v5652_v55  ;;  %v5711_v55 = vld [vmem:[#allocation7 + $0x304] ss:$16 sps:$4 sm:$0xff]  }
 0xafd   :  { %3844 = vmatprep.subr.bf16.mxu0 %v5660_v20  ;;  %v5709_v20 = vld [vmem:[#allocation7 + $0x300] ss:$16 sps:$4 sm:$0xff]  }
 0xb00   :  { %3845 = vmatpush1.bf16.msra.mxu0 %v5658_v56  ;;  %v5717_v56 = vld [vmem:[#allocation10 + $0x274] ss:$8 sps:$4 sm:$0xff]  }
 0xb01   :  { %3846 = vmatprep.subr.bf16.mxu0 %v5666_v58 }
 0xb04   :  { %3847 = vmatpush1.bf16.msra.mxu0 %v5664_v61 }
 0xb05   :  { %3848 = vmatprep.subr.bf16.mxu0 %v5672_v1 }
 0xba7   :  { %v3300_v4 = vpop.f32.mrf.mxu0 }
 0xba8   :  { %v6517_v8 = vadd.f32 %v5863_v7, %v3300_v4  ;;  %v5670_v4 = vld [vmem:[#allocation7 + $0x3e8] ss:$16 sps:$4 sm:$0xff]  }
 0xba9   :  { %v3302_v5 = vpop.f32.mrf.mxu0  ;;  %3849 = vmatpush2.bf16.msra.mxu0 %v5670_v4  ;;  %v4802_v4 = vld [vmem:[%s6665_s6 + $0x2] sm:$0x3] }
 0xbaa   :  { %v6519_v12 = vadd.f32 %v5864_v11, %v3302_v5  ;;  %v2176_v11 = vadd.f32 %v6451_v10, %v6442_v59  ;;  %3850 = vmatprep.subr.bf16.mxu0 %v5678_v25 }
 0xbab   :  { %v3304_v28 = vpop.f32.mrf.mxu0 }
 0xbac   :  { %v3317_v13 = vadd.f32 %v6519_v12, %v6517_v8  ;;  %v6523_v17 = vadd.f32 %v5865_v16, %v3304_v28  ;;  %v2219_v59 = vadd.f32 %v6500_v26, %v2176_v11 }
 0xbad   :  { %v3306_v15 = vpop.f32.mrf.mxu0  ;;  %3851 = vmatpush2.bf16.msra.mxu0 %v5676_v32 }
 0xbae   :  { %v6525_v19 = vadd.f32 %v5866_v18, %v3306_v15  ;;  %3318 = vadd.xlane.f32.xlu0 %v3317_v13  ;;  %v6561_v6 = vadd.f32 %v2219_v59, %v6363_v51  ;;  %v5681_v51 = vld [vmem:[#allocation7 + $0x3a4] ss:$16 sps:$4 sm:$0xff]   ;;  %3852 = vmatprep.subr.bf16.mxu0 %v5684_v33  ;;  %v5718_v33 = vld [vmem:[#allocation10 + $0x370] ss:$8 sps:$4 sm:$0xff]  }
 0xbaf   :  { %3809 = vmatprep.subr.bf16.mxu1 %v5681_v51  ;;  %v5715_v51 = vld [vmem:[#allocation10 + $0x270] ss:$8 sps:$4 sm:$0xff]  }
 0xbb0   :  { %v3320_v21 = vadd.f32 %v6525_v19, %v6523_v17  ;;  %3810 = vmatpush2.bf16.msra.mxu1 %v5679_v34  ;;  %v5726_v34 = vld [vmem:[#allocation10 + $0x364] ss:$8 sps:$4 sm:$0xff]  }
 0xbb1   :  { %3853 = vmatpush2.bf16.msra.mxu0 %v5682_v35  ;;  %v5721_v35 = vld [vmem:[#allocation10 + $0x260] ss:$8 sps:$4 sm:$0xff]  }
 0xbb2   :  { %3321 = vadd.xlane.f32.xlu1 %v3320_v21  ;;  %3854 = vmatprep.subr.bf16.mxu0 %v5690_v37  ;;  %v5727_v37 = vld [vmem:[#allocation10 + $0x250] ss:$8 sps:$4 sm:$0xff]  }
 0xbb5   :  { %3855 = vmatpush2.bf16.msra.mxu0 %v5688_v36  ;;  %v5732_v36 = vld [vmem:[#allocation10 + $0x354] ss:$8 sps:$4 sm:$0xff]  }
 0xbb6   :  { %3856 = vmatprep.subr.bf16.mxu0 %v5696_v39  ;;  %v5735_v39 = vld [vmem:[#allocation10 + $0x244] ss:$8 sps:$4 sm:$0xff]  }
 0xbb9   :  { %3857 = vmatpush2.bf16.msra.mxu0 %v5694_v43  ;;  %v5733_v43 = vld [vmem:[#allocation10 + $0x240] ss:$8 sps:$4 sm:$0xff]  }
 0xbba   :  { %3858 = vmatprep.subr.bf16.mxu0 %v5702_v45  ;;  %v5741_v45 = vld [vmem:[#allocation10 + $0x234] ss:$8 sps:$4 sm:$0xff]  }
 0xbbd   :  { %3859 = vmatpush2.bf16.msra.mxu0 %v5700_v49  ;;  %v5739_v49 = vld [vmem:[#allocation10 + $0x230] ss:$8 sps:$4 sm:$0xff]  }
 0xbbe   :  { %3860 = vmatprep.subr.bf16.mxu0 %v5708_v53  ;;  %v5747_v53 = vld [vmem:[#allocation10 + $0x224] ss:$8 sps:$4 sm:$0xff]  }
 0xbc1   :  { %3861 = vmatpush2.bf16.msra.mxu0 %v5706_v54  ;;  %v5745_v54 = vld [vmem:[#allocation10 + $0x220] ss:$8 sps:$4 sm:$0xff]  }
 0xbc2   :  { %3862 = vmatprep.subr.bf16.mxu0 %v5714_v14  ;;  %v5753_v14 = vld [vmem:[#allocation10 + $0x214] ss:$8 sps:$4 sm:$0xff]  }
 0xbc5   :  { %3863 = vmatpush2.bf16.msra.mxu0 %v5712_v46  ;;  %v5751_v46 = vld [vmem:[#allocation10 + $0x210] ss:$8 sps:$4 sm:$0xff]  }
 0xbc6   :  { %4328 = vmatprep.subr.bf16.mxu0 %v5720_v57  ;;  %v5759_v57 = vld [vmem:[#allocation10 + $0x204] ss:$8 sps:$4 sm:$0xff]  }
 0xc37   :  { %v3319_v5 = vpop.xlane.xlu0 %3318 }
 0xc38   :  { %v3323_v7 = vmul.f32 0.00390625, %v3319_v5 }
 0xc3a   :  { %v6532_v28 = vsub.f32 %v6517_v8, %v3323_v7  ;;  %v6535_v13 = vsub.f32 %v6519_v12, %v3323_v7  ;;  %v3316_v7 = vld [vmem:[#allocation5 + $0x2] sm:$0x3] }
 0xc3b   :  { %v3322_v15 = vpop.xlane.xlu1 %3321  ;;  %v3368_v59 = vrot.slane %v3316_v7, %v6345_v29 }
 0xc3c   :  { %v3324_v16 = vmul.f32 0.00390625, %v3322_v15  ;;  %v3329_v18 = vmul.f32 %v6532_v28, %v6532_v28  ;;  %v3330_v21 = vmul.f32 %v6535_v13, %v6535_v13  ;;  %v3353_v15 = vrot.slane %v4802_v4, %v6345_v29 }
 0xc3e   :  { %v6547_v10 = vsub.f32 %v6523_v17, %v3324_v16  ;;  %v6550_v8 = vsub.f32 %v6525_v19, %v3324_v16  ;;  %v3333_v12 = vadd.f32 %v3330_v21, %v3329_v18  ;;  %v2227_v17 = vadd.f32 %v6543_v22, %v6554_v23 }
 0xc3f   :  { %v6567_v19 = vadd.f32 %v6449_v9, %v6367_v40  ;;  %v5685_v40 = vld [vmem:[#allocation7 + $0x380] ss:$16 sps:$4 sm:$0xff]   ;;  %v5687_v9 = vld [vmem:[#allocation7 + $0x384] ss:$16 sps:$4 sm:$0xff]   ;;  %v3357_v16 = vrot.slane %v4802_v4, %v6348_v30 }
 0xc40   :  { %3334 = vadd.xlane.f32.xlu0 %v3333_v12  ;;  %v3331_v24 = vmul.f32 %v6547_v10, %v6547_v10  ;;  %v3332_v41 = vmul.f32 %v6550_v8, %v6550_v8  ;;  %3811 = vmatprep.subr.bf16.mxu1 %v5687_v9  ;;  %v3372_v12 = vrot.slane %v3316_v7, %v6348_v30  ;;  %v5729_v9 = vld [vmem:[#allocation10 + $0x254] ss:$8 sps:$4 sm:$0xff]   ;;  %v5766_v4 = vld [vmem:[#allocation10 + $0x3f0] ss:$8 sps:$4 sm:$0xff]   ;;  %v5774_v7 = vld [vmem:[#allocation10 + $0x3e4] ss:$8 sps:$4 sm:$0xff]  }
 0xc41   :  { %v2230_v52 = vadd.f32 %v6561_v6, %v6567_v19  ;;  %3812 = vmatpush2.bf16.msra.mxu1 %v5685_v40  ;;  %v5724_v40 = vld [vmem:[#allocation10 + $0x360] ss:$8 sps:$4 sm:$0xff]  }
 0xc42   :  { %v3336_v26 = vadd.f32 %v3332_v41, %v3331_v24  ;;  %3813 = vmatprep.subr.bf16.mxu1 %v5693_v38  ;;  %v5730_v38 = vld [vmem:[#allocation10 + $0x350] ss:$8 sps:$4 sm:$0xff]  }
 0xc44   :  { %3337 = vadd.xlane.f32.xlu1 %v3336_v26  ;;  %2228 = vadd.xlane.f32.xlu0 %v2227_v17 }
 0xc45   :  { %3814 = vmatpush2.bf16.msra.mxu1 %v5691_v42  ;;  %v5738_v42 = vld [vmem:[#allocation10 + $0x344] ss:$8 sps:$4 sm:$0xff]  }
 0xc46   :  { %3815 = vmatprep.subr.bf16.mxu1 %v5699_v44  ;;  %v5736_v44 = vld [vmem:[#allocation10 + $0x340] ss:$8 sps:$4 sm:$0xff]  }
 0xc48   :  { %2231 = vadd.xlane.f32.xlu1 %v2230_v52 }
 0xc49   :  { %3816 = vmatpush2.bf16.msra.mxu1 %v5697_v48  ;;  %v5744_v48 = vld [vmem:[#allocation10 + $0x334] ss:$8 sps:$4 sm:$0xff]  }
 0xc4a   :  { %3817 = vmatprep.subr.bf16.mxu1 %v5705_v50  ;;  %v5742_v50 = vld [vmem:[#allocation10 + $0x330] ss:$8 sps:$4 sm:$0xff]  }
 0xc4d   :  { %3818 = vmatpush2.bf16.msra.mxu1 %v5703_v47  ;;  %v5750_v47 = vld [vmem:[#allocation10 + $0x324] ss:$8 sps:$4 sm:$0xff]  }
 0xc4e   :  { %3819 = vmatprep.subr.bf16.mxu1 %v5711_v55  ;;  %v5748_v55 = vld [vmem:[#allocation10 + $0x320] ss:$8 sps:$4 sm:$0xff]  }
 0xc51   :  { %3820 = vmatpush2.bf16.msra.mxu1 %v5709_v20  ;;  %v5756_v20 = vld [vmem:[#allocation10 + $0x314] ss:$8 sps:$4 sm:$0xff]  }
 0xc52   :  { %4285 = vmatprep.subr.bf16.mxu1 %v5717_v56  ;;  %v5754_v56 = vld [vmem:[#allocation10 + $0x310] ss:$8 sps:$4 sm:$0xff]  }
 0xcc9   :  { %v3335_v58 = vpop.xlane.xlu0 %3334 }
 0xcca   :  { %v3339_v60 = vmul.f32 0.00390625, %v3335_v58  ;;  %v5762_v58 = vld [vmem:[#allocation10 + $0x304] ss:$8 sps:$4 sm:$0xff]  }
 0xccc   :  { %v3341_v61 = vadd.f32 1e-05, %v3339_v60  ;;  %v5757_v60 = vld [vmem:[#allocation10 + $0x200] ss:$8 sps:$4 sm:$0xff]  }
 0xccd   :  { %v3338_v0 = vpop.xlane.xlu1 %3337 }
 0xcce   :  { %5847 = vrsqrt.f32 %v3341_v61  ;;  %v3340_v1 = vmul.f32 0.00390625, %v3338_v0  ;;  %v5760_v61 = vld [vmem:[#allocation10 + $0x300] ss:$8 sps:$4 sm:$0xff]   ;;  %v5765_v0 = vld [vmem:[#allocation10 + $0x2f4] ss:$8 sps:$4 sm:$0xff]  }
 0xcd0   :  { %v3342_v2 = vadd.f32 1e-05, %v3340_v1  ;;  %v5768_v1 = vld [vmem:[#allocation10 + $0x3f4] ss:$8 sps:$4 sm:$0xff]  }
 0xcd2   :  { %5849 = vrsqrt.f32 %v3342_v2  ;;  %v5763_v2 = vld [vmem:[#allocation10 + $0x2f0] ss:$8 sps:$4 sm:$0xff]  }
 0xcdb   :  { %v5848_v5 = vpop.eup %5847 }
 0xcdc   :  { %v3346_v11 = vmul.f32 %v5848_v5, %v6535_v13  ;;  %v3345_v18 = vmul.f32 %v5848_v5, %v6532_v28  ;;  %v5771_v5 = vld [vmem:[#allocation10 + $0x2e4] ss:$8 sps:$4 sm:$0xff]  }
 0xcde   :  { %v3361_v41 = vmul.f32 %v3357_v16, %v3346_v11  ;;  %v3360_v17 = vmul.f32 %v3353_v15, %v3345_v18  ;;  %v5769_v11 = vld [vmem:[#allocation10 + $0x2e0] ss:$8 sps:$4 sm:$0xff]   ;;  %v5780_v18 = vld [vmem:[#allocation10 + $0x3d4] ss:$8 sps:$4 sm:$0xff]  }
 0xcdf   :  { %v5850_v21 = vpop.eup %5849 }
 0xce0   :  { %v3348_v24 = vmul.f32 %v5850_v21, %v6550_v8  ;;  %v3347_v26 = vmul.f32 %v5850_v21, %v6547_v10  ;;  %v6582_v13 = vadd.f32 %v3372_v12, %v3361_v41  ;;  %v6586_v31 = vadd.f32 %v3368_v59, %v3360_v17  ;;  %v5723_v10 = vld [vmem:[#allocation10 + $0x264] ss:$8 sps:$4 sm:$0xff]   ;;  %v5775_v21 = vld [vmem:[#allocation10 + $0x2d0] ss:$8 sps:$4 sm:$0xff]   ;;  %v5781_v41 = vld [vmem:[#allocation10 + $0x2c0] ss:$8 sps:$4 sm:$0xff]  }
 0xce1   :  { %v5789_v17 = vld [vmem:[#allocation10 + $0x2b4] ss:$8 sps:$4 sm:$0xff]  }
 0xce2   :  { %v3363_v52 = vmul.f32 %v3357_v16, %v3348_v24  ;;  %v3362_v3 = vmul.f32 %v3353_v15, %v3347_v26  ;;  %v5772_v15 = vld [vmem:[#allocation10 + $0x3e0] ss:$8 sps:$4 sm:$0xff]   ;;  %v5777_v16 = vld [vmem:[#allocation10 + $0x2d4] ss:$8 sps:$4 sm:$0xff]   ;;  %v5786_v24 = vld [vmem:[#allocation10 + $0x3c4] ss:$8 sps:$4 sm:$0xff]  }
 0xce3   :  { %v5784_v26 = vld [vmem:[#allocation10 + $0x3c0] ss:$8 sps:$4 sm:$0xff]  }
 0xce4   :  { %v6584_v25 = vadd.f32 %v3372_v12, %v3363_v52  ;;  %v6588_v28 = vadd.f32 %v3368_v59, %v3362_v3  ;;  %v5778_v59 = vld [vmem:[#allocation10 + $0x3d0] ss:$8 sps:$4 sm:$0xff]   ;;  %v5783_v12 = vld [vmem:[#allocation10 + $0x2c4] ss:$8 sps:$4 sm:$0xff]   ;;  %v5792_v52 = vld [vmem:[#allocation10 + $0x3b4] ss:$8 sps:$4 sm:$0xff]  }
 0xce5   :  { %v5787_v3 = vld [vmem:[#allocation10 + $0x2b0] ss:$8 sps:$4 sm:$0xff]  }
 0xce6   :  { %v3380_v32 = vpack.c.bf16 %v6584_v25, %v6582_v13  ;;  %v3379_v8 = vpack.c.bf16 %v6588_v28, %v6586_v31 }
 0xce8   :  { %3821 = vmatprep.mubr.bf16.mxu1 %v3380_v32  ;;  %3864 = vmatprep.mubr.bf16.mxu0 %v3380_v32  ;;  %v5790_v32 = vld [vmem:[#allocation10 + $0x3b0] ss:$8 sps:$4 sm:$0xff]  }
 0xce9   :  { %3822 = vmatmul.mubr.bf16.vlgmr.msra.gmra.mxu1 %v3379_v8  ;;  %3865 = vmatmul.mubr.bf16.vlgmr.msra.gmra.mxu0 %v3379_v8  ;;  %v5795_v8 = vld [vmem:[#allocation10 + $0x2a4] ss:$8 sps:$4 sm:$0xff]  }
 0xcea   :  { %4286 = vmatpush1.bf16.msra.mxu1 %v5715_v51  ;;  %4329 = vmatpush1.bf16.msra.mxu0 %v5718_v33  ;;  %v5798_v51 = vld [vmem:[#allocation10 + $0x3a4] ss:$8 sps:$4 sm:$0xff]   ;;  %v5793_v33 = vld [vmem:[#allocation10 + $0x2a0] ss:$8 sps:$4 sm:$0xff]  }
 0xceb   :  { %4287 = vmatprep.subr.bf16.mxu1 %v5723_v10  ;;  %4330 = vmatprep.subr.bf16.mxu0 %v5726_v34  ;;  %v5796_v10 = vld [vmem:[#allocation10 + $0x3a0] ss:$8 sps:$4 sm:$0xff]   ;;  %v5801_v34 = vld [vmem:[#allocation10 + $0x294] ss:$8 sps:$4 sm:$0xff]  }
 0xcee   :  { %4288 = vmatpush1.bf16.msra.mxu1 %v5721_v35  ;;  %4331 = vmatpush1.bf16.msra.mxu0 %v5724_v40  ;;  %v5804_v35 = vld [vmem:[#allocation10 + $0x394] ss:$8 sps:$4 sm:$0xff]   ;;  %v5799_v40 = vld [vmem:[#allocation10 + $0x290] ss:$8 sps:$4 sm:$0xff]  }
 0xcef   :  { %4289 = vmatprep.subr.bf16.mxu1 %v5729_v9  ;;  %4332 = vmatprep.subr.bf16.mxu0 %v5732_v36  ;;  %v5802_v9 = vld [vmem:[#allocation10 + $0x390] ss:$8 sps:$4 sm:$0xff]   ;;  %v5807_v36 = vld [vmem:[#allocation10 + $0x284] ss:$8 sps:$4 sm:$0xff]  }
 0xcf2   :  { %4290 = vmatpush1.bf16.msra.mxu1 %v5727_v37  ;;  %4333 = vmatpush1.bf16.msra.mxu0 %v5730_v38  ;;  %v5810_v37 = vld [vmem:[#allocation10 + $0x384] ss:$8 sps:$4 sm:$0xff]   ;;  %v5805_v38 = vld [vmem:[#allocation10 + $0x280] ss:$8 sps:$4 sm:$0xff]  }
 0xcf3   :  { %4291 = vmatprep.subr.bf16.mxu1 %v5735_v39  ;;  %4334 = vmatprep.subr.bf16.mxu0 %v5738_v42  ;;  %v5808_v39 = vld [vmem:[#allocation10 + $0x380] ss:$8 sps:$4 sm:$0xff]   ;;  %v3447_v42 = vld [vmem:[#allocation8 + $0x4] sm:$0xf] }
 0xcf6   :  { %4292 = vmatpush1.bf16.msra.mxu1 %v5733_v43  ;;  %4335 = vmatpush1.bf16.msra.mxu0 %v5736_v44 }
 0xcf7   :  { %4293 = vmatprep.subr.bf16.mxu1 %v5741_v45  ;;  %4336 = vmatprep.subr.bf16.mxu0 %v5744_v48  ;;  %v3456_v45 = vrot.slane %v3447_v42, %v6348_v30  ;;  %v3464_v48 = vrot.slane %v3447_v42, %v1315_v62 }
 0xcfa   :  { %4294 = vmatpush1.bf16.msra.mxu1 %v5739_v49  ;;  %4337 = vmatpush1.bf16.msra.mxu0 %v5742_v50  ;;  %v3452_v49 = vrot.slane %v3447_v42, %v6345_v29  ;;  %v3460_v50 = vrot.slane %v3447_v42, %v1311_v63 }
 0xcfb   :  { %4295 = vmatprep.subr.bf16.mxu1 %v5747_v53  ;;  %4338 = vmatprep.subr.bf16.mxu0 %v5750_v47 }
 0xcfe   :  { %4296 = vmatpush1.bf16.msra.mxu1 %v5745_v54  ;;  %4339 = vmatpush1.bf16.msra.mxu0 %v5748_v55 }
 0xcff   :  { %4297 = vmatprep.subr.bf16.mxu1 %v5753_v14  ;;  %4340 = vmatprep.subr.bf16.mxu0 %v5756_v20 }
 0xd02   :  { %4298 = vmatpush1.bf16.msra.mxu1 %v5751_v46  ;;  %4341 = vmatpush1.bf16.msra.mxu0 %v5754_v56 }
 0xd03   :  { %4299 = vmatprep.subr.bf16.mxu1 %v5759_v57  ;;  %4342 = vmatprep.subr.bf16.mxu0 %v5762_v58 }
 0xd06   :  { %4300 = vmatpush1.bf16.msra.mxu1 %v5757_v60  ;;  %4343 = vmatpush1.bf16.msra.mxu0 %v5760_v61 }
 0xd07   :  { %4301 = vmatprep.subr.bf16.mxu1 %v5765_v0  ;;  %4344 = vmatprep.subr.bf16.mxu0 %v5768_v1 }
 0xd0a   :  { %4302 = vmatpush2.bf16.msra.mxu1 %v5763_v2  ;;  %4345 = vmatpush2.bf16.msra.mxu0 %v5766_v4 }
 0xd0b   :  { %4303 = vmatprep.subr.bf16.mxu1 %v5771_v5  ;;  %4346 = vmatprep.subr.bf16.mxu0 %v5774_v7 }
 0xd0e   :  { %4304 = vmatpush2.bf16.msra.mxu1 %v5769_v11  ;;  %4347 = vmatpush2.bf16.msra.mxu0 %v5772_v15 }
 0xd0f   :  { %4305 = vmatprep.subr.bf16.mxu1 %v5777_v16  ;;  %4348 = vmatprep.subr.bf16.mxu0 %v5780_v18 }
 0xd12   :  { %4306 = vmatpush2.bf16.msra.mxu1 %v5775_v21  ;;  %4349 = vmatpush2.bf16.msra.mxu0 %v5778_v59  ;;  %v4867_v59 = vld [vmem:[%s6670_s11 + $0x2] sm:$0x3] }
 0xd13   :  { %4307 = vmatprep.subr.bf16.mxu1 %v5783_v12  ;;  %4350 = vmatprep.subr.bf16.mxu0 %v5786_v24  ;;  %v2229_v12 = vpop.xlane.xlu0 %2228  ;;  %v3958_v24 = vrot.slane %v4867_v59, %v6345_v29 }
 0xd16   :  { %4308 = vmatpush2.bf16.msra.mxu1 %v5781_v41  ;;  %4351 = vmatpush2.bf16.msra.mxu0 %v5784_v26  ;;  %v3962_v41 = vrot.slane %v4867_v59, %v6348_v30  ;;  %v2233_v26 = vmul.f32 0.00390625, %v2229_v12 }
 0xd17   :  { %4309 = vmatprep.subr.bf16.mxu1 %v5789_v17  ;;  %4352 = vmatprep.subr.bf16.mxu0 %v5792_v52 }
 0xd1a   :  { %4310 = vmatpush2.bf16.msra.mxu1 %v5787_v3  ;;  %4353 = vmatpush2.bf16.msra.mxu0 %v5790_v32  ;;  %v2232_v3 = vpop.xlane.xlu1 %2231 }
 0xd1b   :  { %4311 = vmatprep.subr.bf16.mxu1 %v5795_v8  ;;  %4354 = vmatprep.subr.bf16.mxu0 %v5798_v51 }
 0xd1e   :  { %4312 = vmatpush2.bf16.msra.mxu1 %v5793_v33  ;;  %4355 = vmatpush2.bf16.msra.mxu0 %v5796_v10 }
 0xd1f   :  { %4313 = vmatprep.subr.bf16.mxu1 %v5801_v34  ;;  %4356 = vmatprep.subr.bf16.mxu0 %v5804_v35  ;;  %v2235_v34 = vsub.f32 %v6554_v23, %v2233_v26  ;;  %v2236_v35 = vsub.f32 %v6543_v22, %v2233_v26 }
 0xd22   :  { %4314 = vmatpush2.bf16.msra.mxu1 %v5799_v40  ;;  %4357 = vmatpush2.bf16.msra.mxu0 %v5802_v9 }
 0xd23   :  { %4315 = vmatprep.subr.bf16.mxu1 %v5807_v36  ;;  %4358 = vmatprep.subr.bf16.mxu0 %v5810_v37  ;;  %v2234_v36 = vmul.f32 0.00390625, %v2232_v3 }
 0xd25   :  { %v2238_v23 = vsub.f32 %v6561_v6, %v2234_v36 }
 0xd26   :  { %4316 = vmatpush2.bf16.msra.mxu1 %v5805_v38  ;;  %4359 = vmatpush2.bf16.msra.mxu0 %v5808_v39 }
 0xda9   :  { %v3823_v43 = vpop.f32.mrf.mxu1  ;;  %v3866_v44 = vpop.f32.mrf.mxu0 }
 0xdaa   :  { %v3824_v57 = vadd.f32 %v3823_v43, %v3452_v49  ;;  %v3867_v58 = vadd.f32 %v3866_v44, %v3460_v50 }
 0xdab   :  { %v3825_v53 = vpop.f32.mrf.mxu1  ;;  %v3868_v47 = vpop.f32.mrf.mxu0 }
 0xdac   :  { %v3826_v14 = vadd.f32 %v3825_v53, %v3456_v45  ;;  %v3869_v20 = vadd.f32 %v3868_v47, %v3464_v48  ;;  %v3875_v7 = vmax.f32 %v3824_v57, 0.0  ;;  %v3877_v11 = vmax.f32 %v3867_v58, 0.0 }
 0xdad   :  { %v3827_v54 = vpop.f32.mrf.mxu1  ;;  %v3870_v55 = vpop.f32.mrf.mxu0  ;;  %v2237_v53 = vsub.f32 %v6567_v19, %v2234_v36 }
 0xdae   :  { %v3828_v46 = vadd.f32 %v3827_v54, %v3452_v49  ;;  %v3871_v56 = vadd.f32 %v3870_v55, %v3460_v50  ;;  %v3876_v4 = vmax.f32 %v3826_v14, 0.0  ;;  %v3878_v5 = vmax.f32 %v3869_v20, 0.0 }
 0xdaf   :  { %v3829_v60 = vpop.f32.mrf.mxu1  ;;  %v3872_v61 = vpop.f32.mrf.mxu0  ;;  %v2239_v49 = vmul.f32 %v2235_v34, %v2235_v34  ;;  %v2240_v50 = vmul.f32 %v2236_v35, %v2236_v35  ;;  %v2241_v20 = vmul.f32 %v2237_v53, %v2237_v53 }
 0xdb0   :  { %v3830_v0 = vadd.f32 %v3829_v60, %v3456_v45  ;;  %v3873_v1 = vadd.f32 %v3872_v61, %v3464_v48  ;;  %v3879_v62 = vmax.f32 %v3828_v46, 0.0  ;;  %v3881_v2 = vmax.f32 %v3871_v56, 0.0 }
 0xdb2   :  { %v3880_v27 = vmax.f32 %v3830_v0, 0.0  ;;  %v3882_v63 = vmax.f32 %v3873_v1, 0.0  ;;  %v3883_v18 = vpack.c.bf16 %v3879_v62, %v3875_v7  ;;  %v3885_v21 = vpack.c.bf16 %v3881_v2, %v3877_v11 }
 0xdb4   :  { %v3884_v15 = vpack.c.bf16 %v3880_v27, %v3876_v4  ;;  %v3886_v16 = vpack.c.bf16 %v3882_v63, %v3878_v5 }
 0xdb6   :  { %4317 = vmatprep.mubr.bf16.mxu1 %v3884_v15  ;;  %4360 = vmatprep.mubr.bf16.mxu0 %v3886_v16  ;;  %v2225_v16 = vld [vmem:[%s6671_s12] sm:$0x3] }
 0xdb7   :  { %4318 = vmatmul.mubr.bf16.vlgmr.msra.gmra.mxu1 %v3883_v18  ;;  %4361 = vmatmul.mubr.bf16.vlgmr.msra.gmra.mxu0 %v3885_v21  ;;  %v2226_v18 = vld [vmem:[#allocation11] sm:$0x3]  ;;  %v2263_v21 = vrot.slane %v2225_v16, %v6345_v29  ;;  %v2267_v59 = vrot.slane %v2225_v16, %v6348_v30 }
 0xe77   :  { %v4319_v17 = vpop.f32.mrf.mxu1  ;;  %v4362_v52 = vpop.f32.mrf.mxu0 }
 0xe78   :  { %v4320_v32 = vadd.f32 %v4319_v17, %v3958_v24 }
 0xe79   :  { %v4321_v8 = vpop.f32.mrf.mxu1  ;;  %v4364_v51 = vpop.f32.mrf.mxu0 }
 0xe7a   :  { %v4363_v33 = vadd.f32 %v4362_v52, %v4320_v32  ;;  %v4322_v10 = vadd.f32 %v4321_v8, %v3962_v41 }
 0xe7b   :  { %v4323_v40 = vpop.f32.mrf.mxu1  ;;  %v4366_v9 = vpop.f32.mrf.mxu0 }
 0xe7c   :  { %v4365_v37 = vadd.f32 %v4364_v51, %v4322_v10  ;;  %v4324_v38 = vadd.f32 %v4323_v40, %v3958_v24  ;;  %v4371_v42 = vadd.f32 %v4363_v33, %v6586_v31  ;;  %v2243_v31 = vadd.f32 %v2240_v50, %v2239_v49 }
 0xe7d   :  { %v4325_v39 = vpop.f32.mrf.mxu1  ;;  %v4368_v48 = vpop.f32.mrf.mxu0  ;;  %v2278_v24 = vrot.slane %v2226_v18, %v6345_v29 }
 0xe7e   :  { %v4372_v43 = vadd.f32 %v4365_v37, %v6582_v13  ;;  %v4367_v44 = vadd.f32 %v4366_v9, %v4324_v38  ;;  %v4326_v45 = vadd.f32 %v4325_v39, %v3962_v41  ;;  %v2242_v13 = vmul.f32 %v2238_v23, %v2238_v23 }
 0xe7f   :  { %v2282_v41 = vrot.slane %v2226_v18, %v6348_v30 }
 0xe80   :  { %v4369_v22 = vadd.f32 %v4368_v48, %v4326_v45  ;;  %v4379_v47 = vadd.f32 %v4372_v43, %v4371_v42  ;;  %v4373_v54 = vadd.f32 %v4367_v44, %v6588_v28  ;;  %v2246_v46 = vadd.f32 %v2242_v13, %v2241_v20 }
 0xe82   :  { %v4374_v55 = vadd.f32 %v4369_v22, %v6584_v25  ;;  %4380 = vadd.xlane.f32.xlu0 %v4379_v47 }
 0xe84   :  { %v4382_v14 = vadd.f32 %v4374_v55, %v4373_v54 }
 0xe86   :  { %4383 = vadd.xlane.f32.xlu1 %v4382_v14  ;;  %2244 = vadd.xlane.f32.xlu0 %v2243_v31 }
 0xe8a   :  { %2247 = vadd.xlane.f32.xlu1 %v2246_v46 }
 0xf0b   :  { %v4381_v56 = vpop.xlane.xlu0 %4380 }
 0xf0c   :  { %v4385_v57 = vmul.f32 0.00390625, %v4381_v56 }
 0xf0e   :  { %v6613_v19 = vsub.f32 %v4371_v42, %v4385_v57  ;;  %v6615_v6 = vsub.f32 %v4372_v43, %v4385_v57 }
 0xf0f   :  { %v4384_v58 = vpop.xlane.xlu1 %4383  ;;  %v2245_v60 = vpop.xlane.xlu0 %2244 }
 0xf10   :  { %v4386_v28 = vmul.f32 0.00390625, %v4384_v58  ;;  %v2249_v61 = vmul.f32 0.00390625, %v2245_v60  ;;  %v4391_v25 = vmul.f32 %v6613_v19, %v6613_v19  ;;  %v4392_v0 = vmul.f32 %v6615_v6, %v6615_v6 }
 0xf12   :  { %v6621_v1 = vsub.f32 %v4373_v54, %v4386_v28  ;;  %v6623_v62 = vsub.f32 %v4374_v55, %v4386_v28  ;;  %v2251_v2 = vadd.f32 1e-05, %v2249_v61  ;;  %v4395_v4 = vadd.f32 %v4392_v0, %v4391_v25 }
 0xf13   :  { %v2248_v5 = vpop.xlane.xlu1 %2247 }
 0xf14   :  { %5851 = vrsqrt.f32 %v2251_v2  ;;  %v2250_v27 = vmul.f32 0.00390625, %v2248_v5  ;;  %4396 = vadd.xlane.f32.xlu0 %v4395_v4  ;;  %v4393_v63 = vmul.f32 %v6621_v1, %v6621_v1  ;;  %v4394_v7 = vmul.f32 %v6623_v62, %v6623_v62 }
 0xf16   :  { %v2252_v11 = vadd.f32 1e-05, %v2250_v27  ;;  %v4398_v15 = vadd.f32 %v4394_v7, %v4393_v63 }
 0xf18   :  { %5853 = vrsqrt.f32 %v2252_v11  ;;  %4399 = vadd.xlane.f32.xlu1 %v4398_v15 }
 0xf21   :  { %v5852_v12 = vpop.eup %5851 }
 0xf22   :  { %v2255_v26 = vmul.f32 %v5852_v12, %v2235_v34  ;;  %v2256_v17 = vmul.f32 %v5852_v12, %v2236_v35 }
 0xf24   :  { %v2270_v52 = vmul.f32 %v2263_v21, %v2255_v26  ;;  %v2271_v3 = vmul.f32 %v2267_v59, %v2256_v17 }
 0xf25   :  { %v5854_v32 = vpop.eup %5853 }
 0xf26   :  { %v2285_v8 = vadd.f32 %v2278_v24, %v2270_v52  ;;  %v2286_v51 = vadd.f32 %v2282_v41, %v2271_v3  ;;  %v2257_v33 = vmul.f32 %v5854_v32, %v2237_v53  ;;  %v2258_v10 = vmul.f32 %v5854_v32, %v2238_v23 }
 0xf28   :  { %2289 = vst [vmem:[#allocation14] sm:$0xff] %v2285_v8  ;;  %2290 = vst [vmem:[#allocation14 + $0x8] sm:$0xff] %v2286_v51  ;;  %v2272_v40 = vmul.f32 %v2263_v21, %v2257_v33  ;;  %v2273_v9 = vmul.f32 %v2267_v59, %v2258_v10 }
 0xf2a   :  { %v2287_v36 = vadd.f32 %v2278_v24, %v2272_v40  ;;  %v2288_v37 = vadd.f32 %v2282_v41, %v2273_v9 }
 0xf2c   :  { %2291 = vst [vmem:[#allocation14 + $0x10] sm:$0xff] %v2287_v36  ;;  %2292 = vst [vmem:[#allocation14 + $0x18] sm:$0xff] %v2288_v37 }
 0xf2d   :  { %5998 = shalt.err (!%p5995_p6)
}
 0xf2e   :  { %4457 = dma.vmem_to_hbm [thread:$0]  %s4452_s30, 512, %s6673_s14, [#allocation4], %s6049_s27, %s6049_s27, %s6050_s28   ;;  %v4378_v45 = vld [vmem:[#allocation11 + $0x2] sm:$0x3] }
 0xf2f   :  { %v4932_v44 = vld [vmem:[%s6671_s12 + $0x2] sm:$0x3]  ;;  %v4430_v53 = vrot.slane %v4378_v45, %v6345_v29  ;;  %v4434_v23 = vrot.slane %v4378_v45, %v6348_v30  ;;  %s6056_s12 = smov [#allocation14]  }
 0xf30   :  { %v4415_v48 = vrot.slane %v4932_v44, %v6345_v29  ;;  %v4419_v49 = vrot.slane %v4932_v44, %v6348_v30  ;;  %s4463_s14 = sshll.u32 %s6056_s12, 4  ;;  %s4464_s14 = int_to_ptr.vmem [resolvable:$true] %s4463_s14 }
 0xf31   :  { %s6007_s7 = scalar_lea.vmem %s4464_s14, 1024  ;;  %p6012_p8 = scmp.lt.s32.totalorder %s4464_s14, %s4464_s14 }
 0xf32   :  { %p6008_p7 = scmp.ne.s32.totalorder %s4464_s14, %s6007_s7  ;;  %p6013_p9 = scmp.lt.s32.totalorder %s6007_s7, %s6007_s7 }
 0xf34   :  { %p6014_p10 = por %p6013_p9, %p6012_p8 }
 0xf36   :  { %p6015_p11 = pnand %p6014_p10, %p6008_p7 }
 0xf9d   :  { %v4397_v34 = vpop.xlane.xlu0 %4396 }
 0xf9e   :  { %v4401_v35 = vmul.f32 0.00390625, %v4397_v34 }
 0xfa0   :  { %v4403_v38 = vadd.f32 1e-05, %v4401_v35 }
 0xfa1   :  { %v4400_v39 = vpop.xlane.xlu1 %4399 }
 0xfa2   :  { %5855 = vrsqrt.f32 %v4403_v38  ;;  %v4402_v42 = vmul.f32 0.00390625, %v4400_v39 }
 0xfa4   :  { %v4404_v43 = vadd.f32 1e-05, %v4402_v42 }
 0xfa6   :  { %5857 = vrsqrt.f32 %v4404_v43 }
 0xfaf   :  { %v5856_v50 = vpop.eup %5855 }
 0xfb0   :  { %v4407_v22 = vmul.f32 %v5856_v50, %v6613_v19  ;;  %v4408_v47 = vmul.f32 %v5856_v50, %v6615_v6 }
 0xfb2   :  { %v4422_v54 = vmul.f32 %v4415_v48, %v4407_v22  ;;  %v4423_v55 = vmul.f32 %v4419_v49, %v4408_v47 }
 0xfb3   :  { %v5858_v14 = vpop.eup %5857 }
 0xfb4   :  { %v4437_v31 = vadd.f32 %v4430_v53, %v4422_v54  ;;  %v4438_v20 = vadd.f32 %v4434_v23, %v4423_v55  ;;  %v4409_v13 = vmul.f32 %v5858_v14, %v6621_v1  ;;  %v4410_v46 = vmul.f32 %v5858_v14, %v6623_v62 }
 0xfb6   :  { %4442 = vst [vmem:[#allocation14 + $0x20] sm:$0xff] %v4437_v31  ;;  %4443 = vst [vmem:[#allocation14 + $0x28] sm:$0xff] %v4438_v20  ;;  %v4424_v29 = vmul.f32 %v4415_v48, %v4409_v13  ;;  %v4425_v56 = vmul.f32 %v4419_v49, %v4410_v46 }
 0xfb8   :  { %v4439_v30 = vadd.f32 %v4430_v53, %v4424_v29  ;;  %v4440_v57 = vadd.f32 %v4434_v23, %v4425_v56 }
 0xfba   :  { %4444 = vst [vmem:[#allocation14 + $0x30] sm:$0xff] %v4439_v30  ;;  %4445 = vst [vmem:[#allocation14 + $0x38] sm:$0xff] %v4440_v57 }
 0xfbb   :  { %6018 = shalt.err (!%p6015_p11)
}
 0xfbc   :  { %4469 = dma.vmem_to_hbm [thread:$0]  %s4464_s14, 1024, %s6674_s15, [#allocation15], %s6049_s27, %s6049_s27, %s6050_s28  }
 0xfbd   :  { %6035 = dma.done.wait [#allocation4], 512  }
 0xfbe   :  { %6036 = vsyncadd [#allocation4], 4294966784 }
 0xfbf   :  { %6037 = dma.done.wait [#allocation15], 1024  }
 0xfc0   :  { %6038 = vsyncadd [#allocation15], 4294966272 }
 0xfc1   :  { %4476 = vsyncpa [#allocation3], 1 }
 0xfc2   :  { %4477 = vsyncpa [#allocation6], 1 }
 0xfc3   :  { %4478 = vsyncpa [#allocation9], 1 }
 0xfc4   :  { %4479 = vsyncpa [#allocation12], 1 }
 0xfc5   :  { %4480 = vsyncpa [#allocation4], 1 }
 0xfc6   :  { %4481 = vsyncpa [#allocation15], 1 }

</bundles_post_ra>
